<compile_context>
chip_gen: v5e
topology: v5e:2x2
jax: 0.10.0
libtpu: 0.0.40
codegen_flags: <defaults>
</compile_context>

<pallas_src>
import jax
import jax.numpy as jnp
from jax.experimental import pallas as pl
from jax.experimental.pallas import tpu as pltpu

# ----------------------- model dimensions (small, synthetic) -----------------------
B, S = 2, 8              # batch, sequence length
V, P, TT = 100, 32, 2    # vocab size, max positions, token-type vocab
H = 128                  # "bert" hidden size
NH, DH = 2, 64           # attention heads, head dim (NH * DH == H)
FF = 256                 # FFN intermediate size
NLAYERS = 2              # transformer layers
HD = 32                  # LSTM hidden_dim
NCLS = 2                 # num_classes
LN_EPS = 1e-12

# ---- packed bias / LayerNorm slab layout: one (NGROWS + NLAYERS*LROWS, VW) f32 array
VW = 3 * H                               # slab width (widest vector = bqkv)
R_EMB_G, R_EMB_B, R_BIH, R_CLSB = 0, 1, 2, 3
NGROWS = 4
LROWS = 8                                # per-layer rows: bqkv, bo, b1, b2, ln1g, ln1b, ln2g, ln2b


def _layer_norm(x, g, b):
    mu = jnp.mean(x, axis=-1, keepdims=True)
    var = jnp.mean(jnp.square(x - mu), axis=-1, keepdims=True)
    return (x - mu) * jax.lax.rsqrt(var + LN_EPS) * g + b


# ============================ the single fused kernel ==============================

def _fused_forward_kernel(
        ids_ref, mask_ref,                      # data (SMEM / VMEM)
        word_emb_ref, pos_type_ref, vecs_ref,   # embeddings + packed small vectors
        wqkv_ref, wo_ref, w1_ref, w2_ref,       # per-layer bf16 weight stacks
        wih_ref, whh_ref, clsw_ref,             # LSTM + classifier weights
        logits_ref,                             # output
        emb_scr, ctx_scr, xp_scr):              # VMEM scratch
    # ------------------ in-kernel token embedding gather (VMEM resident) -----------
    for bb in range(B):
        for ss in range(S):
            tok = ids_ref[bb, ss]
            emb_scr[bb * S + ss: bb * S + ss + 1, :] = (
                word_emb_ref[pl.ds(tok, 1), :] + pos_type_ref[ss:ss + 1, :])

    emb_g = vecs_ref[R_EMB_G:R_EMB_G + 1, 0:H]
    emb_b = vecs_ref[R_EMB_B:R_EMB_B + 1, 0:H]
    x = _layer_norm(emb_scr[...], emb_g, emb_b)                         # (B*S, H) f32

    # additive attention-mask bias, shared by all layers / heads: (B*NH, 1, S)
    mask_f = mask_ref[...].astype(jnp.float32)                          # (B, S)
    bias2 = (1.0 - mask_f) * (-10000.0)
    bias3 = jnp.stack([bias2[bb:bb + 1, :] for bb in range(B) for _ in range(NH)],
                      axis=0)                                           # (B*NH, 1, S)

    def split_heads(m):                          # (B*S, H) -> (B*NH, S, DH), static slices
        return jnp.stack([m[bb * S:(bb + 1) * S, hi * DH:(hi + 1) * DH]
                          for bb in range(B) for hi in range(NH)], axis=0)

    # --------------------- transformer encoder (statically unrolled) ---------------
    for l in range(NLAYERS):
        base = NGROWS + l * LROWS
        bqkv = vecs_ref[base + 0:base + 1, 0:3 * H]
        bo = vecs_ref[base + 1:base + 2, 0:H]
        b1 = vecs_ref[base + 2:base + 3, 0:FF]
        b2 = vecs_ref[base + 3:base + 4, 0:H]
        ln1g = vecs_ref[base + 4:base + 5, 0:H]
        ln1b = vecs_ref[base + 5:base + 6, 0:H]
        ln2g = vecs_ref[base + 6:base + 7, 0:H]
        ln2b = vecs_ref[base + 7:base + 8, 0:H]

        # one wide QKV matmul: (16,128)bf16 @ (128,384)bf16 -> f32.  Scale 1/sqrt(DH)
        # is already folded into the Q columns at prep time.
        qkv = jnp.dot(x.astype(jnp.bfloat16), wqkv_ref[l],
                      preferred_element_type=jnp.float32) + bqkv        # (B*S, 3H)
        q3 = split_heads(qkv[:, 0:H])
        k3 = split_heads(qkv[:, H:2 * H])
        v3 = split_heads(qkv[:, 2 * H:3 * H])

        # all B*NH heads in one batched matmul + ONE softmax pass
        s3 = jnp.einsum('bqd,bkd->bqk', q3, k3,
                        preferred_element_type=jnp.float32) + bias3     # (B*NH, S, S)
        s3 = s3 - jnp.max(s3, axis=-1, keepdims=True)
        p3 = jnp.exp(s3)
        p3 = p3 * pl.reciprocal(jnp.sum(p3, axis=-1, keepdims=True), approx=True)
        ctx3 = jnp.einsum('bqk,bkd->bqd', p3, v3,
                          preferred_element_type=jnp.float32)           # (B*NH, S, DH)

        # per-head PV blocks written at static offsets into a VMEM scratch (no concats)
        for bb in range(B):
            for hi in range(NH):
                ctx_scr[bb * S:(bb + 1) * S, hi * DH:(hi + 1) * DH] = ctx3[bb * NH + hi]

        attn = jnp.dot(ctx_scr[...].astype(jnp.bfloat16), wo_ref[l],
                       preferred_element_type=jnp.float32) + bo
        x = _layer_norm(attn + x, ln1g, ln1b)
        # TODO(synk): HF BERT uses exact erf-GELU; tanh approximation used here.
        ff = jax.nn.gelu(jnp.dot(x.astype(jnp.bfloat16), w1_ref[l],
                                 preferred_element_type=jnp.float32) + b1,
                         approximate=True)
        ff = jnp.dot(ff.astype(jnp.bfloat16), w2_ref[l],
                     preferred_element_type=jnp.float32) + b2
        x = _layer_norm(ff + x, ln2g, ln2b)

    # ------------------------------ bidirectional LSTM -----------------------------
    # Input projection for BOTH directions / all gates hoisted out of the recurrence:
    # (16,128)bf16 @ (128,256)bf16 -> (16, 8*HD) f32, stored once into a scratch so each
    # step reads contiguous static time slices.
    b_ih = vecs_ref[R_BIH:R_BIH + 1, 0:8 * HD]
    xproj = jnp.dot(x.astype(jnp.bfloat16), wih_ref[...],
                    preferred_element_type=jnp.float32) + b_ih          # (B*S, 8*HD)
    xp_scr[...] = xproj.reshape(B, S, 8 * HD)

    # lane mask: even HD-blocks = forward-direction columns, odd = backward
    lane = jax.lax.broadcasted_iota(jnp.int32, (1, 8 * HD), 1)
    is_fwd = (lane & HD) == 0                                           # HD is a power of 2

    whh = whh_ref[...]                                                  # (2HD, 8HD) bf16
    h = jnp.zeros((B, 2 * HD), jnp.float32)                             # [h_fwd | h_bwd]
    c = jnp.zeros((B, 2 * HD), jnp.float32)
    hsum = jnp.zeros((B, 2 * HD), jnp.float32)

    for t in range(S):
        # fwd direction consumes time t, bwd direction consumes time S-1-t
        x_t = jnp.where(is_fwd, xp_scr[:, t, :], xp_scr[:, S - 1 - t, :])   # (B, 8HD)
        pre = x_t + jnp.dot(h.astype(jnp.bfloat16), whh,
                            preferred_element_type=jnp.float32)             # (B, 8HD)
        # ONE EUP op for all gates: g-gate columns pre-scaled x2 so tanh(0.5*pre) is
        # exact tanh for the cell candidate and 0.5*t+0.5 is exact sigmoid for i/f/o.
        tg = jnp.tanh(0.5 * pre)
        i_g = 0.5 * tg[:, 0:2 * HD] + 0.5
        f_g = 0.5 * tg[:, 2 * HD:4 * HD] + 0.5
        g_g = tg[:, 4 * HD:6 * HD]
        o_g = 0.5 * tg[:, 6 * HD:8 * HD] + 0.5
        c = f_g * c + i_g * g_g
        h = o_g * jnp.tanh(c)
        hsum = hsum + h

    # mean-pool over the full sequence (matches torch.mean(lstm_out, dim=1)) + classify
    pooled = hsum * (1.0 / S)                                           # (B, 2*HD)
    cls_b = vecs_ref[R_CLSB:R_CLSB + 1, 0:NCLS]
    # TODO(synk): nn.Dropout(0.3) treated as identity (eval mode); training dropout is stochastic.
    logits_ref[...] = jnp.dot(pooled, clsw_ref[...],
                              preferred_element_type=jnp.float32) + cls_b


# =============================== pallas_call wrapper ===============================

def bert_lstm_classifier(kp, input_ids, attention_mask):
    # Everything (gather, mask bias, encoder, LSTM, pooling, classifier) runs inside one
    # gridless pallas_call; total VMEM footprint < 1 MB.
    # TODO(synk): a parallel batch grid would use v7x's 2nd TensorCore, not worth it at B=2.
    args = (input_ids, attention_mask,
            kp["word_emb"], kp["pos_type"], kp["vecs"],
            kp["wqkv"], kp["wo"], kp["w1"], kp["w2"],
            kp["w_ih"], kp["w_hh"], kp["cls_w"])
    in_specs = ([pl.BlockSpec(memory_space=pltpu.MemorySpace.SMEM)] +
                [pl.BlockSpec(memory_space=pltpu.MemorySpace.VMEM)] * (len(args) - 1))
    return pl.pallas_call(
        _fused_forward_kernel,
        out_shape=jax.ShapeDtypeStruct((B, NCLS), jnp.float32),
        in_specs=in_specs,
        out_specs=pl.BlockSpec(memory_space=pltpu.MemorySpace.VMEM),
        scratch_shapes=[
            pltpu.VMEM((B * S, H), jnp.float32),        # gathered embeddings
            pltpu.VMEM((B * S, H), jnp.float32),        # attention context
            pltpu.VMEM((B, S, 8 * HD), jnp.float32),    # hoisted LSTM input projection
        ],
    )(*args)


# ============================== parameters (synthetic) =============================

def _nrm(k, shape):
    return jax.random.normal(k, shape, dtype=jnp.float32) * 0.02


def init_params(key):
    """PyTorch-layout synthetic weights (stand-in for the pretrained BERT checkpoint)."""
    keys = iter(jax.random.split(key, 64))
    params = {
        "word_emb": _nrm(next(keys), (V, H)),
        "pos_emb": _nrm(next(keys), (P, H)),
        "type_emb": _nrm(next(keys), (TT, H)),
        "emb_ln_g": jnp.ones((H,), jnp.float32),
        "emb_ln_b": jnp.zeros((H,), jnp.float32),
        "layers": [],
    }
    for _ in range(NLAYERS):
        params["layers"].append({
            "wq": _nrm(next(keys), (H, H)), "bq": jnp.zeros((H,), jnp.float32),
            "wk": _nrm(next(keys), (H, H)), "bk": jnp.zeros((H,), jnp.float32),
            "wv": _nrm(next(keys), (H, H)), "bv": jnp.zeros((H,), jnp.float32),
            "wo": _nrm(next(keys), (H, H)), "bo": jnp.zeros((H,), jnp.float32),
            "ln1_g": jnp.ones((H,), jnp.float32), "ln1_b": jnp.zeros((H,), jnp.float32),
            "w1": _nrm(next(keys), (FF, H)), "b1": jnp.zeros((FF,), jnp.float32),
            "w2": _nrm(next(keys), (H, FF)), "b2": jnp.zeros((H,), jnp.float32),
            "ln2_g": jnp.ones((H,), jnp.float32), "ln2_b": jnp.zeros((H,), jnp.float32),
        })
    # bidirectional single-layer LSTM, PyTorch weight layout (4*HD, in) / (4*HD, HD)
    params["lstm"] = {
        "w_ih_f": _nrm(next(keys), (4 * HD, H)),
        "w_hh_f": _nrm(next(keys), (4 * HD, HD)),
        "b_ih_f": jnp.zeros((4 * HD,), jnp.float32),
        "b_hh_f": jnp.zeros((4 * HD,), jnp.float32),
        "w_ih_b": _nrm(next(keys), (4 * HD, H)),
        "w_hh_b": _nrm(next(keys), (4 * HD, HD)),
        "b_ih_b": jnp.zeros((4 * HD,), jnp.float32),
        "b_hh_b": jnp.zeros((4 * HD,), jnp.float32),
    }
    params["cls_w"] = _nrm(next(keys), (NCLS, 2 * HD))
    params["cls_b"] = jnp.zeros((NCLS,), jnp.float32)
    return params


def prepare_params(params):
    """Pre-transpose / pre-stack / pre-pack all weights ONCE into kernel layouts."""
    L = params["layers"]
    lstm = params["lstm"]
    scale = 1.0 / (DH ** 0.5)
    gate_scale = [1.0, 1.0, 2.0, 1.0]           # x2 on the cell-candidate (g) gate columns

    def row(v):
        v = jnp.asarray(v, jnp.float32).reshape(-1)
        return jnp.pad(v, (0, VW - v.shape[0])).reshape(1, VW)

    # -------- packed small-vector slab (biases + LayerNorm params) --------
    b_f = lstm["b_ih_f"] + lstm["b_hh_f"]        # (4HD,), PyTorch gate order i,f,g,o
    b_b = lstm["b_ih_b"] + lstm["b_hh_b"]
    b_ih_packed = jnp.concatenate(
        [gate_scale[j] * seg for j in range(4)
         for seg in (b_f[j * HD:(j + 1) * HD], b_b[j * HD:(j + 1) * HD])])   # (8HD,)

    rows = [row(params["emb_ln_g"]), row(params["emb_ln_b"]),
            row(b_ih_packed), row(params["cls_b"])]
    for lp in L:
        rows += [row(jnp.concatenate([lp["bq"] * scale, lp["bk"], lp["bv"]])),
                 row(lp["bo"]), row(lp["b1"]), row(lp["b2"]),
                 row(lp["ln1_g"]), row(lp["ln1_b"]),
                 row(lp["ln2_g"]), row(lp["ln2_b"])]
    vecs = jnp.concatenate(rows, axis=0)         # (NGROWS + 8*NLAYERS, VW) f32

    # -------- large matmul weights (bf16, MXU layouts, scale folded into Q) --------
    wqkv = jnp.stack([jnp.concatenate([lp["wq"].T * scale, lp["wk"].T, lp["wv"].T], axis=1)
                      for lp in L]).astype(jnp.bfloat16)                 # (L, H, 3H)
    wo = jnp.stack([lp["wo"].T for lp in L]).astype(jnp.bfloat16)        # (L, H, H)
    w1 = jnp.stack([lp["w1"].T for lp in L]).astype(jnp.bfloat16)        # (L, H, FF)
    w2 = jnp.stack([lp["w2"].T for lp in L]).astype(jnp.bfloat16)        # (L, FF, H)

    # LSTM input projection: gate-major interleaved columns [i_f,i_b,f_f,f_b,2g_f,2g_b,o_f,o_b]
    wihfT, wihbT = lstm["w_ih_f"].T, lstm["w_ih_b"].T                    # (H, 4HD)
    w_ih = jnp.concatenate(
        [gate_scale[j] * m[:, j * HD:(j + 1) * HD]
         for j in range(4) for m in (wihfT, wihbT)], axis=1).astype(jnp.bfloat16)  # (H, 8HD)

    # Block-diagonal recurrent weight: rows = [h_fwd (HD) ; h_bwd (HD)], same column order
    whhfT, whhbT = lstm["w_hh_f"].T, lstm["w_hh_b"].T                    # (HD, 4HD)
    zero = jnp.zeros((HD, HD), jnp.float32)
    whh_cols = []
    for j in range(4):
        whh_cols.append(jnp.concatenate([gate_scale[j] * whhfT[:, j * HD:(j + 1) * HD], zero], axis=0))
        whh_cols.append(jnp.concatenate([zero, gate_scale[j] * whhbT[:, j * HD:(j + 1) * HD]], axis=0))
    w_hh = jnp.concatenate(whh_cols, axis=1).astype(jnp.bfloat16)        # (2HD, 8HD)

    return {
        "word_emb": params["word_emb"],                                   # (V, H) f32
        # position + token-type(0) embeddings folded into one constant (S, H) table
        "pos_type": params["pos_emb"][:S] + params["type_emb"][0][None, :],
        "vecs": vecs,
        "wqkv": wqkv, "wo": wo, "w1": w1, "w2": w2,
        "w_ih": w_ih, "w_hh": w_hh,
        "cls_w": params["cls_w"].T.astype(jnp.float32),                   # (2HD, NCLS)
    }


# ====================================== main =======================================

if __name__ == "__main__":
    key = jax.random.PRNGKey(0)
    pkey, dkey = jax.random.split(key)
    kernel_params = prepare_params(init_params(pkey))
    input_ids = jax.random.randint(dkey, (B, S), 0, V, dtype=jnp.int32)
    attention_mask = jnp.ones((B, S), jnp.int32).at[1, S - 2:].set(0)

    logits = jax.jit(bert_lstm_classifier)(kernel_params, input_ids, attention_mask)
    jax.block_until_ready(logits)
    assert logits.shape == (B, NCLS) and logits.dtype == jnp.float32
    print("KERNEL_OK")
</pallas_src>

<mosaic_0001>
module attributes {stable_mosaic.version = 11 : i64} {
  func.func @_fused_forward_kernel(%arg0: memref<2x8xi32, #tpu.memory_space<smem>>, %arg1: memref<2x8xi32, #tpu.memory_space<vmem>>, %arg2: memref<100x128xf32, #tpu.memory_space<vmem>>, %arg3: memref<8x128xf32, #tpu.memory_space<vmem>>, %arg4: memref<20x384xf32, #tpu.memory_space<vmem>>, %arg5: memref<2x128x384xbf16, #tpu.memory_space<vmem>>, %arg6: memref<2x128x128xbf16, #tpu.memory_space<vmem>>, %arg7: memref<2x128x256xbf16, #tpu.memory_space<vmem>>, %arg8: memref<2x256x128xbf16, #tpu.memory_space<vmem>>, %arg9: memref<128x256xbf16, #tpu.memory_space<vmem>>, %arg10: memref<64x256xbf16, #tpu.memory_space<vmem>>, %arg11: memref<64x2xf32, #tpu.memory_space<vmem>>, %arg12: memref<2x2xf32, #tpu.memory_space<vmem>>, %arg13: memref<16x128xf32, #tpu.memory_space<vmem>>, %arg14: memref<16x128xf32, #tpu.memory_space<vmem>>, %arg15: memref<2x8x256xf32, #tpu.memory_space<vmem>>) attributes {dimension_semantics = [], scalar_prefetch = 0 : i64, scratch_operands = 3 : i64, tpu.core_type = #tpu.core_type<tc>} {
    %c0 = arith.constant 0 : index
    %c0_0 = arith.constant 0 : index
    %0 = memref.load %arg0[%c0, %c0_0] : memref<2x8xi32, #tpu.memory_space<smem>>
    %1 = arith.index_cast %0 : i32 to index
    %c0_1 = arith.constant 0 : index
    %2 = vector.load %arg2[%1, %c0_1] : memref<100x128xf32, #tpu.memory_space<vmem>>, vector<1x128xf32>
    %c0_2 = arith.constant 0 : index
    %c0_3 = arith.constant 0 : index
    %3 = vector.load %arg3[%c0_2, %c0_3] : memref<8x128xf32, #tpu.memory_space<vmem>>, vector<1x128xf32>
    %4 = arith.addf %2, %3 : vector<1x128xf32>
    %c0_4 = arith.constant 0 : index
    %c0_5 = arith.constant 0 : index
    %5 = vector.load %arg13[%c0_4, %c0_5] : memref<16x128xf32, #tpu.memory_space<vmem>>, vector<1x128xf32>
    tpu.vector_store %arg13[%c0_4, %c0_5], %4 {strides = array<i32>} : memref<16x128xf32, #tpu.memory_space<vmem>>, vector<1x128xf32>,
    %c0_6 = arith.constant 0 : index
    %c1 = arith.constant 1 : index
    %6 = memref.load %arg0[%c0_6, %c1] : memref<2x8xi32, #tpu.memory_space<smem>>
    %7 = arith.index_cast %6 : i32 to index
    %c0_7 = arith.constant 0 : index
    %8 = vector.load %arg2[%7, %c0_7] : memref<100x128xf32, #tpu.memory_space<vmem>>, vector<1x128xf32>
    %c1_8 = arith.constant 1 : index
    %c0_9 = arith.constant 0 : index
    %9 = vector.load %arg3[%c1_8, %c0_9] : memref<8x128xf32, #tpu.memory_space<vmem>>, vector<1x128xf32>
    %10 = arith.addf %8, %9 : vector<1x128xf32>
    %c1_10 = arith.constant 1 : index
    %c0_11 = arith.constant 0 : index
    %11 = vector.load %arg13[%c1_10, %c0_11] : memref<16x128xf32, #tpu.memory_space<vmem>>, vector<1x128xf32>
    tpu.vector_store %arg13[%c1_10, %c0_11], %10 {strides = array<i32>} : memref<16x128xf32, #tpu.memory_space<vmem>>, vector<1x128xf32>,
    %c0_12 = arith.constant 0 : index
    %c2 = arith.constant 2 : index
    %12 = memref.load %arg0[%c0_12, %c2] : memref<2x8xi32, #tpu.memory_space<smem>>
    %13 = arith.index_cast %12 : i32 to index
    %c0_13 = arith.constant 0 : index
    %14 = vector.load %arg2[%13, %c0_13] : memref<100x128xf32, #tpu.memory_space<vmem>>, vector<1x128xf32>
    %c2_14 = arith.constant 2 : index
    %c0_15 = arith.constant 0 : index
    %15 = vector.load %arg3[%c2_14, %c0_15] : memref<8x128xf32, #tpu.memory_space<vmem>>, vector<1x128xf32>
    %16 = arith.addf %14, %15 : vector<1x128xf32>
    %c2_16 = arith.constant 2 : index
    %c0_17 = arith.constant 0 : index
    %17 = vector.load %arg13[%c2_16, %c0_17] : memref<16x128xf32, #tpu.memory_space<vmem>>, vector<1x128xf32>
    tpu.vector_store %arg13[%c2_16, %c0_17], %16 {strides = array<i32>} : memref<16x128xf32, #tpu.memory_space<vmem>>, vector<1x128xf32>,
    %c0_18 = arith.constant 0 : index
    %c3 = arith.constant 3 : index
    %18 = memref.load %arg0[%c0_18, %c3] : memref<2x8xi32, #tpu.memory_space<smem>>
    %19 = arith.index_cast %18 : i32 to index
    %c0_19 = arith.constant 0 : index
    %20 = vector.load %arg2[%19, %c0_19] : memref<100x128xf32, #tpu.memory_space<vmem>>, vector<1x128xf32>
    %c3_20 = arith.constant 3 : index
    %c0_21 = arith.constant 0 : index
    %21 = vector.load %arg3[%c3_20, %c0_21] : memref<8x128xf32, #tpu.memory_space<vmem>>, vector<1x128xf32>
    %22 = arith.addf %20, %21 : vector<1x128xf32>
    %c3_22 = arith.constant 3 : index
    %c0_23 = arith.constant 0 : index
    %23 = vector.load %arg13[%c3_22, %c0_23] : memref<16x128xf32, #tpu.memory_space<vmem>>, vector<1x128xf32>
    tpu.vector_store %arg13[%c3_22, %c0_23], %22 {strides = array<i32>} : memref<16x128xf32, #tpu.memory_space<vmem>>, vector<1x128xf32>,
    %c0_24 = arith.constant 0 : index
    %c4 = arith.constant 4 : index
    %24 = memref.load %arg0[%c0_24, %c4] : memref<2x8xi32, #tpu.memory_space<smem>>
    %25 = arith.index_cast %24 : i32 to index
    %c0_25 = arith.constant 0 : index
    %26 = vector.load %arg2[%25, %c0_25] : memref<100x128xf32, #tpu.memory_space<vmem>>, vector<1x128xf32>
    %c4_26 = arith.constant 4 : index
    %c0_27 = arith.constant 0 : index
    %27 = vector.load %arg3[%c4_26, %c0_27] : memref<8x128xf32, #tpu.memory_space<vmem>>, vector<1x128xf32>
    %28 = arith.addf %26, %27 : vector<1x128xf32>
    %c4_28 = arith.constant 4 : index
    %c0_29 = arith.constant 0 : index
    %29 = vector.load %arg13[%c4_28, %c0_29] : memref<16x128xf32, #tpu.memory_space<vmem>>, vector<1x128xf32>
    tpu.vector_store %arg13[%c4_28, %c0_29], %28 {strides = array<i32>} : memref<16x128xf32, #tpu.memory_space<vmem>>, vector<1x128xf32>,
    %c0_30 = arith.constant 0 : index
    %c5 = arith.constant 5 : index
    %30 = memref.load %arg0[%c0_30, %c5] : memref<2x8xi32, #tpu.memory_space<smem>>
    %31 = arith.index_cast %30 : i32 to index
    %c0_31 = arith.constant 0 : index
    %32 = vector.load %arg2[%31, %c0_31] : memref<100x128xf32, #tpu.memory_space<vmem>>, vector<1x128xf32>
    %c5_32 = arith.constant 5 : index
    %c0_33 = arith.constant 0 : index
    %33 = vector.load %arg3[%c5_32, %c0_33] : memref<8x128xf32, #tpu.memory_space<vmem>>, vector<1x128xf32>
    %34 = arith.addf %32, %33 : vector<1x128xf32>
    %c5_34 = arith.constant 5 : index
    %c0_35 = arith.constant 0 : index
    %35 = vector.load %arg13[%c5_34, %c0_35] : memref<16x128xf32, #tpu.memory_space<vmem>>, vector<1x128xf32>
    tpu.vector_store %arg13[%c5_34, %c0_35], %34 {strides = array<i32>} : memref<16x128xf32, #tpu.memory_space<vmem>>, vector<1x128xf32>,
    %c0_36 = arith.constant 0 : index
    %c6 = arith.constant 6 : index
    %36 = memref.load %arg0[%c0_36, %c6] : memref<2x8xi32, #tpu.memory_space<smem>>
    %37 = arith.index_cast %36 : i32 to index
    %c0_37 = arith.constant 0 : index
    %38 = vector.load %arg2[%37, %c0_37] : memref<100x128xf32, #tpu.memory_space<vmem>>, vector<1x128xf32>
    %c6_38 = arith.constant 6 : index
    %c0_39 = arith.constant 0 : index
    %39 = vector.load %arg3[%c6_38, %c0_39] : memref<8x128xf32, #tpu.memory_space<vmem>>, vector<1x128xf32>
    %40 = arith.addf %38, %39 : vector<1x128xf32>
    %c6_40 = arith.constant 6 : index
    %c0_41 = arith.constant 0 : index
    %41 = vector.load %arg13[%c6_40, %c0_41] : memref<16x128xf32, #tpu.memory_space<vmem>>, vector<1x128xf32>
    tpu.vector_store %arg13[%c6_40, %c0_41], %40 {strides = array<i32>} : memref<16x128xf32, #tpu.memory_space<vmem>>, vector<1x128xf32>,
    %c0_42 = arith.constant 0 : index
    %c7 = arith.constant 7 : index
    %42 = memref.load %arg0[%c0_42, %c7] : memref<2x8xi32, #tpu.memory_space<smem>>
    %43 = arith.index_cast %42 : i32 to index
    %c0_43 = arith.constant 0 : index
    %44 = vector.load %arg2[%43, %c0_43] : memref<100x128xf32, #tpu.memory_space<vmem>>, vector<1x128xf32>
    %c7_44 = arith.constant 7 : index
    %c0_45 = arith.constant 0 : index
    %45 = vector.load %arg3[%c7_44, %c0_45] : memref<8x128xf32, #tpu.memory_space<vmem>>, vector<1x128xf32>
    %46 = arith.addf %44, %45 : vector<1x128xf32>
    %c7_46 = arith.constant 7 : index
    %c0_47 = arith.constant 0 : index
    %47 = vector.load %arg13[%c7_46, %c0_47] : memref<16x128xf32, #tpu.memory_space<vmem>>, vector<1x128xf32>
    tpu.vector_store %arg13[%c7_46, %c0_47], %46 {strides = array<i32>} : memref<16x128xf32, #tpu.memory_space<vmem>>, vector<1x128xf32>,
    %c1_48 = arith.constant 1 : index
    %c0_49 = arith.constant 0 : index
    %48 = memref.load %arg0[%c1_48, %c0_49] : memref<2x8xi32, #tpu.memory_space<smem>>
    %49 = arith.index_cast %48 : i32 to index
    %c0_50 = arith.constant 0 : index
    %50 = vector.load %arg2[%49, %c0_50] : memref<100x128xf32, #tpu.memory_space<vmem>>, vector<1x128xf32>
    %c0_51 = arith.constant 0 : index
    %c0_52 = arith.constant 0 : index
    %51 = vector.load %arg3[%c0_51, %c0_52] : memref<8x128xf32, #tpu.memory_space<vmem>>, vector<1x128xf32>
    %52 = arith.addf %50, %51 : vector<1x128xf32>
    %c8 = arith.constant 8 : index
    %c0_53 = arith.constant 0 : index
    %53 = vector.load %arg13[%c8, %c0_53] : memref<16x128xf32, #tpu.memory_space<vmem>>, vector<1x128xf32>
    tpu.vector_store %arg13[%c8, %c0_53], %52 {strides = array<i32>} : memref<16x128xf32, #tpu.memory_space<vmem>>, vector<1x128xf32>,
    %c1_54 = arith.constant 1 : index
    %c1_55 = arith.constant 1 : index
    %54 = memref.load %arg0[%c1_54, %c1_55] : memref<2x8xi32, #tpu.memory_space<smem>>
    %55 = arith.index_cast %54 : i32 to index
    %c0_56 = arith.constant 0 : index
    %56 = vector.load %arg2[%55, %c0_56] : memref<100x128xf32, #tpu.memory_space<vmem>>, vector<1x128xf32>
    %c1_57 = arith.constant 1 : index
    %c0_58 = arith.constant 0 : index
    %57 = vector.load %arg3[%c1_57, %c0_58] : memref<8x128xf32, #tpu.memory_space<vmem>>, vector<1x128xf32>
    %58 = arith.addf %56, %57 : vector<1x128xf32>
    %c9 = arith.constant 9 : index
    %c0_59 = arith.constant 0 : index
    %59 = vector.load %arg13[%c9, %c0_59] : memref<16x128xf32, #tpu.memory_space<vmem>>, vector<1x128xf32>
    tpu.vector_store %arg13[%c9, %c0_59], %58 {strides = array<i32>} : memref<16x128xf32, #tpu.memory_space<vmem>>, vector<1x128xf32>,
    %c1_60 = arith.constant 1 : index
    %c2_61 = arith.constant 2 : index
    %60 = memref.load %arg0[%c1_60, %c2_61] : memref<2x8xi32, #tpu.memory_space<smem>>
    %61 = arith.index_cast %60 : i32 to index
    %c0_62 = arith.constant 0 : index
    %62 = vector.load %arg2[%61, %c0_62] : memref<100x128xf32, #tpu.memory_space<vmem>>, vector<1x128xf32>
    %c2_63 = arith.constant 2 : index
    %c0_64 = arith.constant 0 : index
    %63 = vector.load %arg3[%c2_63, %c0_64] : memref<8x128xf32, #tpu.memory_space<vmem>>, vector<1x128xf32>
    %64 = arith.addf %62, %63 : vector<1x128xf32>
    %c10 = arith.constant 10 : index
    %c0_65 = arith.constant 0 : index
    %65 = vector.load %arg13[%c10, %c0_65] : memref<16x128xf32, #tpu.memory_space<vmem>>, vector<1x128xf32>
    tpu.vector_store %arg13[%c10, %c0_65], %64 {strides = array<i32>} : memref<16x128xf32, #tpu.memory_space<vmem>>, vector<1x128xf32>,
    %c1_66 = arith.constant 1 : index
    %c3_67 = arith.constant 3 : index
    %66 = memref.load %arg0[%c1_66, %c3_67] : memref<2x8xi32, #tpu.memory_space<smem>>
    %67 = arith.index_cast %66 : i32 to index
    %c0_68 = arith.constant 0 : index
    %68 = vector.load %arg2[%67, %c0_68] : memref<100x128xf32, #tpu.memory_space<vmem>>, vector<1x128xf32>
    %c3_69 = arith.constant 3 : index
    %c0_70 = arith.constant 0 : index
    %69 = vector.load %arg3[%c3_69, %c0_70] : memref<8x128xf32, #tpu.memory_space<vmem>>, vector<1x128xf32>
    %70 = arith.addf %68, %69 : vector<1x128xf32>
    %c11 = arith.constant 11 : index
    %c0_71 = arith.constant 0 : index
    %71 = vector.load %arg13[%c11, %c0_71] : memref<16x128xf32, #tpu.memory_space<vmem>>, vector<1x128xf32>
    tpu.vector_store %arg13[%c11, %c0_71], %70 {strides = array<i32>} : memref<16x128xf32, #tpu.memory_space<vmem>>, vector<1x128xf32>,
    %c1_72 = arith.constant 1 : index
    %c4_73 = arith.constant 4 : index
    %72 = memref.load %arg0[%c1_72, %c4_73] : memref<2x8xi32, #tpu.memory_space<smem>>
    %73 = arith.index_cast %72 : i32 to index
    %c0_74 = arith.constant 0 : index
    %74 = vector.load %arg2[%73, %c0_74] : memref<100x128xf32, #tpu.memory_space<vmem>>, vector<1x128xf32>
    %c4_75 = arith.constant 4 : index
    %c0_76 = arith.constant 0 : index
    %75 = vector.load %arg3[%c4_75, %c0_76] : memref<8x128xf32, #tpu.memory_space<vmem>>, vector<1x128xf32>
    %76 = arith.addf %74, %75 : vector<1x128xf32>
    %c12 = arith.constant 12 : index
    %c0_77 = arith.constant 0 : index
    %77 = vector.load %arg13[%c12, %c0_77] : memref<16x128xf32, #tpu.memory_space<vmem>>, vector<1x128xf32>
    tpu.vector_store %arg13[%c12, %c0_77], %76 {strides = array<i32>} : memref<16x128xf32, #tpu.memory_space<vmem>>, vector<1x128xf32>,
    %c1_78 = arith.constant 1 : index
    %c5_79 = arith.constant 5 : index
    %78 = memref.load %arg0[%c1_78, %c5_79] : memref<2x8xi32, #tpu.memory_space<smem>>
    %79 = arith.index_cast %78 : i32 to index
    %c0_80 = arith.constant 0 : index
    %80 = vector.load %arg2[%79, %c0_80] : memref<100x128xf32, #tpu.memory_space<vmem>>, vector<1x128xf32>
    %c5_81 = arith.constant 5 : index
    %c0_82 = arith.constant 0 : index
    %81 = vector.load %arg3[%c5_81, %c0_82] : memref<8x128xf32, #tpu.memory_space<vmem>>, vector<1x128xf32>
    %82 = arith.addf %80, %81 : vector<1x128xf32>
    %c13 = arith.constant 13 : index
    %c0_83 = arith.constant 0 : index
    %83 = vector.load %arg13[%c13, %c0_83] : memref<16x128xf32, #tpu.memory_space<vmem>>, vector<1x128xf32>
    tpu.vector_store %arg13[%c13, %c0_83], %82 {strides = array<i32>} : memref<16x128xf32, #tpu.memory_space<vmem>>, vector<1x128xf32>,
    %c1_84 = arith.constant 1 : index
    %c6_85 = arith.constant 6 : index
    %84 = memref.load %arg0[%c1_84, %c6_85] : memref<2x8xi32, #tpu.memory_space<smem>>
    %85 = arith.index_cast %84 : i32 to index
    %c0_86 = arith.constant 0 : index
    %86 = vector.load %arg2[%85, %c0_86] : memref<100x128xf32, #tpu.memory_space<vmem>>, vector<1x128xf32>
    %c6_87 = arith.constant 6 : index
    %c0_88 = arith.constant 0 : index
    %87 = vector.load %arg3[%c6_87, %c0_88] : memref<8x128xf32, #tpu.memory_space<vmem>>, vector<1x128xf32>
    %88 = arith.addf %86, %87 : vector<1x128xf32>
    %c14 = arith.constant 14 : index
    %c0_89 = arith.constant 0 : index
    %89 = vector.load %arg13[%c14, %c0_89] : memref<16x128xf32, #tpu.memory_space<vmem>>, vector<1x128xf32>
    tpu.vector_store %arg13[%c14, %c0_89], %88 {strides = array<i32>} : memref<16x128xf32, #tpu.memory_space<vmem>>, vector<1x128xf32>,
    %c1_90 = arith.constant 1 : index
    %c7_91 = arith.constant 7 : index
    %90 = memref.load %arg0[%c1_90, %c7_91] : memref<2x8xi32, #tpu.memory_space<smem>>
    %91 = arith.index_cast %90 : i32 to index
    %c0_92 = arith.constant 0 : index
    %92 = vector.load %arg2[%91, %c0_92] : memref<100x128xf32, #tpu.memory_space<vmem>>, vector<1x128xf32>
    %c7_93 = arith.constant 7 : index
    %c0_94 = arith.constant 0 : index
    %93 = vector.load %arg3[%c7_93, %c0_94] : memref<8x128xf32, #tpu.memory_space<vmem>>, vector<1x128xf32>
    %94 = arith.addf %92, %93 : vector<1x128xf32>
    %c15 = arith.constant 15 : index
    %c0_95 = arith.constant 0 : index
    %95 = vector.load %arg13[%c15, %c0_95] : memref<16x128xf32, #tpu.memory_space<vmem>>, vector<1x128xf32>
    tpu.vector_store %arg13[%c15, %c0_95], %94 {strides = array<i32>} : memref<16x128xf32, #tpu.memory_space<vmem>>, vector<1x128xf32>,
    %c0_96 = arith.constant 0 : index
    %c0_97 = arith.constant 0 : index
    %96 = vector.load %arg4[%c0_96, %c0_97] : memref<20x384xf32, #tpu.memory_space<vmem>>, vector<1x128xf32>
    %c1_98 = arith.constant 1 : index
    %c0_99 = arith.constant 0 : index
    %97 = vector.load %arg4[%c1_98, %c0_99] : memref<20x384xf32, #tpu.memory_space<vmem>>, vector<1x128xf32>
    %c0_100 = arith.constant 0 : index
    %c0_101 = arith.constant 0 : index
    %98 = vector.load %arg13[%c0_100, %c0_101] : memref<16x128xf32, #tpu.memory_space<vmem>>, vector<16x128xf32>
    %cst = arith.constant dense<0.000000e+00> : vector<16xf32>
    %99 = vector.multi_reduction <add>, %98, %cst [1] : vector<16x128xf32> to vector<16xf32>
    %100 = vector.shape_cast %99 : vector<16xf32> to vector<16x1xf32>
    %cst_102 = arith.constant 1.280000e+02 : f32
    %101 = vector.broadcast %cst_102 : f32 to vector<16x1xf32>
    %102 = arith.divf %100, %101 : vector<16x1xf32>
    %103 = vector.broadcast %102 : vector<16x1xf32> to vector<16x128xf32>
    %104 = arith.subf %98, %103 : vector<16x128xf32>
    %105 = arith.mulf %104, %104 : vector<16x128xf32>
    %cst_103 = arith.constant dense<0.000000e+00> : vector<16xf32>
    %106 = vector.multi_reduction <add>, %105, %cst_103 [1] : vector<16x128xf32> to vector<16xf32>
    %107 = vector.shape_cast %106 : vector<16xf32> to vector<16x1xf32>
    %cst_104 = arith.constant 1.280000e+02 : f32
    %108 = vector.broadcast %cst_104 : f32 to vector<16x1xf32>
    %109 = arith.divf %107, %108 : vector<16x1xf32>
    %110 = vector.broadcast %102 : vector<16x1xf32> to vector<16x128xf32>
    %111 = arith.subf %98, %110 : vector<16x128xf32>
    %cst_105 = arith.constant 9.99999996E-13 : f32
    %112 = vector.broadcast %cst_105 : f32 to vector<16x1xf32>
    %113 = arith.addf %109, %112 : vector<16x1xf32>
    %114 = math.rsqrt %113 : vector<16x1xf32>
    %115 = vector.broadcast %114 : vector<16x1xf32> to vector<16x128xf32>
    %116 = arith.mulf %111, %115 : vector<16x128xf32>
    %117 = vector.broadcast %96 : vector<1x128xf32> to vector<16x128xf32>
    %118 = arith.mulf %116, %117 : vector<16x128xf32>
    %119 = vector.broadcast %97 : vector<1x128xf32> to vector<16x128xf32>
    %120 = arith.addf %118, %119 : vector<16x128xf32>
    %c0_106 = arith.constant 0 : index
    %c0_107 = arith.constant 0 : index
    %121 = vector.load %arg1[%c0_106, %c0_107] : memref<2x8xi32, #tpu.memory_space<vmem>>, vector<2x8xi32>
    %122 = arith.sitofp %121 : vector<2x8xi32> to vector<2x8xf32>
    %cst_108 = arith.constant 1.000000e+00 : f32
    %123 = vector.broadcast %cst_108 : f32 to vector<2x8xf32>
    %124 = arith.subf %123, %122 : vector<2x8xf32>
    %cst_109 = arith.constant -1.000000e+04 : f32
    %125 = vector.broadcast %cst_109 : f32 to vector<2x8xf32>
    %126 = arith.mulf %124, %125 : vector<2x8xf32>
    %127 = vector.extract_strided_slice %126 {offsets = [0, 0], sizes = [1, 8], strides = [1, 1]} : vector<2x8xf32> to vector<1x8xf32>
    %128 = vector.extract_strided_slice %126 {offsets = [0, 0], sizes = [1, 8], strides = [1, 1]} : vector<2x8xf32> to vector<1x8xf32>
    %129 = vector.extract_strided_slice %126 {offsets = [1, 0], sizes = [1, 8], strides = [1, 1]} : vector<2x8xf32> to vector<1x8xf32>
    %130 = vector.extract_strided_slice %126 {offsets = [1, 0], sizes = [1, 8], strides = [1, 1]} : vector<2x8xf32> to vector<1x8xf32>
    %131 = vector.shape_cast %127 : vector<1x8xf32> to vector<1x1x8xf32>
    %132 = vector.shape_cast %128 : vector<1x8xf32> to vector<1x1x8xf32>
    %133 = vector.shape_cast %129 : vector<1x8xf32> to vector<1x1x8xf32>
    %134 = vector.shape_cast %130 : vector<1x8xf32> to vector<1x1x8xf32>
    %135 = tpu.concatenate %131, %132, %133, %134 in 0 : vector<1x1x8xf32>, vector<1x1x8xf32>, vector<1x1x8xf32>, vector<1x1x8xf32> -> vector<4x1x8xf32>
    %c4_110 = arith.constant 4 : index
    %c0_111 = arith.constant 0 : index
    %136 = vector.load %arg4[%c4_110, %c0_111] : memref<20x384xf32, #tpu.memory_space<vmem>>, vector<1x384xf32>
    %c5_112 = arith.constant 5 : index
    %c0_113 = arith.constant 0 : index
    %137 = vector.load %arg4[%c5_112, %c0_113] : memref<20x384xf32, #tpu.memory_space<vmem>>, vector<1x128xf32>
    %c6_114 = arith.constant 6 : index
    %c0_115 = arith.constant 0 : index
    %138 = vector.load %arg4[%c6_114, %c0_115] : memref<20x384xf32, #tpu.memory_space<vmem>>, vector<1x256xf32>
    %c7_116 = arith.constant 7 : index
    %c0_117 = arith.constant 0 : index
    %139 = vector.load %arg4[%c7_116, %c0_117] : memref<20x384xf32, #tpu.memory_space<vmem>>, vector<1x128xf32>
    %c8_118 = arith.constant 8 : index
    %c0_119 = arith.constant 0 : index
    %140 = vector.load %arg4[%c8_118, %c0_119] : memref<20x384xf32, #tpu.memory_space<vmem>>, vector<1x128xf32>
    %c9_120 = arith.constant 9 : index
    %c0_121 = arith.constant 0 : index
    %141 = vector.load %arg4[%c9_120, %c0_121] : memref<20x384xf32, #tpu.memory_space<vmem>>, vector<1x128xf32>
    %c10_122 = arith.constant 10 : index
    %c0_123 = arith.constant 0 : index
    %142 = vector.load %arg4[%c10_122, %c0_123] : memref<20x384xf32, #tpu.memory_space<vmem>>, vector<1x128xf32>
    %c11_124 = arith.constant 11 : index
    %c0_125 = arith.constant 0 : index
    %143 = vector.load %arg4[%c11_124, %c0_125] : memref<20x384xf32, #tpu.memory_space<vmem>>, vector<1x128xf32>
    %144 = arith.truncf %120 : vector<16x128xf32> to vector<16x128xbf16>
    %c0_126 = arith.constant 0 : index
    %c0_127 = arith.constant 0 : index
    %c0_128 = arith.constant 0 : index
    %145 = vector.load %arg5[%c0_126, %c0_127, %c0_128] : memref<2x128x384xbf16, #tpu.memory_space<vmem>>, vector<1x128x384xbf16>
    %146 = vector.shape_cast %145 : vector<1x128x384xbf16> to vector<128x384xbf16>
    %cst_129 = arith.constant dense<0.000000e+00> : vector<16x384xf32>
    %147 = tpu.matmul %144, %146, %cst_129 {dimension_numbers = #tpu.dot_dimension_numbers<[1], [0], [0], [1], [0, 0, 1, 1], [], []>} : vector<16x128xbf16>, vector<128x384xbf16>, vector<16x384xf32> -> vector<16x384xf32>
    %148 = vector.broadcast %136 : vector<1x384xf32> to vector<16x384xf32>
    %149 = arith.addf %147, %148 : vector<16x384xf32>
    %150 = vector.extract_strided_slice %149 {offsets = [0, 0], sizes = [16, 128], strides = [1, 1]} : vector<16x384xf32> to vector<16x128xf32>
    %151 = vector.extract_strided_slice %150 {offsets = [0, 0], sizes = [8, 64], strides = [1, 1]} : vector<16x128xf32> to vector<8x64xf32>
    %152 = vector.extract_strided_slice %150 {offsets = [0, 64], sizes = [8, 64], strides = [1, 1]} : vector<16x128xf32> to vector<8x64xf32>
    %153 = vector.extract_strided_slice %150 {offsets = [8, 0], sizes = [8, 64], strides = [1, 1]} : vector<16x128xf32> to vector<8x64xf32>
    %154 = vector.extract_strided_slice %150 {offsets = [8, 64], sizes = [8, 64], strides = [1, 1]} : vector<16x128xf32> to vector<8x64xf32>
    %155 = vector.shape_cast %151 : vector<8x64xf32> to vector<1x8x64xf32>
    %156 = vector.shape_cast %152 : vector<8x64xf32> to vector<1x8x64xf32>
    %157 = vector.shape_cast %153 : vector<8x64xf32> to vector<1x8x64xf32>
    %158 = vector.shape_cast %154 : vector<8x64xf32> to vector<1x8x64xf32>
    %159 = tpu.concatenate %155, %156, %157, %158 in 0 : vector<1x8x64xf32>, vector<1x8x64xf32>, vector<1x8x64xf32>, vector<1x8x64xf32> -> vector<4x8x64xf32>
    %160 = vector.extract_strided_slice %149 {offsets = [0, 128], sizes = [16, 128], strides = [1, 1]} : vector<16x384xf32> to vector<16x128xf32>
    %161 = vector.extract_strided_slice %160 {offsets = [0, 0], sizes = [8, 64], strides = [1, 1]} : vector<16x128xf32> to vector<8x64xf32>
    %162 = vector.extract_strided_slice %160 {offsets = [0, 64], sizes = [8, 64], strides = [1, 1]} : vector<16x128xf32> to vector<8x64xf32>
    %163 = vector.extract_strided_slice %160 {offsets = [8, 0], sizes = [8, 64], strides = [1, 1]} : vector<16x128xf32> to vector<8x64xf32>
    %164 = vector.extract_strided_slice %160 {offsets = [8, 64], sizes = [8, 64], strides = [1, 1]} : vector<16x128xf32> to vector<8x64xf32>
    %165 = vector.shape_cast %161 : vector<8x64xf32> to vector<1x8x64xf32>
    %166 = vector.shape_cast %162 : vector<8x64xf32> to vector<1x8x64xf32>
    %167 = vector.shape_cast %163 : vector<8x64xf32> to vector<1x8x64xf32>
    %168 = vector.shape_cast %164 : vector<8x64xf32> to vector<1x8x64xf32>
    %169 = tpu.concatenate %165, %166, %167, %168 in 0 : vector<1x8x64xf32>, vector<1x8x64xf32>, vector<1x8x64xf32>, vector<1x8x64xf32> -> vector<4x8x64xf32>
    %170 = vector.extract_strided_slice %149 {offsets = [0, 256], sizes = [16, 128], strides = [1, 1]} : vector<16x384xf32> to vector<16x128xf32>
    %171 = vector.extract_strided_slice %170 {offsets = [0, 0], sizes = [8, 64], strides = [1, 1]} : vector<16x128xf32> to vector<8x64xf32>
    %172 = vector.extract_strided_slice %170 {offsets = [0, 64], sizes = [8, 64], strides = [1, 1]} : vector<16x128xf32> to vector<8x64xf32>
    %173 = vector.extract_strided_slice %170 {offsets = [8, 0], sizes = [8, 64], strides = [1, 1]} : vector<16x128xf32> to vector<8x64xf32>
    %174 = vector.extract_strided_slice %170 {offsets = [8, 64], sizes = [8, 64], strides = [1, 1]} : vector<16x128xf32> to vector<8x64xf32>
    %175 = vector.shape_cast %171 : vector<8x64xf32> to vector<1x8x64xf32>
    %176 = vector.shape_cast %172 : vector<8x64xf32> to vector<1x8x64xf32>
    %177 = vector.shape_cast %173 : vector<8x64xf32> to vector<1x8x64xf32>
    %178 = vector.shape_cast %174 : vector<8x64xf32> to vector<1x8x64xf32>
    %179 = tpu.concatenate %175, %176, %177, %178 in 0 : vector<1x8x64xf32>, vector<1x8x64xf32>, vector<1x8x64xf32>, vector<1x8x64xf32> -> vector<4x8x64xf32>
    "tpu.trace_start"() <{level = 10 : i32, message = "bqd,bkd->bqk"}> : () -> ()
    %cst_130 = arith.constant dense<0.000000e+00> : vector<4x8x8xf32>
    %180 = tpu.matmul %159, %169, %cst_130 {dimension_numbers = #tpu.dot_dimension_numbers<[2], [2], [1], [1], [0, 0, 0, 1, 1, 1], [0], [0]>} : vector<4x8x64xf32>, vector<4x8x64xf32>, vector<4x8x8xf32> -> vector<4x8x8xf32>
    "tpu.trace_stop"() : () -> ()
    %181 = vector.broadcast %135 : vector<4x1x8xf32> to vector<4x8x8xf32>
    %182 = arith.addf %180, %181 : vector<4x8x8xf32>
    %cst_131 = arith.constant dense<0xFF800000> : vector<4x8xf32>
    %183 = vector.multi_reduction <maximumf>, %182, %cst_131 [2] : vector<4x8x8xf32> to vector<4x8xf32>
    %184 = vector.shape_cast %183 : vector<4x8xf32> to vector<4x8x1xf32>
    %185 = vector.broadcast %184 : vector<4x8x1xf32> to vector<4x8x8xf32>
    %186 = arith.subf %182, %185 : vector<4x8x8xf32>
    %187 = math.exp %186 : vector<4x8x8xf32>
    %cst_132 = arith.constant dense<0.000000e+00> : vector<4x8xf32>
    %188 = vector.multi_reduction <add>, %187, %cst_132 [2] : vector<4x8x8xf32> to vector<4x8xf32>
    %189 = vector.shape_cast %188 : vector<4x8xf32> to vector<4x8x1xf32>
    %190 = tpu.reciprocal %189 {approx = true} : vector<4x8x1xf32> -> vector<4x8x1xf32>
    %191 = vector.broadcast %190 : vector<4x8x1xf32> to vector<4x8x8xf32>
    %192 = arith.mulf %187, %191 : vector<4x8x8xf32>
    "tpu.trace_start"() <{level = 10 : i32, message = "bqk,bkd->bqd"}> : () -> ()
    %cst_133 = arith.constant dense<0.000000e+00> : vector<4x8x64xf32>
    %193 = tpu.matmul %192, %179, %cst_133 {dimension_numbers = #tpu.dot_dimension_numbers<[2], [1], [1], [2], [0, 0, 0, 1, 1, 2], [0], [0]>} : vector<4x8x8xf32>, vector<4x8x64xf32>, vector<4x8x64xf32> -> vector<4x8x64xf32>
    "tpu.trace_stop"() : () -> ()
    %194 = vector.extract_strided_slice %193 {offsets = [0, 0, 0], sizes = [1, 8, 64], strides = [1, 1, 1]} : vector<4x8x64xf32> to vector<1x8x64xf32>
    %195 = vector.shape_cast %194 : vector<1x8x64xf32> to vector<8x64xf32>
    %c0_134 = arith.constant 0 : index
    %c0_135 = arith.constant 0 : index
    %196 = vector.load %arg14[%c0_134, %c0_135] : memref<16x128xf32, #tpu.memory_space<vmem>>, vector<8x64xf32>
    tpu.vector_store %arg14[%c0_134, %c0_135], %195 {strides = array<i32>} : memref<16x128xf32, #tpu.memory_space<vmem>>, vector<8x64xf32>,
    %197 = vector.extract_strided_slice %193 {offsets = [1, 0, 0], sizes = [1, 8, 64], strides = [1, 1, 1]} : vector<4x8x64xf32> to vector<1x8x64xf32>
    %198 = vector.shape_cast %197 : vector<1x8x64xf32> to vector<8x64xf32>
    %c0_136 = arith.constant 0 : index
    %c64 = arith.constant 64 : index
    %199 = vector.load %arg14[%c0_136, %c64] : memref<16x128xf32, #tpu.memory_space<vmem>>, vector<8x64xf32>
    tpu.vector_store %arg14[%c0_136, %c64], %198 {strides = array<i32>} : memref<16x128xf32, #tpu.memory_space<vmem>>, vector<8x64xf32>,
    %200 = vector.extract_strided_slice %193 {offsets = [2, 0, 0], sizes = [1, 8, 64], strides = [1, 1, 1]} : vector<4x8x64xf32> to vector<1x8x64xf32>
    %201 = vector.shape_cast %200 : vector<1x8x64xf32> to vector<8x64xf32>
    %c8_137 = arith.constant 8 : index
    %c0_138 = arith.constant 0 : index
    %202 = vector.load %arg14[%c8_137, %c0_138] : memref<16x128xf32, #tpu.memory_space<vmem>>, vector<8x64xf32>
    tpu.vector_store %arg14[%c8_137, %c0_138], %201 {strides = array<i32>} : memref<16x128xf32, #tpu.memory_space<vmem>>, vector<8x64xf32>,
    %203 = vector.extract_strided_slice %193 {offsets = [3, 0, 0], sizes = [1, 8, 64], strides = [1, 1, 1]} : vector<4x8x64xf32> to vector<1x8x64xf32>
    %204 = vector.shape_cast %203 : vector<1x8x64xf32> to vector<8x64xf32>
    %c8_139 = arith.constant 8 : index
    %c64_140 = arith.constant 64 : index
    %205 = vector.load %arg14[%c8_139, %c64_140] : memref<16x128xf32, #tpu.memory_space<vmem>>, vector<8x64xf32>
    tpu.vector_store %arg14[%c8_139, %c64_140], %204 {strides = array<i32>} : memref<16x128xf32, #tpu.memory_space<vmem>>, vector<8x64xf32>,
    %c0_141 = arith.constant 0 : index
    %c0_142 = arith.constant 0 : index
    %206 = vector.load %arg14[%c0_141, %c0_142] : memref<16x128xf32, #tpu.memory_space<vmem>>, vector<16x128xf32>
    %207 = arith.truncf %206 : vector<16x128xf32> to vector<16x128xbf16>
    %c0_143 = arith.constant 0 : index
    %c0_144 = arith.constant 0 : index
    %c0_145 = arith.constant 0 : index
    %208 = vector.load %arg6[%c0_143, %c0_144, %c0_145] : memref<2x128x128xbf16, #tpu.memory_space<vmem>>, vector<1x128x128xbf16>
    %209 = vector.shape_cast %208 : vector<1x128x128xbf16> to vector<128x128xbf16>
    %cst_146 = arith.constant dense<0.000000e+00> : vector<16x128xf32>
    %210 = tpu.matmul %207, %209, %cst_146 {dimension_numbers = #tpu.dot_dimension_numbers<[1], [0], [0], [1], [0, 0, 1, 1], [], []>} : vector<16x128xbf16>, vector<128x128xbf16>, vector<16x128xf32> -> vector<16x128xf32>
    %211 = vector.broadcast %137 : vector<1x128xf32> to vector<16x128xf32>
    %212 = arith.addf %210, %211 : vector<16x128xf32>
    %213 = arith.addf %212, %120 : vector<16x128xf32>
    %cst_147 = arith.constant dense<0.000000e+00> : vector<16xf32>
    %214 = vector.multi_reduction <add>, %213, %cst_147 [1] : vector<16x128xf32> to vector<16xf32>
    %215 = vector.shape_cast %214 : vector<16xf32> to vector<16x1xf32>
    %cst_148 = arith.constant 1.280000e+02 : f32
    %216 = vector.broadcast %cst_148 : f32 to vector<16x1xf32>
    %217 = arith.divf %215, %216 : vector<16x1xf32>
    %218 = vector.broadcast %217 : vector<16x1xf32> to vector<16x128xf32>
    %219 = arith.subf %213, %218 : vector<16x128xf32>
    %220 = arith.mulf %219, %219 : vector<16x128xf32>
    %cst_149 = arith.constant dense<0.000000e+00> : vector<16xf32>
    %221 = vector.multi_reduction <add>, %220, %cst_149 [1] : vector<16x128xf32> to vector<16xf32>
    %222 = vector.shape_cast %221 : vector<16xf32> to vector<16x1xf32>
    %cst_150 = arith.constant 1.280000e+02 : f32
    %223 = vector.broadcast %cst_150 : f32 to vector<16x1xf32>
    %224 = arith.divf %222, %223 : vector<16x1xf32>
    %225 = vector.broadcast %217 : vector<16x1xf32> to vector<16x128xf32>
    %226 = arith.subf %213, %225 : vector<16x128xf32>
    %cst_151 = arith.constant 9.99999996E-13 : f32
    %227 = vector.broadcast %cst_151 : f32 to vector<16x1xf32>
    %228 = arith.addf %224, %227 : vector<16x1xf32>
    %229 = math.rsqrt %228 : vector<16x1xf32>
    %230 = vector.broadcast %229 : vector<16x1xf32> to vector<16x128xf32>
    %231 = arith.mulf %226, %230 : vector<16x128xf32>
    %232 = vector.broadcast %140 : vector<1x128xf32> to vector<16x128xf32>
    %233 = arith.mulf %231, %232 : vector<16x128xf32>
    %234 = vector.broadcast %141 : vector<1x128xf32> to vector<16x128xf32>
    %235 = arith.addf %233, %234 : vector<16x128xf32>
    %236 = arith.truncf %235 : vector<16x128xf32> to vector<16x128xbf16>
    %c0_152 = arith.constant 0 : index
    %c0_153 = arith.constant 0 : index
    %c0_154 = arith.constant 0 : index
    %237 = vector.load %arg7[%c0_152, %c0_153, %c0_154] : memref<2x128x256xbf16, #tpu.memory_space<vmem>>, vector<1x128x256xbf16>
    %238 = vector.shape_cast %237 : vector<1x128x256xbf16> to vector<128x256xbf16>
    %cst_155 = arith.constant dense<0.000000e+00> : vector<16x256xf32>
    %239 = tpu.matmul %236, %238, %cst_155 {dimension_numbers = #tpu.dot_dimension_numbers<[1], [0], [0], [1], [0, 0, 1, 1], [], []>} : vector<16x128xbf16>, vector<128x256xbf16>, vector<16x256xf32> -> vector<16x256xf32>
    %240 = vector.broadcast %138 : vector<1x256xf32> to vector<16x256xf32>
    %241 = arith.addf %239, %240 : vector<16x256xf32>
    %242 = arith.mulf %241, %241 : vector<16x256xf32>
    %243 = arith.mulf %241, %242 : vector<16x256xf32>
    %cst_156 = arith.constant 4.471500e-02 : f32
    %244 = vector.broadcast %cst_156 : f32 to vector<16x256xf32>
    %245 = arith.mulf %244, %243 : vector<16x256xf32>
    %246 = arith.addf %241, %245 : vector<16x256xf32>
    %cst_157 = arith.constant 0.797884583 : f32
    %247 = vector.broadcast %cst_157 : f32 to vector<16x256xf32>
    %248 = arith.mulf %247, %246 : vector<16x256xf32>
    %249 = math.tanh %248 : vector<16x256xf32>
    %cst_158 = arith.constant 1.000000e+00 : f32
    %250 = vector.broadcast %cst_158 : f32 to vector<16x256xf32>
    %251 = arith.addf %250, %249 : vector<16x256xf32>
    %cst_159 = arith.constant 5.000000e-01 : f32
    %252 = vector.broadcast %cst_159 : f32 to vector<16x256xf32>
    %253 = arith.mulf %252, %251 : vector<16x256xf32>
    %254 = arith.mulf %241, %253 : vector<16x256xf32>
    %255 = arith.truncf %254 : vector<16x256xf32> to vector<16x256xbf16>
    %c0_160 = arith.constant 0 : index
    %c0_161 = arith.constant 0 : index
    %c0_162 = arith.constant 0 : index
    %256 = vector.load %arg8[%c0_160, %c0_161, %c0_162] : memref<2x256x128xbf16, #tpu.memory_space<vmem>>, vector<1x256x128xbf16>
    %257 = vector.shape_cast %256 : vector<1x256x128xbf16> to vector<256x128xbf16>
    %cst_163 = arith.constant dense<0.000000e+00> : vector<16x128xf32>
    %258 = tpu.matmul %255, %257, %cst_163 {dimension_numbers = #tpu.dot_dimension_numbers<[1], [0], [0], [1], [0, 0, 1, 1], [], []>} : vector<16x256xbf16>, vector<256x128xbf16>, vector<16x128xf32> -> vector<16x128xf32>
    %259 = vector.broadcast %139 : vector<1x128xf32> to vector<16x128xf32>
    %260 = arith.addf %258, %259 : vector<16x128xf32>
    %261 = arith.addf %260, %235 : vector<16x128xf32>
    %cst_164 = arith.constant dense<0.000000e+00> : vector<16xf32>
    %262 = vector.multi_reduction <add>, %261, %cst_164 [1] : vector<16x128xf32> to vector<16xf32>
    %263 = vector.shape_cast %262 : vector<16xf32> to vector<16x1xf32>
    %cst_165 = arith.constant 1.280000e+02 : f32
    %264 = vector.broadcast %cst_165 : f32 to vector<16x1xf32>
    %265 = arith.divf %263, %264 : vector<16x1xf32>
    %266 = vector.broadcast %265 : vector<16x1xf32> to vector<16x128xf32>
    %267 = arith.subf %261, %266 : vector<16x128xf32>
    %268 = arith.mulf %267, %267 : vector<16x128xf32>
    %cst_166 = arith.constant dense<0.000000e+00> : vector<16xf32>
    %269 = vector.multi_reduction <add>, %268, %cst_166 [1] : vector<16x128xf32> to vector<16xf32>
    %270 = vector.shape_cast %269 : vector<16xf32> to vector<16x1xf32>
    %cst_167 = arith.constant 1.280000e+02 : f32
    %271 = vector.broadcast %cst_167 : f32 to vector<16x1xf32>
    %272 = arith.divf %270, %271 : vector<16x1xf32>
    %273 = vector.broadcast %265 : vector<16x1xf32> to vector<16x128xf32>
    %274 = arith.subf %261, %273 : vector<16x128xf32>
    %cst_168 = arith.constant 9.99999996E-13 : f32
    %275 = vector.broadcast %cst_168 : f32 to vector<16x1xf32>
    %276 = arith.addf %272, %275 : vector<16x1xf32>
    %277 = math.rsqrt %276 : vector<16x1xf32>
    %278 = vector.broadcast %277 : vector<16x1xf32> to vector<16x128xf32>
    %279 = arith.mulf %274, %278 : vector<16x128xf32>
    %280 = vector.broadcast %142 : vector<1x128xf32> to vector<16x128xf32>
    %281 = arith.mulf %279, %280 : vector<16x128xf32>
    %282 = vector.broadcast %143 : vector<1x128xf32> to vector<16x128xf32>
    %283 = arith.addf %281, %282 : vector<16x128xf32>
    %c12_169 = arith.constant 12 : index
    %c0_170 = arith.constant 0 : index
    %284 = vector.load %arg4[%c12_169, %c0_170] : memref<20x384xf32, #tpu.memory_space<vmem>>, vector<1x384xf32>
    %c13_171 = arith.constant 13 : index
    %c0_172 = arith.constant 0 : index
    %285 = vector.load %arg4[%c13_171, %c0_172] : memref<20x384xf32, #tpu.memory_space<vmem>>, vector<1x128xf32>
    %c14_173 = arith.constant 14 : index
    %c0_174 = arith.constant 0 : index
    %286 = vector.load %arg4[%c14_173, %c0_174] : memref<20x384xf32, #tpu.memory_space<vmem>>, vector<1x256xf32>
    %c15_175 = arith.constant 15 : index
    %c0_176 = arith.constant 0 : index
    %287 = vector.load %arg4[%c15_175, %c0_176] : memref<20x384xf32, #tpu.memory_space<vmem>>, vector<1x128xf32>
    %c16 = arith.constant 16 : index
    %c0_177 = arith.constant 0 : index
    %288 = vector.load %arg4[%c16, %c0_177] : memref<20x384xf32, #tpu.memory_space<vmem>>, vector<1x128xf32>
    %c17 = arith.constant 17 : index
    %c0_178 = arith.constant 0 : index
    %289 = vector.load %arg4[%c17, %c0_178] : memref<20x384xf32, #tpu.memory_space<vmem>>, vector<1x128xf32>
    %c18 = arith.constant 18 : index
    %c0_179 = arith.constant 0 : index
    %290 = vector.load %arg4[%c18, %c0_179] : memref<20x384xf32, #tpu.memory_space<vmem>>, vector<1x128xf32>
    %c19 = arith.constant 19 : index
    %c0_180 = arith.constant 0 : index
    %291 = vector.load %arg4[%c19, %c0_180] : memref<20x384xf32, #tpu.memory_space<vmem>>, vector<1x128xf32>
    %292 = arith.truncf %283 : vector<16x128xf32> to vector<16x128xbf16>
    %c1_181 = arith.constant 1 : index
    %c0_182 = arith.constant 0 : index
    %c0_183 = arith.constant 0 : index
    %293 = vector.load %arg5[%c1_181, %c0_182, %c0_183] : memref<2x128x384xbf16, #tpu.memory_space<vmem>>, vector<1x128x384xbf16>
    %294 = vector.shape_cast %293 : vector<1x128x384xbf16> to vector<128x384xbf16>
    %cst_184 = arith.constant dense<0.000000e+00> : vector<16x384xf32>
    %295 = tpu.matmul %292, %294, %cst_184 {dimension_numbers = #tpu.dot_dimension_numbers<[1], [0], [0], [1], [0, 0, 1, 1], [], []>} : vector<16x128xbf16>, vector<128x384xbf16>, vector<16x384xf32> -> vector<16x384xf32>
    %296 = vector.broadcast %284 : vector<1x384xf32> to vector<16x384xf32>
    %297 = arith.addf %295, %296 : vector<16x384xf32>
    %298 = vector.extract_strided_slice %297 {offsets = [0, 0], sizes = [16, 128], strides = [1, 1]} : vector<16x384xf32> to vector<16x128xf32>
    %299 = vector.extract_strided_slice %298 {offsets = [0, 0], sizes = [8, 64], strides = [1, 1]} : vector<16x128xf32> to vector<8x64xf32>
    %300 = vector.extract_strided_slice %298 {offsets = [0, 64], sizes = [8, 64], strides = [1, 1]} : vector<16x128xf32> to vector<8x64xf32>
    %301 = vector.extract_strided_slice %298 {offsets = [8, 0], sizes = [8, 64], strides = [1, 1]} : vector<16x128xf32> to vector<8x64xf32>
    %302 = vector.extract_strided_slice %298 {offsets = [8, 64], sizes = [8, 64], strides = [1, 1]} : vector<16x128xf32> to vector<8x64xf32>
    %303 = vector.shape_cast %299 : vector<8x64xf32> to vector<1x8x64xf32>
    %304 = vector.shape_cast %300 : vector<8x64xf32> to vector<1x8x64xf32>
    %305 = vector.shape_cast %301 : vector<8x64xf32> to vector<1x8x64xf32>
    %306 = vector.shape_cast %302 : vector<8x64xf32> to vector<1x8x64xf32>
    %307 = tpu.concatenate %303, %304, %305, %306 in 0 : vector<1x8x64xf32>, vector<1x8x64xf32>, vector<1x8x64xf32>, vector<1x8x64xf32> -> vector<4x8x64xf32>
    %308 = vector.extract_strided_slice %297 {offsets = [0, 128], sizes = [16, 128], strides = [1, 1]} : vector<16x384xf32> to vector<16x128xf32>
    %309 = vector.extract_strided_slice %308 {offsets = [0, 0], sizes = [8, 64], strides = [1, 1]} : vector<16x128xf32> to vector<8x64xf32>
    %310 = vector.extract_strided_slice %308 {offsets = [0, 64], sizes = [8, 64], strides = [1, 1]} : vector<16x128xf32> to vector<8x64xf32>
    %311 = vector.extract_strided_slice %308 {offsets = [8, 0], sizes = [8, 64], strides = [1, 1]} : vector<16x128xf32> to vector<8x64xf32>
    %312 = vector.extract_strided_slice %308 {offsets = [8, 64], sizes = [8, 64], strides = [1, 1]} : vector<16x128xf32> to vector<8x64xf32>
    %313 = vector.shape_cast %309 : vector<8x64xf32> to vector<1x8x64xf32>
    %314 = vector.shape_cast %310 : vector<8x64xf32> to vector<1x8x64xf32>
    %315 = vector.shape_cast %311 : vector<8x64xf32> to vector<1x8x64xf32>
    %316 = vector.shape_cast %312 : vector<8x64xf32> to vector<1x8x64xf32>
    %317 = tpu.concatenate %313, %314, %315, %316 in 0 : vector<1x8x64xf32>, vector<1x8x64xf32>, vector<1x8x64xf32>, vector<1x8x64xf32> -> vector<4x8x64xf32>
    %318 = vector.extract_strided_slice %297 {offsets = [0, 256], sizes = [16, 128], strides = [1, 1]} : vector<16x384xf32> to vector<16x128xf32>
    %319 = vector.extract_strided_slice %318 {offsets = [0, 0], sizes = [8, 64], strides = [1, 1]} : vector<16x128xf32> to vector<8x64xf32>
    %320 = vector.extract_strided_slice %318 {offsets = [0, 64], sizes = [8, 64], strides = [1, 1]} : vector<16x128xf32> to vector<8x64xf32>
    %321 = vector.extract_strided_slice %318 {offsets = [8, 0], sizes = [8, 64], strides = [1, 1]} : vector<16x128xf32> to vector<8x64xf32>
    %322 = vector.extract_strided_slice %318 {offsets = [8, 64], sizes = [8, 64], strides = [1, 1]} : vector<16x128xf32> to vector<8x64xf32>
    %323 = vector.shape_cast %319 : vector<8x64xf32> to vector<1x8x64xf32>
    %324 = vector.shape_cast %320 : vector<8x64xf32> to vector<1x8x64xf32>
    %325 = vector.shape_cast %321 : vector<8x64xf32> to vector<1x8x64xf32>
    %326 = vector.shape_cast %322 : vector<8x64xf32> to vector<1x8x64xf32>
    %327 = tpu.concatenate %323, %324, %325, %326 in 0 : vector<1x8x64xf32>, vector<1x8x64xf32>, vector<1x8x64xf32>, vector<1x8x64xf32> -> vector<4x8x64xf32>
    "tpu.trace_start"() <{level = 10 : i32, message = "bqd,bkd->bqk"}> : () -> ()
    %cst_185 = arith.constant dense<0.000000e+00> : vector<4x8x8xf32>
    %328 = tpu.matmul %307, %317, %cst_185 {dimension_numbers = #tpu.dot_dimension_numbers<[2], [2], [1], [1], [0, 0, 0, 1, 1, 1], [0], [0]>} : vector<4x8x64xf32>, vector<4x8x64xf32>, vector<4x8x8xf32> -> vector<4x8x8xf32>
    "tpu.trace_stop"() : () -> ()
    %329 = vector.broadcast %135 : vector<4x1x8xf32> to vector<4x8x8xf32>
    %330 = arith.addf %328, %329 : vector<4x8x8xf32>
    %cst_186 = arith.constant dense<0xFF800000> : vector<4x8xf32>
    %331 = vector.multi_reduction <maximumf>, %330, %cst_186 [2] : vector<4x8x8xf32> to vector<4x8xf32>
    %332 = vector.shape_cast %331 : vector<4x8xf32> to vector<4x8x1xf32>
    %333 = vector.broadcast %332 : vector<4x8x1xf32> to vector<4x8x8xf32>
    %334 = arith.subf %330, %333 : vector<4x8x8xf32>
    %335 = math.exp %334 : vector<4x8x8xf32>
    %cst_187 = arith.constant dense<0.000000e+00> : vector<4x8xf32>
    %336 = vector.multi_reduction <add>, %335, %cst_187 [2] : vector<4x8x8xf32> to vector<4x8xf32>
    %337 = vector.shape_cast %336 : vector<4x8xf32> to vector<4x8x1xf32>
    %338 = tpu.reciprocal %337 {approx = true} : vector<4x8x1xf32> -> vector<4x8x1xf32>
    %339 = vector.broadcast %338 : vector<4x8x1xf32> to vector<4x8x8xf32>
    %340 = arith.mulf %335, %339 : vector<4x8x8xf32>
    "tpu.trace_start"() <{level = 10 : i32, message = "bqk,bkd->bqd"}> : () -> ()
    %cst_188 = arith.constant dense<0.000000e+00> : vector<4x8x64xf32>
    %341 = tpu.matmul %340, %327, %cst_188 {dimension_numbers = #tpu.dot_dimension_numbers<[2], [1], [1], [2], [0, 0, 0, 1, 1, 2], [0], [0]>} : vector<4x8x8xf32>, vector<4x8x64xf32>, vector<4x8x64xf32> -> vector<4x8x64xf32>
    "tpu.trace_stop"() : () -> ()
    %342 = vector.extract_strided_slice %341 {offsets = [0, 0, 0], sizes = [1, 8, 64], strides = [1, 1, 1]} : vector<4x8x64xf32> to vector<1x8x64xf32>
    %343 = vector.shape_cast %342 : vector<1x8x64xf32> to vector<8x64xf32>
    %c0_189 = arith.constant 0 : index
    %c0_190 = arith.constant 0 : index
    %344 = vector.load %arg14[%c0_189, %c0_190] : memref<16x128xf32, #tpu.memory_space<vmem>>, vector<8x64xf32>
    tpu.vector_store %arg14[%c0_189, %c0_190], %343 {strides = array<i32>} : memref<16x128xf32, #tpu.memory_space<vmem>>, vector<8x64xf32>,
    %345 = vector.extract_strided_slice %341 {offsets = [1, 0, 0], sizes = [1, 8, 64], strides = [1, 1, 1]} : vector<4x8x64xf32> to vector<1x8x64xf32>
    %346 = vector.shape_cast %345 : vector<1x8x64xf32> to vector<8x64xf32>
    %c0_191 = arith.constant 0 : index
    %c64_192 = arith.constant 64 : index
    %347 = vector.load %arg14[%c0_191, %c64_192] : memref<16x128xf32, #tpu.memory_space<vmem>>, vector<8x64xf32>
    tpu.vector_store %arg14[%c0_191, %c64_192], %346 {strides = array<i32>} : memref<16x128xf32, #tpu.memory_space<vmem>>, vector<8x64xf32>,
    %348 = vector.extract_strided_slice %341 {offsets = [2, 0, 0], sizes = [1, 8, 64], strides = [1, 1, 1]} : vector<4x8x64xf32> to vector<1x8x64xf32>
    %349 = vector.shape_cast %348 : vector<1x8x64xf32> to vector<8x64xf32>
    %c8_193 = arith.constant 8 : index
    %c0_194 = arith.constant 0 : index
    %350 = vector.load %arg14[%c8_193, %c0_194] : memref<16x128xf32, #tpu.memory_space<vmem>>, vector<8x64xf32>
    tpu.vector_store %arg14[%c8_193, %c0_194], %349 {strides = array<i32>} : memref<16x128xf32, #tpu.memory_space<vmem>>, vector<8x64xf32>,
    %351 = vector.extract_strided_slice %341 {offsets = [3, 0, 0], sizes = [1, 8, 64], strides = [1, 1, 1]} : vector<4x8x64xf32> to vector<1x8x64xf32>
    %352 = vector.shape_cast %351 : vector<1x8x64xf32> to vector<8x64xf32>
    %c8_195 = arith.constant 8 : index
    %c64_196 = arith.constant 64 : index
    %353 = vector.load %arg14[%c8_195, %c64_196] : memref<16x128xf32, #tpu.memory_space<vmem>>, vector<8x64xf32>
    tpu.vector_store %arg14[%c8_195, %c64_196], %352 {strides = array<i32>} : memref<16x128xf32, #tpu.memory_space<vmem>>, vector<8x64xf32>,
    %c0_197 = arith.constant 0 : index
    %c0_198 = arith.constant 0 : index
    %354 = vector.load %arg14[%c0_197, %c0_198] : memref<16x128xf32, #tpu.memory_space<vmem>>, vector<16x128xf32>
    %355 = arith.truncf %354 : vector<16x128xf32> to vector<16x128xbf16>
    %c1_199 = arith.constant 1 : index
    %c0_200 = arith.constant 0 : index
    %c0_201 = arith.constant 0 : index
    %356 = vector.load %arg6[%c1_199, %c0_200, %c0_201] : memref<2x128x128xbf16, #tpu.memory_space<vmem>>, vector<1x128x128xbf16>
    %357 = vector.shape_cast %356 : vector<1x128x128xbf16> to vector<128x128xbf16>
    %cst_202 = arith.constant dense<0.000000e+00> : vector<16x128xf32>
    %358 = tpu.matmul %355, %357, %cst_202 {dimension_numbers = #tpu.dot_dimension_numbers<[1], [0], [0], [1], [0, 0, 1, 1], [], []>} : vector<16x128xbf16>, vector<128x128xbf16>, vector<16x128xf32> -> vector<16x128xf32>
    %359 = vector.broadcast %285 : vector<1x128xf32> to vector<16x128xf32>
    %360 = arith.addf %358, %359 : vector<16x128xf32>
    %361 = arith.addf %360, %283 : vector<16x128xf32>
    %cst_203 = arith.constant dense<0.000000e+00> : vector<16xf32>
    %362 = vector.multi_reduction <add>, %361, %cst_203 [1] : vector<16x128xf32> to vector<16xf32>
    %363 = vector.shape_cast %362 : vector<16xf32> to vector<16x1xf32>
    %cst_204 = arith.constant 1.280000e+02 : f32
    %364 = vector.broadcast %cst_204 : f32 to vector<16x1xf32>
    %365 = arith.divf %363, %364 : vector<16x1xf32>
    %366 = vector.broadcast %365 : vector<16x1xf32> to vector<16x128xf32>
    %367 = arith.subf %361, %366 : vector<16x128xf32>
    %368 = arith.mulf %367, %367 : vector<16x128xf32>
    %cst_205 = arith.constant dense<0.000000e+00> : vector<16xf32>
    %369 = vector.multi_reduction <add>, %368, %cst_205 [1] : vector<16x128xf32> to vector<16xf32>
    %370 = vector.shape_cast %369 : vector<16xf32> to vector<16x1xf32>
    %cst_206 = arith.constant 1.280000e+02 : f32
    %371 = vector.broadcast %cst_206 : f32 to vector<16x1xf32>
    %372 = arith.divf %370, %371 : vector<16x1xf32>
    %373 = vector.broadcast %365 : vector<16x1xf32> to vector<16x128xf32>
    %374 = arith.subf %361, %373 : vector<16x128xf32>
    %cst_207 = arith.constant 9.99999996E-13 : f32
    %375 = vector.broadcast %cst_207 : f32 to vector<16x1xf32>
    %376 = arith.addf %372, %375 : vector<16x1xf32>
    %377 = math.rsqrt %376 : vector<16x1xf32>
    %378 = vector.broadcast %377 : vector<16x1xf32> to vector<16x128xf32>
    %379 = arith.mulf %374, %378 : vector<16x128xf32>
    %380 = vector.broadcast %288 : vector<1x128xf32> to vector<16x128xf32>
    %381 = arith.mulf %379, %380 : vector<16x128xf32>
    %382 = vector.broadcast %289 : vector<1x128xf32> to vector<16x128xf32>
    %383 = arith.addf %381, %382 : vector<16x128xf32>
    %384 = arith.truncf %383 : vector<16x128xf32> to vector<16x128xbf16>
    %c1_208 = arith.constant 1 : index
    %c0_209 = arith.constant 0 : index
    %c0_210 = arith.constant 0 : index
    %385 = vector.load %arg7[%c1_208, %c0_209, %c0_210] : memref<2x128x256xbf16, #tpu.memory_space<vmem>>, vector<1x128x256xbf16>
    %386 = vector.shape_cast %385 : vector<1x128x256xbf16> to vector<128x256xbf16>
    %cst_211 = arith.constant dense<0.000000e+00> : vector<16x256xf32>
    %387 = tpu.matmul %384, %386, %cst_211 {dimension_numbers = #tpu.dot_dimension_numbers<[1], [0], [0], [1], [0, 0, 1, 1], [], []>} : vector<16x128xbf16>, vector<128x256xbf16>, vector<16x256xf32> -> vector<16x256xf32>
    %388 = vector.broadcast %286 : vector<1x256xf32> to vector<16x256xf32>
    %389 = arith.addf %387, %388 : vector<16x256xf32>
    %390 = arith.mulf %389, %389 : vector<16x256xf32>
    %391 = arith.mulf %389, %390 : vector<16x256xf32>
    %cst_212 = arith.constant 4.471500e-02 : f32
    %392 = vector.broadcast %cst_212 : f32 to vector<16x256xf32>
    %393 = arith.mulf %392, %391 : vector<16x256xf32>
    %394 = arith.addf %389, %393 : vector<16x256xf32>
    %cst_213 = arith.constant 0.797884583 : f32
    %395 = vector.broadcast %cst_213 : f32 to vector<16x256xf32>
    %396 = arith.mulf %395, %394 : vector<16x256xf32>
    %397 = math.tanh %396 : vector<16x256xf32>
    %cst_214 = arith.constant 1.000000e+00 : f32
    %398 = vector.broadcast %cst_214 : f32 to vector<16x256xf32>
    %399 = arith.addf %398, %397 : vector<16x256xf32>
    %cst_215 = arith.constant 5.000000e-01 : f32
    %400 = vector.broadcast %cst_215 : f32 to vector<16x256xf32>
    %401 = arith.mulf %400, %399 : vector<16x256xf32>
    %402 = arith.mulf %389, %401 : vector<16x256xf32>
    %403 = arith.truncf %402 : vector<16x256xf32> to vector<16x256xbf16>
    %c1_216 = arith.constant 1 : index
    %c0_217 = arith.constant 0 : index
    %c0_218 = arith.constant 0 : index
    %404 = vector.load %arg8[%c1_216, %c0_217, %c0_218] : memref<2x256x128xbf16, #tpu.memory_space<vmem>>, vector<1x256x128xbf16>
    %405 = vector.shape_cast %404 : vector<1x256x128xbf16> to vector<256x128xbf16>
    %cst_219 = arith.constant dense<0.000000e+00> : vector<16x128xf32>
    %406 = tpu.matmul %403, %405, %cst_219 {dimension_numbers = #tpu.dot_dimension_numbers<[1], [0], [0], [1], [0, 0, 1, 1], [], []>} : vector<16x256xbf16>, vector<256x128xbf16>, vector<16x128xf32> -> vector<16x128xf32>
    %407 = vector.broadcast %287 : vector<1x128xf32> to vector<16x128xf32>
    %408 = arith.addf %406, %407 : vector<16x128xf32>
    %409 = arith.addf %408, %383 : vector<16x128xf32>
    %cst_220 = arith.constant dense<0.000000e+00> : vector<16xf32>
    %410 = vector.multi_reduction <add>, %409, %cst_220 [1] : vector<16x128xf32> to vector<16xf32>
    %411 = vector.shape_cast %410 : vector<16xf32> to vector<16x1xf32>
    %cst_221 = arith.constant 1.280000e+02 : f32
    %412 = vector.broadcast %cst_221 : f32 to vector<16x1xf32>
    %413 = arith.divf %411, %412 : vector<16x1xf32>
    %414 = vector.broadcast %413 : vector<16x1xf32> to vector<16x128xf32>
    %415 = arith.subf %409, %414 : vector<16x128xf32>
    %416 = arith.mulf %415, %415 : vector<16x128xf32>
    %cst_222 = arith.constant dense<0.000000e+00> : vector<16xf32>
    %417 = vector.multi_reduction <add>, %416, %cst_222 [1] : vector<16x128xf32> to vector<16xf32>
    %418 = vector.shape_cast %417 : vector<16xf32> to vector<16x1xf32>
    %cst_223 = arith.constant 1.280000e+02 : f32
    %419 = vector.broadcast %cst_223 : f32 to vector<16x1xf32>
    %420 = arith.divf %418, %419 : vector<16x1xf32>
    %421 = vector.broadcast %413 : vector<16x1xf32> to vector<16x128xf32>
    %422 = arith.subf %409, %421 : vector<16x128xf32>
    %cst_224 = arith.constant 9.99999996E-13 : f32
    %423 = vector.broadcast %cst_224 : f32 to vector<16x1xf32>
    %424 = arith.addf %420, %423 : vector<16x1xf32>
    %425 = math.rsqrt %424 : vector<16x1xf32>
    %426 = vector.broadcast %425 : vector<16x1xf32> to vector<16x128xf32>
    %427 = arith.mulf %422, %426 : vector<16x128xf32>
    %428 = vector.broadcast %290 : vector<1x128xf32> to vector<16x128xf32>
    %429 = arith.mulf %427, %428 : vector<16x128xf32>
    %430 = vector.broadcast %291 : vector<1x128xf32> to vector<16x128xf32>
    %431 = arith.addf %429, %430 : vector<16x128xf32>
    %c2_225 = arith.constant 2 : index
    %c0_226 = arith.constant 0 : index
    %432 = vector.load %arg4[%c2_225, %c0_226] : memref<20x384xf32, #tpu.memory_space<vmem>>, vector<1x256xf32>
    %433 = arith.truncf %431 : vector<16x128xf32> to vector<16x128xbf16>
    %c0_227 = arith.constant 0 : index
    %c0_228 = arith.constant 0 : index
    %434 = vector.load %arg9[%c0_227, %c0_228] : memref<128x256xbf16, #tpu.memory_space<vmem>>, vector<128x256xbf16>
    %cst_229 = arith.constant dense<0.000000e+00> : vector<16x256xf32>
    %435 = tpu.matmul %433, %434, %cst_229 {dimension_numbers = #tpu.dot_dimension_numbers<[1], [0], [0], [1], [0, 0, 1, 1], [], []>} : vector<16x128xbf16>, vector<128x256xbf16>, vector<16x256xf32> -> vector<16x256xf32>
    %436 = vector.broadcast %432 : vector<1x256xf32> to vector<16x256xf32>
    %437 = arith.addf %435, %436 : vector<16x256xf32>
    %438 = vector.shape_cast %437 : vector<16x256xf32> to vector<2x8x256xf32>
    %c0_230 = arith.constant 0 : index
    %c0_231 = arith.constant 0 : index
    %c0_232 = arith.constant 0 : index
    %439 = vector.load %arg15[%c0_230, %c0_231, %c0_232] : memref<2x8x256xf32, #tpu.memory_space<vmem>>, vector<2x8x256xf32>
    tpu.vector_store %arg15[%c0_230, %c0_231, %c0_232], %438 {strides = array<i32>} : memref<2x8x256xf32, #tpu.memory_space<vmem>>, vector<2x8x256xf32>,
    %440 = tpu.iota {dimensions = array<i32: 1>} : vector<1x256xi32>
    %c32_i32 = arith.constant 32 : i32
    %441 = vector.broadcast %c32_i32 : i32 to vector<1x256xi32>
    %442 = arith.andi %440, %441 : vector<1x256xi32>
    %c0_i32 = arith.constant 0 : i32
    %443 = vector.broadcast %c0_i32 : i32 to vector<1x256xi32>
    %444 = arith.cmpi eq, %442, %443 : vector<1x256xi32>
    %c0_233 = arith.constant 0 : index
    %c0_234 = arith.constant 0 : index
    %445 = vector.load %arg10[%c0_233, %c0_234] : memref<64x256xbf16, #tpu.memory_space<vmem>>, vector<64x256xbf16>
    %cst_235 = arith.constant 0.000000e+00 : f32
    %446 = vector.broadcast %cst_235 : f32 to vector<2x64xf32>
    %cst_236 = arith.constant 0.000000e+00 : f32
    %447 = vector.broadcast %cst_236 : f32 to vector<2x64xf32>
    %cst_237 = arith.constant 0.000000e+00 : f32
    %448 = vector.broadcast %cst_237 : f32 to vector<2x64xf32>
    %c0_238 = arith.constant 0 : index
    %c0_239 = arith.constant 0 : index
    %c0_240 = arith.constant 0 : index
    %449 = vector.load %arg15[%c0_238, %c0_239, %c0_240] : memref<2x8x256xf32, #tpu.memory_space<vmem>>, vector<2x1x256xf32>
    %450 = vector.shape_cast %449 : vector<2x1x256xf32> to vector<2x256xf32>
    %c0_241 = arith.constant 0 : index
    %c7_242 = arith.constant 7 : index
    %c0_243 = arith.constant 0 : index
    %451 = vector.load %arg15[%c0_241, %c7_242, %c0_243] : memref<2x8x256xf32, #tpu.memory_space<vmem>>, vector<2x1x256xf32>
    %452 = vector.shape_cast %451 : vector<2x1x256xf32> to vector<2x256xf32>
    %453 = vector.shape_cast %444 : vector<1x256xi1> to vector<1x256xi1>
    %454 = vector.broadcast %453 : vector<1x256xi1> to vector<2x256xi1>
    %455 = arith.select %454, %450, %452 : vector<2x256xi1>, vector<2x256xf32>
    %456 = arith.truncf %446 : vector<2x64xf32> to vector<2x64xbf16>
    %cst_244 = arith.constant dense<0.000000e+00> : vector<2x256xf32>
    %457 = tpu.matmul %456, %445, %cst_244 {dimension_numbers = #tpu.dot_dimension_numbers<[1], [0], [0], [1], [0, 0, 1, 1], [], []>} : vector<2x64xbf16>, vector<64x256xbf16>, vector<2x256xf32> -> vector<2x256xf32>
    %458 = arith.addf %455, %457 : vector<2x256xf32>
    %cst_245 = arith.constant 5.000000e-01 : f32
    %459 = vector.broadcast %cst_245 : f32 to vector<2x256xf32>
    %460 = arith.mulf %459, %458 : vector<2x256xf32>
    %461 = math.tanh %460 : vector<2x256xf32>
    %462 = vector.extract_strided_slice %461 {offsets = [0, 0], sizes = [2, 64], strides = [1, 1]} : vector<2x256xf32> to vector<2x64xf32>
    %cst_246 = arith.constant 5.000000e-01 : f32
    %463 = vector.broadcast %cst_246 : f32 to vector<2x64xf32>
    %464 = arith.mulf %463, %462 : vector<2x64xf32>
    %cst_247 = arith.constant 5.000000e-01 : f32
    %465 = vector.broadcast %cst_247 : f32 to vector<2x64xf32>
    %466 = arith.addf %464, %465 : vector<2x64xf32>
    %467 = vector.extract_strided_slice %461 {offsets = [0, 64], sizes = [2, 64], strides = [1, 1]} : vector<2x256xf32> to vector<2x64xf32>
    %cst_248 = arith.constant 5.000000e-01 : f32
    %468 = vector.broadcast %cst_248 : f32 to vector<2x64xf32>
    %469 = arith.mulf %468, %467 : vector<2x64xf32>
    %cst_249 = arith.constant 5.000000e-01 : f32
    %470 = vector.broadcast %cst_249 : f32 to vector<2x64xf32>
    %471 = arith.addf %469, %470 : vector<2x64xf32>
    %472 = vector.extract_strided_slice %461 {offsets = [0, 128], sizes = [2, 64], strides = [1, 1]} : vector<2x256xf32> to vector<2x64xf32>
    %473 = vector.extract_strided_slice %461 {offsets = [0, 192], sizes = [2, 64], strides = [1, 1]} : vector<2x256xf32> to vector<2x64xf32>
    %cst_250 = arith.constant 5.000000e-01 : f32
    %474 = vector.broadcast %cst_250 : f32 to vector<2x64xf32>
    %475 = arith.mulf %474, %473 : vector<2x64xf32>
    %cst_251 = arith.constant 5.000000e-01 : f32
    %476 = vector.broadcast %cst_251 : f32 to vector<2x64xf32>
    %477 = arith.addf %475, %476 : vector<2x64xf32>
    %478 = arith.mulf %471, %447 : vector<2x64xf32>
    %479 = arith.mulf %466, %472 : vector<2x64xf32>
    %480 = arith.addf %478, %479 : vector<2x64xf32>
    %481 = math.tanh %480 : vector<2x64xf32>
    %482 = arith.mulf %477, %481 : vector<2x64xf32>
    %483 = arith.addf %448, %482 : vector<2x64xf32>
    %c0_252 = arith.constant 0 : index
    %c1_253 = arith.constant 1 : index
    %c0_254 = arith.constant 0 : index
    %484 = vector.load %arg15[%c0_252, %c1_253, %c0_254] : memref<2x8x256xf32, #tpu.memory_space<vmem>>, vector<2x1x256xf32>
    %485 = vector.shape_cast %484 : vector<2x1x256xf32> to vector<2x256xf32>
    %c0_255 = arith.constant 0 : index
    %c6_256 = arith.constant 6 : index
    %c0_257 = arith.constant 0 : index
    %486 = vector.load %arg15[%c0_255, %c6_256, %c0_257] : memref<2x8x256xf32, #tpu.memory_space<vmem>>, vector<2x1x256xf32>
    %487 = vector.shape_cast %486 : vector<2x1x256xf32> to vector<2x256xf32>
    %488 = vector.shape_cast %444 : vector<1x256xi1> to vector<1x256xi1>
    %489 = vector.broadcast %488 : vector<1x256xi1> to vector<2x256xi1>
    %490 = arith.select %489, %485, %487 : vector<2x256xi1>, vector<2x256xf32>
    %491 = arith.truncf %482 : vector<2x64xf32> to vector<2x64xbf16>
    %cst_258 = arith.constant dense<0.000000e+00> : vector<2x256xf32>
    %492 = tpu.matmul %491, %445, %cst_258 {dimension_numbers = #tpu.dot_dimension_numbers<[1], [0], [0], [1], [0, 0, 1, 1], [], []>} : vector<2x64xbf16>, vector<64x256xbf16>, vector<2x256xf32> -> vector<2x256xf32>
    %493 = arith.addf %490, %492 : vector<2x256xf32>
    %cst_259 = arith.constant 5.000000e-01 : f32
    %494 = vector.broadcast %cst_259 : f32 to vector<2x256xf32>
    %495 = arith.mulf %494, %493 : vector<2x256xf32>
    %496 = math.tanh %495 : vector<2x256xf32>
    %497 = vector.extract_strided_slice %496 {offsets = [0, 0], sizes = [2, 64], strides = [1, 1]} : vector<2x256xf32> to vector<2x64xf32>
    %cst_260 = arith.constant 5.000000e-01 : f32
    %498 = vector.broadcast %cst_260 : f32 to vector<2x64xf32>
    %499 = arith.mulf %498, %497 : vector<2x64xf32>
    %cst_261 = arith.constant 5.000000e-01 : f32
    %500 = vector.broadcast %cst_261 : f32 to vector<2x64xf32>
    %501 = arith.addf %499, %500 : vector<2x64xf32>
    %502 = vector.extract_strided_slice %496 {offsets = [0, 64], sizes = [2, 64], strides = [1, 1]} : vector<2x256xf32> to vector<2x64xf32>
    %cst_262 = arith.constant 5.000000e-01 : f32
    %503 = vector.broadcast %cst_262 : f32 to vector<2x64xf32>
    %504 = arith.mulf %503, %502 : vector<2x64xf32>
    %cst_263 = arith.constant 5.000000e-01 : f32
    %505 = vector.broadcast %cst_263 : f32 to vector<2x64xf32>
    %506 = arith.addf %504, %505 : vector<2x64xf32>
    %507 = vector.extract_strided_slice %496 {offsets = [0, 128], sizes = [2, 64], strides = [1, 1]} : vector<2x256xf32> to vector<2x64xf32>
    %508 = vector.extract_strided_slice %496 {offsets = [0, 192], sizes = [2, 64], strides = [1, 1]} : vector<2x256xf32> to vector<2x64xf32>
    %cst_264 = arith.constant 5.000000e-01 : f32
    %509 = vector.broadcast %cst_264 : f32 to vector<2x64xf32>
    %510 = arith.mulf %509, %508 : vector<2x64xf32>
    %cst_265 = arith.constant 5.000000e-01 : f32
    %511 = vector.broadcast %cst_265 : f32 to vector<2x64xf32>
    %512 = arith.addf %510, %511 : vector<2x64xf32>
    %513 = arith.mulf %506, %480 : vector<2x64xf32>
    %514 = arith.mulf %501, %507 : vector<2x64xf32>
    %515 = arith.addf %513, %514 : vector<2x64xf32>
    %516 = math.tanh %515 : vector<2x64xf32>
    %517 = arith.mulf %512, %516 : vector<2x64xf32>
    %518 = arith.addf %483, %517 : vector<2x64xf32>
    %c0_266 = arith.constant 0 : index
    %c2_267 = arith.constant 2 : index
    %c0_268 = arith.constant 0 : index
    %519 = vector.load %arg15[%c0_266, %c2_267, %c0_268] : memref<2x8x256xf32, #tpu.memory_space<vmem>>, vector<2x1x256xf32>
    %520 = vector.shape_cast %519 : vector<2x1x256xf32> to vector<2x256xf32>
    %c0_269 = arith.constant 0 : index
    %c5_270 = arith.constant 5 : index
    %c0_271 = arith.constant 0 : index
    %521 = vector.load %arg15[%c0_269, %c5_270, %c0_271] : memref<2x8x256xf32, #tpu.memory_space<vmem>>, vector<2x1x256xf32>
    %522 = vector.shape_cast %521 : vector<2x1x256xf32> to vector<2x256xf32>
    %523 = vector.shape_cast %444 : vector<1x256xi1> to vector<1x256xi1>
    %524 = vector.broadcast %523 : vector<1x256xi1> to vector<2x256xi1>
    %525 = arith.select %524, %520, %522 : vector<2x256xi1>, vector<2x256xf32>
    %526 = arith.truncf %517 : vector<2x64xf32> to vector<2x64xbf16>
    %cst_272 = arith.constant dense<0.000000e+00> : vector<2x256xf32>
    %527 = tpu.matmul %526, %445, %cst_272 {dimension_numbers = #tpu.dot_dimension_numbers<[1], [0], [0], [1], [0, 0, 1, 1], [], []>} : vector<2x64xbf16>, vector<64x256xbf16>, vector<2x256xf32> -> vector<2x256xf32>
    %528 = arith.addf %525, %527 : vector<2x256xf32>
    %cst_273 = arith.constant 5.000000e-01 : f32
    %529 = vector.broadcast %cst_273 : f32 to vector<2x256xf32>
    %530 = arith.mulf %529, %528 : vector<2x256xf32>
    %531 = math.tanh %530 : vector<2x256xf32>
    %532 = vector.extract_strided_slice %531 {offsets = [0, 0], sizes = [2, 64], strides = [1, 1]} : vector<2x256xf32> to vector<2x64xf32>
    %cst_274 = arith.constant 5.000000e-01 : f32
    %533 = vector.broadcast %cst_274 : f32 to vector<2x64xf32>
    %534 = arith.mulf %533, %532 : vector<2x64xf32>
    %cst_275 = arith.constant 5.000000e-01 : f32
    %535 = vector.broadcast %cst_275 : f32 to vector<2x64xf32>
    %536 = arith.addf %534, %535 : vector<2x64xf32>
    %537 = vector.extract_strided_slice %531 {offsets = [0, 64], sizes = [2, 64], strides = [1, 1]} : vector<2x256xf32> to vector<2x64xf32>
    %cst_276 = arith.constant 5.000000e-01 : f32
    %538 = vector.broadcast %cst_276 : f32 to vector<2x64xf32>
    %539 = arith.mulf %538, %537 : vector<2x64xf32>
    %cst_277 = arith.constant 5.000000e-01 : f32
    %540 = vector.broadcast %cst_277 : f32 to vector<2x64xf32>
    %541 = arith.addf %539, %540 : vector<2x64xf32>
    %542 = vector.extract_strided_slice %531 {offsets = [0, 128], sizes = [2, 64], strides = [1, 1]} : vector<2x256xf32> to vector<2x64xf32>
    %543 = vector.extract_strided_slice %531 {offsets = [0, 192], sizes = [2, 64], strides = [1, 1]} : vector<2x256xf32> to vector<2x64xf32>
    %cst_278 = arith.constant 5.000000e-01 : f32
    %544 = vector.broadcast %cst_278 : f32 to vector<2x64xf32>
    %545 = arith.mulf %544, %543 : vector<2x64xf32>
    %cst_279 = arith.constant 5.000000e-01 : f32
    %546 = vector.broadcast %cst_279 : f32 to vector<2x64xf32>
    %547 = arith.addf %545, %546 : vector<2x64xf32>
    %548 = arith.mulf %541, %515 : vector<2x64xf32>
    %549 = arith.mulf %536, %542 : vector<2x64xf32>
    %550 = arith.addf %548, %549 : vector<2x64xf32>
    %551 = math.tanh %550 : vector<2x64xf32>
    %552 = arith.mulf %547, %551 : vector<2x64xf32>
    %553 = arith.addf %518, %552 : vector<2x64xf32>
    %c0_280 = arith.constant 0 : index
    %c3_281 = arith.constant 3 : index
    %c0_282 = arith.constant 0 : index
    %554 = vector.load %arg15[%c0_280, %c3_281, %c0_282] : memref<2x8x256xf32, #tpu.memory_space<vmem>>, vector<2x1x256xf32>
    %555 = vector.shape_cast %554 : vector<2x1x256xf32> to vector<2x256xf32>
    %c0_283 = arith.constant 0 : index
    %c4_284 = arith.constant 4 : index
    %c0_285 = arith.constant 0 : index
    %556 = vector.load %arg15[%c0_283, %c4_284, %c0_285] : memref<2x8x256xf32, #tpu.memory_space<vmem>>, vector<2x1x256xf32>
    %557 = vector.shape_cast %556 : vector<2x1x256xf32> to vector<2x256xf32>
    %558 = vector.shape_cast %444 : vector<1x256xi1> to vector<1x256xi1>
    %559 = vector.broadcast %558 : vector<1x256xi1> to vector<2x256xi1>
    %560 = arith.select %559, %555, %557 : vector<2x256xi1>, vector<2x256xf32>
    %561 = arith.truncf %552 : vector<2x64xf32> to vector<2x64xbf16>
    %cst_286 = arith.constant dense<0.000000e+00> : vector<2x256xf32>
    %562 = tpu.matmul %561, %445, %cst_286 {dimension_numbers = #tpu.dot_dimension_numbers<[1], [0], [0], [1], [0, 0, 1, 1], [], []>} : vector<2x64xbf16>, vector<64x256xbf16>, vector<2x256xf32> -> vector<2x256xf32>
    %563 = arith.addf %560, %562 : vector<2x256xf32>
    %cst_287 = arith.constant 5.000000e-01 : f32
    %564 = vector.broadcast %cst_287 : f32 to vector<2x256xf32>
    %565 = arith.mulf %564, %563 : vector<2x256xf32>
    %566 = math.tanh %565 : vector<2x256xf32>
    %567 = vector.extract_strided_slice %566 {offsets = [0, 0], sizes = [2, 64], strides = [1, 1]} : vector<2x256xf32> to vector<2x64xf32>
    %cst_288 = arith.constant 5.000000e-01 : f32
    %568 = vector.broadcast %cst_288 : f32 to vector<2x64xf32>
    %569 = arith.mulf %568, %567 : vector<2x64xf32>
    %cst_289 = arith.constant 5.000000e-01 : f32
    %570 = vector.broadcast %cst_289 : f32 to vector<2x64xf32>
    %571 = arith.addf %569, %570 : vector<2x64xf32>
    %572 = vector.extract_strided_slice %566 {offsets = [0, 64], sizes = [2, 64], strides = [1, 1]} : vector<2x256xf32> to vector<2x64xf32>
    %cst_290 = arith.constant 5.000000e-01 : f32
    %573 = vector.broadcast %cst_290 : f32 to vector<2x64xf32>
    %574 = arith.mulf %573, %572 : vector<2x64xf32>
    %cst_291 = arith.constant 5.000000e-01 : f32
    %575 = vector.broadcast %cst_291 : f32 to vector<2x64xf32>
    %576 = arith.addf %574, %575 : vector<2x64xf32>
    %577 = vector.extract_strided_slice %566 {offsets = [0, 128], sizes = [2, 64], strides = [1, 1]} : vector<2x256xf32> to vector<2x64xf32>
    %578 = vector.extract_strided_slice %566 {offsets = [0, 192], sizes = [2, 64], strides = [1, 1]} : vector<2x256xf32> to vector<2x64xf32>
    %cst_292 = arith.constant 5.000000e-01 : f32
    %579 = vector.broadcast %cst_292 : f32 to vector<2x64xf32>
    %580 = arith.mulf %579, %578 : vector<2x64xf32>
    %cst_293 = arith.constant 5.000000e-01 : f32
    %581 = vector.broadcast %cst_293 : f32 to vector<2x64xf32>
    %582 = arith.addf %580, %581 : vector<2x64xf32>
    %583 = arith.mulf %576, %550 : vector<2x64xf32>
    %584 = arith.mulf %571, %577 : vector<2x64xf32>
    %585 = arith.addf %583, %584 : vector<2x64xf32>
    %586 = math.tanh %585 : vector<2x64xf32>
    %587 = arith.mulf %582, %586 : vector<2x64xf32>
    %588 = arith.addf %553, %587 : vector<2x64xf32>
    %c0_294 = arith.constant 0 : index
    %c4_295 = arith.constant 4 : index
    %c0_296 = arith.constant 0 : index
    %589 = vector.load %arg15[%c0_294, %c4_295, %c0_296] : memref<2x8x256xf32, #tpu.memory_space<vmem>>, vector<2x1x256xf32>
    %590 = vector.shape_cast %589 : vector<2x1x256xf32> to vector<2x256xf32>
    %c0_297 = arith.constant 0 : index
    %c3_298 = arith.constant 3 : index
    %c0_299 = arith.constant 0 : index
    %591 = vector.load %arg15[%c0_297, %c3_298, %c0_299] : memref<2x8x256xf32, #tpu.memory_space<vmem>>, vector<2x1x256xf32>
    %592 = vector.shape_cast %591 : vector<2x1x256xf32> to vector<2x256xf32>
    %593 = vector.shape_cast %444 : vector<1x256xi1> to vector<1x256xi1>
    %594 = vector.broadcast %593 : vector<1x256xi1> to vector<2x256xi1>
    %595 = arith.select %594, %590, %592 : vector<2x256xi1>, vector<2x256xf32>
    %596 = arith.truncf %587 : vector<2x64xf32> to vector<2x64xbf16>
    %cst_300 = arith.constant dense<0.000000e+00> : vector<2x256xf32>
    %597 = tpu.matmul %596, %445, %cst_300 {dimension_numbers = #tpu.dot_dimension_numbers<[1], [0], [0], [1], [0, 0, 1, 1], [], []>} : vector<2x64xbf16>, vector<64x256xbf16>, vector<2x256xf32> -> vector<2x256xf32>
    %598 = arith.addf %595, %597 : vector<2x256xf32>
    %cst_301 = arith.constant 5.000000e-01 : f32
    %599 = vector.broadcast %cst_301 : f32 to vector<2x256xf32>
    %600 = arith.mulf %599, %598 : vector<2x256xf32>
    %601 = math.tanh %600 : vector<2x256xf32>
    %602 = vector.extract_strided_slice %601 {offsets = [0, 0], sizes = [2, 64], strides = [1, 1]} : vector<2x256xf32> to vector<2x64xf32>
    %cst_302 = arith.constant 5.000000e-01 : f32
    %603 = vector.broadcast %cst_302 : f32 to vector<2x64xf32>
    %604 = arith.mulf %603, %602 : vector<2x64xf32>
    %cst_303 = arith.constant 5.000000e-01 : f32
    %605 = vector.broadcast %cst_303 : f32 to vector<2x64xf32>
    %606 = arith.addf %604, %605 : vector<2x64xf32>
    %607 = vector.extract_strided_slice %601 {offsets = [0, 64], sizes = [2, 64], strides = [1, 1]} : vector<2x256xf32> to vector<2x64xf32>
    %cst_304 = arith.constant 5.000000e-01 : f32
    %608 = vector.broadcast %cst_304 : f32 to vector<2x64xf32>
    %609 = arith.mulf %608, %607 : vector<2x64xf32>
    %cst_305 = arith.constant 5.000000e-01 : f32
    %610 = vector.broadcast %cst_305 : f32 to vector<2x64xf32>
    %611 = arith.addf %609, %610 : vector<2x64xf32>
    %612 = vector.extract_strided_slice %601 {offsets = [0, 128], sizes = [2, 64], strides = [1, 1]} : vector<2x256xf32> to vector<2x64xf32>
    %613 = vector.extract_strided_slice %601 {offsets = [0, 192], sizes = [2, 64], strides = [1, 1]} : vector<2x256xf32> to vector<2x64xf32>
    %cst_306 = arith.constant 5.000000e-01 : f32
    %614 = vector.broadcast %cst_306 : f32 to vector<2x64xf32>
    %615 = arith.mulf %614, %613 : vector<2x64xf32>
    %cst_307 = arith.constant 5.000000e-01 : f32
    %616 = vector.broadcast %cst_307 : f32 to vector<2x64xf32>
    %617 = arith.addf %615, %616 : vector<2x64xf32>
    %618 = arith.mulf %611, %585 : vector<2x64xf32>
    %619 = arith.mulf %606, %612 : vector<2x64xf32>
    %620 = arith.addf %618, %619 : vector<2x64xf32>
    %621 = math.tanh %620 : vector<2x64xf32>
    %622 = arith.mulf %617, %621 : vector<2x64xf32>
    %623 = arith.addf %588, %622 : vector<2x64xf32>
    %c0_308 = arith.constant 0 : index
    %c5_309 = arith.constant 5 : index
    %c0_310 = arith.constant 0 : index
    %624 = vector.load %arg15[%c0_308, %c5_309, %c0_310] : memref<2x8x256xf32, #tpu.memory_space<vmem>>, vector<2x1x256xf32>
    %625 = vector.shape_cast %624 : vector<2x1x256xf32> to vector<2x256xf32>
    %c0_311 = arith.constant 0 : index
    %c2_312 = arith.constant 2 : index
    %c0_313 = arith.constant 0 : index
    %626 = vector.load %arg15[%c0_311, %c2_312, %c0_313] : memref<2x8x256xf32, #tpu.memory_space<vmem>>, vector<2x1x256xf32>
    %627 = vector.shape_cast %626 : vector<2x1x256xf32> to vector<2x256xf32>
    %628 = vector.shape_cast %444 : vector<1x256xi1> to vector<1x256xi1>
    %629 = vector.broadcast %628 : vector<1x256xi1> to vector<2x256xi1>
    %630 = arith.select %629, %625, %627 : vector<2x256xi1>, vector<2x256xf32>
    %631 = arith.truncf %622 : vector<2x64xf32> to vector<2x64xbf16>
    %cst_314 = arith.constant dense<0.000000e+00> : vector<2x256xf32>
    %632 = tpu.matmul %631, %445, %cst_314 {dimension_numbers = #tpu.dot_dimension_numbers<[1], [0], [0], [1], [0, 0, 1, 1], [], []>} : vector<2x64xbf16>, vector<64x256xbf16>, vector<2x256xf32> -> vector<2x256xf32>
    %633 = arith.addf %630, %632 : vector<2x256xf32>
    %cst_315 = arith.constant 5.000000e-01 : f32
    %634 = vector.broadcast %cst_315 : f32 to vector<2x256xf32>
    %635 = arith.mulf %634, %633 : vector<2x256xf32>
    %636 = math.tanh %635 : vector<2x256xf32>
    %637 = vector.extract_strided_slice %636 {offsets = [0, 0], sizes = [2, 64], strides = [1, 1]} : vector<2x256xf32> to vector<2x64xf32>
    %cst_316 = arith.constant 5.000000e-01 : f32
    %638 = vector.broadcast %cst_316 : f32 to vector<2x64xf32>
    %639 = arith.mulf %638, %637 : vector<2x64xf32>
    %cst_317 = arith.constant 5.000000e-01 : f32
    %640 = vector.broadcast %cst_317 : f32 to vector<2x64xf32>
    %641 = arith.addf %639, %640 : vector<2x64xf32>
    %642 = vector.extract_strided_slice %636 {offsets = [0, 64], sizes = [2, 64], strides = [1, 1]} : vector<2x256xf32> to vector<2x64xf32>
    %cst_318 = arith.constant 5.000000e-01 : f32
    %643 = vector.broadcast %cst_318 : f32 to vector<2x64xf32>
    %644 = arith.mulf %643, %642 : vector<2x64xf32>
    %cst_319 = arith.constant 5.000000e-01 : f32
    %645 = vector.broadcast %cst_319 : f32 to vector<2x64xf32>
    %646 = arith.addf %644, %645 : vector<2x64xf32>
    %647 = vector.extract_strided_slice %636 {offsets = [0, 128], sizes = [2, 64], strides = [1, 1]} : vector<2x256xf32> to vector<2x64xf32>
    %648 = vector.extract_strided_slice %636 {offsets = [0, 192], sizes = [2, 64], strides = [1, 1]} : vector<2x256xf32> to vector<2x64xf32>
    %cst_320 = arith.constant 5.000000e-01 : f32
    %649 = vector.broadcast %cst_320 : f32 to vector<2x64xf32>
    %650 = arith.mulf %649, %648 : vector<2x64xf32>
    %cst_321 = arith.constant 5.000000e-01 : f32
    %651 = vector.broadcast %cst_321 : f32 to vector<2x64xf32>
    %652 = arith.addf %650, %651 : vector<2x64xf32>
    %653 = arith.mulf %646, %620 : vector<2x64xf32>
    %654 = arith.mulf %641, %647 : vector<2x64xf32>
    %655 = arith.addf %653, %654 : vector<2x64xf32>
    %656 = math.tanh %655 : vector<2x64xf32>
    %657 = arith.mulf %652, %656 : vector<2x64xf32>
    %658 = arith.addf %623, %657 : vector<2x64xf32>
    %c0_322 = arith.constant 0 : index
    %c6_323 = arith.constant 6 : index
    %c0_324 = arith.constant 0 : index
    %659 = vector.load %arg15[%c0_322, %c6_323, %c0_324] : memref<2x8x256xf32, #tpu.memory_space<vmem>>, vector<2x1x256xf32>
    %660 = vector.shape_cast %659 : vector<2x1x256xf32> to vector<2x256xf32>
    %c0_325 = arith.constant 0 : index
    %c1_326 = arith.constant 1 : index
    %c0_327 = arith.constant 0 : index
    %661 = vector.load %arg15[%c0_325, %c1_326, %c0_327] : memref<2x8x256xf32, #tpu.memory_space<vmem>>, vector<2x1x256xf32>
    %662 = vector.shape_cast %661 : vector<2x1x256xf32> to vector<2x256xf32>
    %663 = vector.shape_cast %444 : vector<1x256xi1> to vector<1x256xi1>
    %664 = vector.broadcast %663 : vector<1x256xi1> to vector<2x256xi1>
    %665 = arith.select %664, %660, %662 : vector<2x256xi1>, vector<2x256xf32>
    %666 = arith.truncf %657 : vector<2x64xf32> to vector<2x64xbf16>
    %cst_328 = arith.constant dense<0.000000e+00> : vector<2x256xf32>
    %667 = tpu.matmul %666, %445, %cst_328 {dimension_numbers = #tpu.dot_dimension_numbers<[1], [0], [0], [1], [0, 0, 1, 1], [], []>} : vector<2x64xbf16>, vector<64x256xbf16>, vector<2x256xf32> -> vector<2x256xf32>
    %668 = arith.addf %665, %667 : vector<2x256xf32>
    %cst_329 = arith.constant 5.000000e-01 : f32
    %669 = vector.broadcast %cst_329 : f32 to vector<2x256xf32>
    %670 = arith.mulf %669, %668 : vector<2x256xf32>
    %671 = math.tanh %670 : vector<2x256xf32>
    %672 = vector.extract_strided_slice %671 {offsets = [0, 0], sizes = [2, 64], strides = [1, 1]} : vector<2x256xf32> to vector<2x64xf32>
    %cst_330 = arith.constant 5.000000e-01 : f32
    %673 = vector.broadcast %cst_330 : f32 to vector<2x64xf32>
    %674 = arith.mulf %673, %672 : vector<2x64xf32>
    %cst_331 = arith.constant 5.000000e-01 : f32
    %675 = vector.broadcast %cst_331 : f32 to vector<2x64xf32>
    %676 = arith.addf %674, %675 : vector<2x64xf32>
    %677 = vector.extract_strided_slice %671 {offsets = [0, 64], sizes = [2, 64], strides = [1, 1]} : vector<2x256xf32> to vector<2x64xf32>
    %cst_332 = arith.constant 5.000000e-01 : f32
    %678 = vector.broadcast %cst_332 : f32 to vector<2x64xf32>
    %679 = arith.mulf %678, %677 : vector<2x64xf32>
    %cst_333 = arith.constant 5.000000e-01 : f32
    %680 = vector.broadcast %cst_333 : f32 to vector<2x64xf32>
    %681 = arith.addf %679, %680 : vector<2x64xf32>
    %682 = vector.extract_strided_slice %671 {offsets = [0, 128], sizes = [2, 64], strides = [1, 1]} : vector<2x256xf32> to vector<2x64xf32>
    %683 = vector.extract_strided_slice %671 {offsets = [0, 192], sizes = [2, 64], strides = [1, 1]} : vector<2x256xf32> to vector<2x64xf32>
    %cst_334 = arith.constant 5.000000e-01 : f32
    %684 = vector.broadcast %cst_334 : f32 to vector<2x64xf32>
    %685 = arith.mulf %684, %683 : vector<2x64xf32>
    %cst_335 = arith.constant 5.000000e-01 : f32
    %686 = vector.broadcast %cst_335 : f32 to vector<2x64xf32>
    %687 = arith.addf %685, %686 : vector<2x64xf32>
    %688 = arith.mulf %681, %655 : vector<2x64xf32>
    %689 = arith.mulf %676, %682 : vector<2x64xf32>
    %690 = arith.addf %688, %689 : vector<2x64xf32>
    %691 = math.tanh %690 : vector<2x64xf32>
    %692 = arith.mulf %687, %691 : vector<2x64xf32>
    %693 = arith.addf %658, %692 : vector<2x64xf32>
    %c0_336 = arith.constant 0 : index
    %c7_337 = arith.constant 7 : index
    %c0_338 = arith.constant 0 : index
    %694 = vector.load %arg15[%c0_336, %c7_337, %c0_338] : memref<2x8x256xf32, #tpu.memory_space<vmem>>, vector<2x1x256xf32>
    %695 = vector.shape_cast %694 : vector<2x1x256xf32> to vector<2x256xf32>
    %c0_339 = arith.constant 0 : index
    %c0_340 = arith.constant 0 : index
    %c0_341 = arith.constant 0 : index
    %696 = vector.load %arg15[%c0_339, %c0_340, %c0_341] : memref<2x8x256xf32, #tpu.memory_space<vmem>>, vector<2x1x256xf32>
    %697 = vector.shape_cast %696 : vector<2x1x256xf32> to vector<2x256xf32>
    %698 = vector.shape_cast %444 : vector<1x256xi1> to vector<1x256xi1>
    %699 = vector.broadcast %698 : vector<1x256xi1> to vector<2x256xi1>
    %700 = arith.select %699, %695, %697 : vector<2x256xi1>, vector<2x256xf32>
    %701 = arith.truncf %692 : vector<2x64xf32> to vector<2x64xbf16>
    %cst_342 = arith.constant dense<0.000000e+00> : vector<2x256xf32>
    %702 = tpu.matmul %701, %445, %cst_342 {dimension_numbers = #tpu.dot_dimension_numbers<[1], [0], [0], [1], [0, 0, 1, 1], [], []>} : vector<2x64xbf16>, vector<64x256xbf16>, vector<2x256xf32> -> vector<2x256xf32>
    %703 = arith.addf %700, %702 : vector<2x256xf32>
    %cst_343 = arith.constant 5.000000e-01 : f32
    %704 = vector.broadcast %cst_343 : f32 to vector<2x256xf32>
    %705 = arith.mulf %704, %703 : vector<2x256xf32>
    %706 = math.tanh %705 : vector<2x256xf32>
    %707 = vector.extract_strided_slice %706 {offsets = [0, 0], sizes = [2, 64], strides = [1, 1]} : vector<2x256xf32> to vector<2x64xf32>
    %cst_344 = arith.constant 5.000000e-01 : f32
    %708 = vector.broadcast %cst_344 : f32 to vector<2x64xf32>
    %709 = arith.mulf %708, %707 : vector<2x64xf32>
    %cst_345 = arith.constant 5.000000e-01 : f32
    %710 = vector.broadcast %cst_345 : f32 to vector<2x64xf32>
    %711 = arith.addf %709, %710 : vector<2x64xf32>
    %712 = vector.extract_strided_slice %706 {offsets = [0, 64], sizes = [2, 64], strides = [1, 1]} : vector<2x256xf32> to vector<2x64xf32>
    %cst_346 = arith.constant 5.000000e-01 : f32
    %713 = vector.broadcast %cst_346 : f32 to vector<2x64xf32>
    %714 = arith.mulf %713, %712 : vector<2x64xf32>
    %cst_347 = arith.constant 5.000000e-01 : f32
    %715 = vector.broadcast %cst_347 : f32 to vector<2x64xf32>
    %716 = arith.addf %714, %715 : vector<2x64xf32>
    %717 = vector.extract_strided_slice %706 {offsets = [0, 128], sizes = [2, 64], strides = [1, 1]} : vector<2x256xf32> to vector<2x64xf32>
    %718 = vector.extract_strided_slice %706 {offsets = [0, 192], sizes = [2, 64], strides = [1, 1]} : vector<2x256xf32> to vector<2x64xf32>
    %cst_348 = arith.constant 5.000000e-01 : f32
    %719 = vector.broadcast %cst_348 : f32 to vector<2x64xf32>
    %720 = arith.mulf %719, %718 : vector<2x64xf32>
    %cst_349 = arith.constant 5.000000e-01 : f32
    %721 = vector.broadcast %cst_349 : f32 to vector<2x64xf32>
    %722 = arith.addf %720, %721 : vector<2x64xf32>
    %723 = arith.mulf %716, %690 : vector<2x64xf32>
    %724 = arith.mulf %711, %717 : vector<2x64xf32>
    %725 = arith.addf %723, %724 : vector<2x64xf32>
    %726 = math.tanh %725 : vector<2x64xf32>
    %727 = arith.mulf %722, %726 : vector<2x64xf32>
    %728 = arith.addf %693, %727 : vector<2x64xf32>
    %cst_350 = arith.constant 1.250000e-01 : f32
    %729 = vector.broadcast %cst_350 : f32 to vector<2x64xf32>
    %730 = arith.mulf %728, %729 : vector<2x64xf32>
    %c3_351 = arith.constant 3 : index
    %c0_352 = arith.constant 0 : index
    %731 = vector.load %arg4[%c3_351, %c0_352] : memref<20x384xf32, #tpu.memory_space<vmem>>, vector<1x2xf32>
    %c0_353 = arith.constant 0 : index
    %c0_354 = arith.constant 0 : index
    %732 = vector.load %arg11[%c0_353, %c0_354] : memref<64x2xf32, #tpu.memory_space<vmem>>, vector<64x2xf32>
    %cst_355 = arith.constant dense<0.000000e+00> : vector<2x2xf32>
    %733 = tpu.matmul %730, %732, %cst_355 {dimension_numbers = #tpu.dot_dimension_numbers<[1], [0], [0], [1], [0, 0, 1, 1], [], []>} : vector<2x64xf32>, vector<64x2xf32>, vector<2x2xf32> -> vector<2x2xf32>
    %734 = vector.broadcast %731 : vector<1x2xf32> to vector<2x2xf32>
    %735 = arith.addf %733, %734 : vector<2x2xf32>
    %c0_356 = arith.constant 0 : index
    %c0_357 = arith.constant 0 : index
    %736 = vector.load %arg12[%c0_356, %c0_357] : memref<2x2xf32, #tpu.memory_space<vmem>>, vector<2x2xf32>
    tpu.vector_store %arg12[%c0_356, %c0_357], %735 {strides = array<i32>} : memref<2x2xf32, #tpu.memory_space<vmem>>, vector<2x2xf32>,
    return
  }
}

</mosaic_0001>

<bundles_post_ra>
// kernel: bert_lstm_classifier.1
= control target key start
LH: loop header
LB: loop body
LE: loop exit
PB: predicated region body
PF: predicated region fallthrough
CT: control target
= control target key end

     0   :  { %17 = vsyncpa [#allocation8], 0  ;;  %s5061_s0 = inlined_call_operand.vmem [shape: s32[2,8], index: 0, kind: input, shape index: {}]   ;;  %s5062_s1 = inlined_call_operand.vmem [shape: s32[2,8], index: 1, kind: input, shape index: {}]   ;;  %s5063_s2 = inlined_call_operand.hbm [shape: f32[100,128], index: 2, kind: input, shape index: {}]   ;;  %s5064_s3 = inlined_call_operand.hbm [shape: f32[8,128], index: 3, kind: input, shape index: {}]   ;;  %s5065_s4 = inlined_call_operand.hbm [shape: f32[20,384], index: 4, kind: input, shape index: {}]   ;;  %s5066_s5 = inlined_call_operand.hbm [shape: bf16[2,128,384], index: 5, kind: input, shape index: {}]   ;;  %s5067_s6 = inlined_call_operand.hbm [shape: bf16[2,128,128], index: 6, kind: input, shape index: {}]   ;;  %s5068_s7 = inlined_call_operand.hbm [shape: bf16[2,128,256], index: 7, kind: input, shape index: {}]   ;;  %s5069_s8 = inlined_call_operand.hbm [shape: bf16[2,256,128], index: 8, kind: input, shape index: {}]   ;;  %s5070_s9 = inlined_call_operand.hbm [shape: bf16[128,256], index: 9, kind: input, shape index: {}]   ;;  %s5071_s10 = inlined_call_operand.vmem [shape: bf16[64,256], index: 10, kind: input, shape index: {}]   ;;  %s5072_s11 = inlined_call_operand.vmem [shape: f32[64,2], index: 11, kind: input, shape index: {}]   ;;  %s5073_s12 = inlined_call_operand.hbm [shape: f32[2,2], index: 12, kind: output, shape index: {}]  }
   0x1   :  { %18 = vsyncpa [#allocation6], 0 }
   0x2   :  { %19 = vsyncpa [#allocation11], 0 }
   0x3   :  { %20 = vsyncpa [#allocation14], 0 }
   0x4   :  { %21 = vsyncpa [#allocation17], 0 }
   0x5   :  { %22 = vsyncpa [#allocation20], 0  ;;  %s53_s23 = sshll.u32 %s5064_s3, 4  ;;  %s54_s23 = int_to_ptr.hbm [resolvable:$true] %s53_s23 }
   0x6   :  { %23 = vsyncpa [#allocation7], 0  ;;  %s4367_s24 = smov [#allocation10]   ;;  %s76_s28 = sshll.u32 %s5066_s5, 4  ;;  %s77_s28 = int_to_ptr.hbm [resolvable:$true] %s76_s28 }
   0x7   :  { %s55_s25 = sshll.u32 %s4367_s24, 4  ;;  %s4368_s29 = smov [#allocation13]   ;;  %s56_s25 = int_to_ptr.vmem [resolvable:$true] %s55_s25 }
   0x8   :  { %58 = dma.hbm_to_vmem [thread:$0]  %s54_s23, 128, %s56_s25, [#allocation11]  }
   0x9   :  { %s78_s30 = sshll.u32 %s4368_s29, 4  ;;  %s4369_s13 = smov 192   ;;  %s79_s30 = int_to_ptr.vmem [resolvable:$true] %s78_s30 }
   0xa   :  { %s4370_s14 = smov 12   ;;  %s102_s3 = sshll.u32 %s5068_s7, 4  ;;  %s103_s3 = int_to_ptr.hbm [resolvable:$true] %s102_s3 }
   0xb   :  { %84 = dma.hbm_to_vmem [thread:$0]  %s77_s28, 6144, %s79_s30, [#allocation14], %s4369_s13, %s4369_s13, %s4370_s14  }
   0xc   :  { %s4371_s17 = smov [#allocation16]   ;;  %s29_s5 = sshll.u32 %s5061_s0, 4  ;;  %s30_s5 = int_to_ptr.vmem [resolvable:$true] %s29_s5 }
   0xd   :  { %s104_s18 = sshll.u32 %s4371_s17, 4  ;;  %s4372_s21 = smov 128   ;;  %s105_s18 = int_to_ptr.vmem [resolvable:$true] %s104_s18 }
   0xe   :  { %s4373_s22 = smov 8   ;;  %s4374_s23 = smov [#allocation5]  }
   0xf   :  { %110 = dma.hbm_to_vmem [thread:$0]  %s103_s3, 4096, %s105_s18, [#allocation17], %s4372_s21, %s4372_s21, %s4373_s22  }
  0x10   :  { %32 = dma.vmem_to_smem %s30_s5, 32, %s4374_s23, [#allocation8]  }
  0x11   :  { %s39_s7 = sshll.u32 %s5063_s2, 4  ;;  %s4375_s26 = smov [#allocation9]   ;;  %s40_s7 = int_to_ptr.hbm [resolvable:$true] %s39_s7 }
  0x12   :  { %s41_s27 = sshll.u32 %s4375_s26, 4  ;;  %s63_s0 = sshll.u32 %s5065_s4, 4  ;;  %s42_s27 = int_to_ptr.vmem [resolvable:$true] %s41_s27  ;;  %s64_s0 = int_to_ptr.hbm [resolvable:$true] %s63_s0 }
  0x13   :  { %47 = dma.hbm_to_vmem [thread:$0]  %s40_s7, 1664, %s42_s27, [#allocation6], %s4372_s21, %s4372_s21, %s4373_s22  }
  0x14   :  { %s4376_s30 = smov [#allocation12]   ;;  %s4377_s14 = smov 384  }
  0x15   :  { %s65_s13 = sshll.u32 %s4376_s30, 4  ;;  %s4378_s15 = smov 24   ;;  %s66_s13 = int_to_ptr.vmem [resolvable:$true] %s65_s13 }
  0x16   :  { %71 = dma.hbm_to_vmem [thread:$0]  %s64_s0, 1152, %s66_s13, [#allocation11], %s4377_s14, %s4377_s14, %s4378_s15  }
  0x17   :  { %s89_s3 = sshll.u32 %s5067_s6, 4  ;;  %s4379_s17 = smov [#allocation15]   ;;  %s90_s3 = int_to_ptr.hbm [resolvable:$true] %s89_s3 }
  0x18   :  { %s91_s18 = sshll.u32 %s4379_s17, 4  ;;  %s115_s20 = sshll.u32 %s5069_s8, 4  ;;  %s92_s18 = int_to_ptr.vmem [resolvable:$true] %s91_s18  ;;  %s116_s20 = int_to_ptr.hbm [resolvable:$true] %s115_s20 }
  0x19   :  { %s4380_s5 = smov 64   ;;  %s4381_s23 = smov 4  }
  0x1a   :  { %97 = dma.hbm_to_vmem [thread:$0]  %s90_s3, 2048, %s92_s18, [#allocation14], %s4380_s5, %s4380_s5, %s4381_s23  }
  0x1b   :  { %s4382_s24 = smov [#allocation18]   ;;  %s128_s6 = sshll.u32 %s5070_s9, 4  ;;  %s129_s6 = int_to_ptr.hbm [resolvable:$true] %s128_s6 }
  0x1c   :  { %s117_s25 = sshll.u32 %s4382_s24, 4  ;;  %s4383_s27 = smov [#allocation19]   ;;  %s118_s25 = int_to_ptr.vmem [resolvable:$true] %s117_s25 }
  0x1d   :  { %123 = dma.hbm_to_vmem [thread:$0]  %s116_s20, 4096, %s118_s25, [#allocation17], %s4380_s5, %s4380_s5, %s4381_s23  }
  0x1e   :  { %s130_s28 = sshll.u32 %s4383_s27, 4  ;;  %s131_s28 = int_to_ptr.vmem [resolvable:$true] %s130_s28 }
  0x1f   :  { %136 = dma.hbm_to_vmem [thread:$0]  %s129_s6, 2048, %s131_s28, [#allocation20], %s4372_s21, %s4372_s21, %s4373_s22  }
  0x20   :  { %4353 = dma.done.wait [#allocation8], 32  }
  0x21   :  { %4354 = vsyncadd [#allocation8], 4294967264 }
  0x22   :  { %4355 = dma.done.wait [#allocation6], 1664  }
  0x23   :  { %4356 = vsyncadd [#allocation6], 4294965632 }
  0x24   :  { %4357 = dma.done.wait [#allocation11], 1280  }
  0x25   :  { %4358 = vsyncadd [#allocation11], 4294966016 }
  0x26   :  { %4359 = dma.done.wait [#allocation14], 8192  }
  0x27   :  { %4360 = vsyncadd [#allocation14], 4294959104 }
  0x28   :  { %4361 = dma.done.wait [#allocation17], 8192  }
  0x29   :  { %4362 = vsyncadd [#allocation17], 4294959104 }
  0x2a   :  { %4363 = dma.done.wait [#allocation20], 2048  }
  0x2b   :  { %4364 = vsyncadd [#allocation20], 4294965248 }
  0x2c   :  { %177 = sfence }
  0x2d   :  { %s179_s8 = sld [smem:[#allocation5]]  ;;  %v182_v0 = vld [vmem:[#allocation10] sm:$0x1]  ;;  %v188_v1 = vld [vmem:[#allocation10 + $0x1] sm:$0x1]  ;;  %v4384_v50 = vmov 128.0  }
  0x2e   :  { %s3173_s9 = sld [smem:[#allocation5 + $0x1]]  ;;  %v194_v2 = vld [vmem:[#allocation10 + $0x2] sm:$0x1]  ;;  %v200_v3 = vld [vmem:[#allocation10 + $0x3] sm:$0x1]  ;;  %4007 = vrcp.f32 %v4384_v50  ;;  %vm579_vm7 = vcmask 523264  }
  0x2f   :  { %s3174_s29 = sld [smem:[#allocation5 + $0x2]]  ;;  %v206_v5 = vld [vmem:[#allocation10 + $0x4] sm:$0x1]  ;;  %v212_v8 = vld [vmem:[#allocation10 + $0x5] sm:$0x1]  ;;  %vm676_vm8 = vcmask 64512  }
  0x30   :  { %s3175_s0 = sld [smem:[#allocation5 + $0x3]]  ;;  %v218_v11 = vld [vmem:[#allocation10 + $0x6] sm:$0x1]  ;;  %v224_v14 = vld [vmem:[#allocation10 + $0x7] sm:$0x1]  ;;  %vm818_vm9 = vcmask 1048064  }
  0x31   :  { %s3176_s30 = sld [smem:[#allocation5 + $0x4]]  ;;  %v230_v17 = vld [vmem:[#allocation10] sm:$0x1]  ;;  %v236_v20 = vld [vmem:[#allocation10 + $0x1] sm:$0x1] }
  0x32   :  { %s4492_s21 = sld [smem:[#allocation5 + $0x5]]  ;;  %v242_v30 = vld [vmem:[#allocation10 + $0x2] sm:$0x1]  ;;  %v248_v31 = vld [vmem:[#allocation10 + $0x3] sm:$0x1] }
  0x33   :  { %s4494_s22 = sld [smem:[#allocation5 + $0x6]]  ;;  %s180_s13 = scalar_lea.vmem [#allocation9], %s179_s8  ;;  %v254_v32 = vld [vmem:[#allocation10 + $0x4] sm:$0x1]  ;;  %v260_v34 = vld [vmem:[#allocation10 + $0x5] sm:$0x1] }
  0x34   :  { %v181_v4 = vld [vmem:[%s180_s13] sm:$0x1]  ;;  %s4496_s14 = sld [smem:[#allocation5 + $0x7]]  ;;  %s186_s15 = scalar_lea.vmem [#allocation9], %s3173_s9  ;;  %v266_v38 = vld [vmem:[#allocation10 + $0x6] sm:$0x1]  ;;  %v4008_v51 = vpop.eup %4007 }
  0x35   :  { %v183_v6 = vadd.f32 %v182_v0, %v181_v4  ;;  %v187_v7 = vld [vmem:[%s186_s15] sm:$0x1]  ;;  %s4498_s2 = sld [smem:[#allocation5 + $0x80]]  ;;  %s192_s16 = scalar_lea.vmem [#allocation9], %s3174_s29  ;;  %v272_v41 = vld [vmem:[#allocation10 + $0x7] sm:$0x1]  ;;  %vm288_vm0 = vweird.f32 %v4008_v51 }
  0x36   :  { %v189_v9 = vadd.f32 %v188_v1, %v187_v7  ;;  %v193_v10 = vld [vmem:[%s192_s16] sm:$0x1]  ;;  %s4500_s3 = sld [smem:[#allocation5 + $0x81]]  ;;  %s198_s17 = scalar_lea.vmem [#allocation9], %s3175_s0  ;;  %v284_v52 = vmul.f32 128.0, %v4008_v51 }
  0x37   :  { %184 = vst [vmem:[#allocation2] sm:$0x1] %v183_v6  ;;  %v195_v12 = vadd.f32 %v194_v2, %v193_v10  ;;  %v199_v13 = vld [vmem:[%s198_s17] sm:$0x1]  ;;  %s204_s18 = scalar_lea.vmem [#allocation9], %s3176_s30  ;;  %s3182_s25 = sld [smem:[#allocation5 + $0x82]] }
  0x38   :  { %190 = vst [vmem:[#allocation2 + $0x1] sm:$0x1] %v189_v9  ;;  %v201_v15 = vadd.f32 %v200_v3, %v199_v13  ;;  %v205_v16 = vld [vmem:[%s204_s18] sm:$0x1]  ;;  %s210_s4 = scalar_lea.vmem [#allocation9], %s4492_s21  ;;  %s3183_s7 = sld [smem:[#allocation5 + $0x83]] }
  0x39   :  { %196 = vst [vmem:[#allocation2 + $0x2] sm:$0x1] %v195_v12  ;;  %v207_v18 = vadd.f32 %v206_v5, %v205_v16  ;;  %v211_v19 = vld [vmem:[%s210_s4] sm:$0x1]  ;;  %s216_s19 = scalar_lea.vmem [#allocation9], %s4494_s22  ;;  %s3184_s26 = sld [smem:[#allocation5 + $0x84]] }
  0x3a   :  { %202 = vst [vmem:[#allocation2 + $0x3] sm:$0x1] %v201_v15  ;;  %v213_v21 = vadd.f32 %v212_v8, %v211_v19  ;;  %v217_v22 = vld [vmem:[%s216_s19] sm:$0x1]  ;;  %s222_s20 = scalar_lea.vmem [#allocation9], %s4496_s14  ;;  %s3185_s6 = sld [smem:[#allocation5 + $0x85]] }
  0x3b   :  { %208 = vst [vmem:[#allocation2 + $0x4] sm:$0x1] %v207_v18  ;;  %v219_v23 = vadd.f32 %v218_v11, %v217_v22  ;;  %v223_v24 = vld [vmem:[%s222_s20] sm:$0x1]  ;;  %s228_s23 = scalar_lea.vmem [#allocation9], %s4498_s2  ;;  %s3186_s27 = sld [smem:[#allocation5 + $0x86]] }
  0x3c   :  { %214 = vst [vmem:[#allocation2 + $0x5] sm:$0x1] %v213_v21  ;;  %v225_v25 = vadd.f32 %v224_v14, %v223_v24  ;;  %v229_v26 = vld [vmem:[%s228_s23] sm:$0x1]  ;;  %s234_s24 = scalar_lea.vmem [#allocation9], %s4500_s3  ;;  %s3187_s28 = sld [smem:[#allocation5 + $0x87]] }
  0x3d   :  { %220 = vst [vmem:[#allocation2 + $0x6] sm:$0x1] %v219_v23  ;;  %v231_v27 = vadd.f32 %v230_v17, %v229_v26  ;;  %v235_v28 = vld [vmem:[%s234_s24] sm:$0x1]  ;;  %s240_s8 = scalar_lea.vmem [#allocation9], %s3182_s25  ;;  %v285_v53 = vsub.f32 1.0, %v284_v52 }
  0x3e   :  { %226 = vst [vmem:[#allocation2 + $0x7] sm:$0x1] %v225_v25  ;;  %v237_v29 = vadd.f32 %v236_v20, %v235_v28  ;;  %v241_v33 = vld [vmem:[%s240_s8] sm:$0x1]  ;;  %s246_s9 = scalar_lea.vmem [#allocation9], %s3183_s7 }
  0x3f   :  { %232 = vst [vmem:[#allocation2 + $0x8] sm:$0x1] %v231_v27  ;;  %v243_v36 = vadd.f32 %v242_v30, %v241_v33  ;;  %v247_v37 = vld [vmem:[%s246_s9] sm:$0x1]  ;;  %s252_s29 = scalar_lea.vmem [#allocation9], %s3184_s26  ;;  %v286_v54 = vmul.f32 %v4008_v51, %v285_v53  ;;  %s4386_s9 = smov [#allocation21]  }
  0x40   :  { %238 = vst [vmem:[#allocation2 + $0x9] sm:$0x1] %v237_v29  ;;  %v249_v39 = vadd.f32 %v248_v31, %v247_v37  ;;  %v253_v40 = vld [vmem:[%s252_s29] sm:$0x1]  ;;  %s258_s0 = scalar_lea.vmem [#allocation9], %s3185_s6 }
  0x41   :  { %244 = vst [vmem:[#allocation2 + $0xa] sm:$0x1] %v243_v36  ;;  %v255_v42 = vadd.f32 %v254_v32, %v253_v40  ;;  %v259_v43 = vld [vmem:[%s258_s0] sm:$0x1]  ;;  %s264_s30 = scalar_lea.vmem [#allocation9], %s3186_s27  ;;  %v287_v55 = vadd.f32 %v4008_v51, %v286_v54 }
  0x42   :  { %250 = vst [vmem:[#allocation2 + $0xb] sm:$0x1] %v249_v39  ;;  %v261_v44 = vadd.f32 %v260_v34, %v259_v43  ;;  %v265_v45 = vld [vmem:[%s264_s30] sm:$0x1]  ;;  %s270_s21 = scalar_lea.vmem [#allocation9], %s3187_s28  ;;  %s3142_s30 = sshll.u32 %s5073_s12, 4  ;;  %s3143_s30 = int_to_ptr.hbm [resolvable:$true] %s3142_s30 }
  0x43   :  { %256 = vst [vmem:[#allocation2 + $0xc] sm:$0x1] %v255_v42  ;;  %v267_v46 = vadd.f32 %v266_v38, %v265_v45  ;;  %v271_v47 = vld [vmem:[%s270_s21] sm:$0x1]  ;;  %v4507_v56 = vsel %vm288_vm0, %v4008_v51, %v287_v55  ;;  %v3274_v1 = vld [vmem:[#allocation13 + $0xa8] sm:$0xf] }
  0x44   :  { %262 = vst [vmem:[#allocation2 + $0xd] sm:$0x1] %v261_v44  ;;  %v273_v48 = vadd.f32 %v272_v41, %v271_v47  ;;  %v3857_v2 = vld [vmem:[#allocation13 + $0xb0] sm:$0xf0]  ;;  %v3856_v3 = vld [vmem:[#allocation13 + $0xac] sm:$0xf] }
  0x45   :  { %v277_v35 = vld [vmem:[#allocation2] sm:$0xff]  ;;  %268 = vst [vmem:[#allocation2 + $0xe] sm:$0x1] %v267_v46  ;;  %v3275_v4 = vor.u32 %v3857_v2, %v3274_v1  ;;  %v3276_v5 = vld [vmem:[#allocation13 + $0xb4] sm:$0xf0] }
  0x46   :  { %279 = vadd.xlane.f32.xlu0 %v277_v35  ;;  %274 = vst [vmem:[#allocation2 + $0xf] sm:$0x1] %v273_v48  ;;  %v3282_v6 = vld [vmem:[#allocation13 + $0xb0] sm:$0xf]  ;;  %v3858_v7 = vld [vmem:[#allocation13 + $0xb8] sm:$0xf0]  ;;  %v3279_v8 = vor.u32 %v3856_v3, %v3276_v5 }
  0x47   :  { %v3283_v9 = vor.u32 %v3858_v7, %v3282_v6  ;;  %515 = vmatpush.bf16.msra.mxu0 %v3275_v4  ;;  %v3262_v10 = vld [vmem:[#allocation13 + $0x90] sm:$0xf]  ;;  %v3854_v11 = vld [vmem:[#allocation13 + $0x98] sm:$0xf0]  ;;  %v3853_v12 = vld [vmem:[#allocation13 + $0x94] sm:$0xf] }
  0x48   :  { %529 = vmatpush.bf16.msra.mxu1 %v3279_v8  ;;  %v3263_v13 = vor.u32 %v3854_v11, %v3262_v10  ;;  %v3264_v14 = vld [vmem:[#allocation13 + $0x9c] sm:$0xf0]  ;;  %v3270_v15 = vld [vmem:[#allocation13 + $0x98] sm:$0xf]  ;;  %v3855_v16 = vld [vmem:[#allocation13 + $0xa0] sm:$0xf0] }
  0x49   :  { %543 = vmatpush.bf16.msra.mxu2 %v3283_v9  ;;  %v3267_v17 = vor.u32 %v3853_v12, %v3264_v14  ;;  %v3271_v18 = vor.u32 %v3855_v16, %v3270_v15  ;;  %v3250_v19 = vld [vmem:[#allocation13 + $0x78] sm:$0xf]  ;;  %v3851_v20 = vld [vmem:[#allocation13 + $0x80] sm:$0xf0]  ;;  %v3850_v21 = vld [vmem:[#allocation13 + $0x7c] sm:$0xf] }
  0x4a   :  { %v3251_v22 = vor.u32 %v3851_v20, %v3250_v19  ;;  %v3252_v23 = vld [vmem:[#allocation13 + $0x84] sm:$0xf0]  ;;  %v3258_v24 = vld [vmem:[#allocation13 + $0x80] sm:$0xf]  ;;  %v3852_v25 = vld [vmem:[#allocation13 + $0x88] sm:$0xf0] }
  0x4b   :  { %516 = vmatpush.bf16.msra.mxu0 %v3263_v13  ;;  %v3255_v26 = vor.u32 %v3850_v21, %v3252_v23  ;;  %v3259_v27 = vor.u32 %v3852_v25, %v3258_v24  ;;  %v3238_v28 = vld [vmem:[#allocation13 + $0x60] sm:$0xf]  ;;  %v3848_v29 = vld [vmem:[#allocation13 + $0x68] sm:$0xf0]  ;;  %v3847_v30 = vld [vmem:[#allocation13 + $0x64] sm:$0xf] }
  0x4c   :  { %530 = vmatpush.bf16.msra.mxu1 %v3267_v17  ;;  %v3239_v31 = vor.u32 %v3848_v29, %v3238_v28  ;;  %v3240_v32 = vld [vmem:[#allocation13 + $0x6c] sm:$0xf0]  ;;  %v3246_v33 = vld [vmem:[#allocation13 + $0x68] sm:$0xf]  ;;  %v3849_v34 = vld [vmem:[#allocation13 + $0x70] sm:$0xf0] }
  0x4d   :  { %v278_v49 = vld [vmem:[#allocation2 + $0x8] sm:$0xff]  ;;  %544 = vmatpush.bf16.msra.mxu2 %v3271_v18  ;;  %v3247_v36 = vor.u32 %v3849_v34, %v3246_v33  ;;  %v3226_v37 = vld [vmem:[#allocation13 + $0x48] sm:$0xf]  ;;  %v3844_v39 = vld [vmem:[#allocation13 + $0x4c] sm:$0xf] }
  0x4e   :  { %281 = vadd.xlane.f32.xlu0 %v278_v49  ;;  %v3845_v38 = vld [vmem:[#allocation13 + $0x50] sm:$0xf0]  ;;  %v3228_v41 = vld [vmem:[#allocation13 + $0x54] sm:$0xf0]  ;;  %v3234_v42 = vld [vmem:[#allocation13 + $0x50] sm:$0xf] }
  0x4f   :  { %517 = vmatpush.bf16.msra.mxu0 %v3251_v22  ;;  %v3227_v40 = vor.u32 %v3845_v38, %v3226_v37  ;;  %v3846_v43 = vld [vmem:[#allocation13 + $0x58] sm:$0xf0]  ;;  %v3231_v44 = vor.u32 %v3844_v39, %v3228_v41  ;;  %v3214_v46 = vld [vmem:[#allocation13 + $0x30] sm:$0xf]  ;;  %v3841_v48 = vld [vmem:[#allocation13 + $0x34] sm:$0xf] }
  0x50   :  { %531 = vmatpush.bf16.msra.mxu1 %v3255_v26  ;;  %v3235_v45 = vor.u32 %v3846_v43, %v3234_v42  ;;  %v3842_v47 = vld [vmem:[#allocation13 + $0x38] sm:$0xf0]  ;;  %v3216_v51 = vld [vmem:[#allocation13 + $0x3c] sm:$0xf0]  ;;  %v3222_v52 = vld [vmem:[#allocation13 + $0x38] sm:$0xf] }
  0x51   :  { %545 = vmatpush.bf16.msra.mxu2 %v3259_v27  ;;  %v3215_v50 = vor.u32 %v3842_v47, %v3214_v46  ;;  %v3843_v53 = vld [vmem:[#allocation13 + $0x40] sm:$0xf0]  ;;  %v3219_v55 = vor.u32 %v3841_v48, %v3216_v51  ;;  %v3204_v1 = vld [vmem:[#allocation13 + $0x24] sm:$0xf0]  ;;  %v3210_v2 = vld [vmem:[#allocation13 + $0x20] sm:$0xf] }
  0x52   :  { %v3840_v4 = vld [vmem:[#allocation13 + $0x28] sm:$0xf0]  ;;  %v3190_v5 = vld [vmem:[#allocation13] sm:$0xf]  ;;  %v3835_v9 = vld [vmem:[#allocation13 + $0x4] sm:$0xf] }
  0x53   :  { %518 = vmatpush.bf16.msra.mxu0 %v3239_v31  ;;  %v3836_v6 = vld [vmem:[#allocation13 + $0x8] sm:$0xf0]  ;;  %v3211_v7 = vor.u32 %v3840_v4, %v3210_v2  ;;  %v3192_v10 = vld [vmem:[#allocation13 + $0xc] sm:$0xf0]  ;;  %v3198_v11 = vld [vmem:[#allocation13 + $0x8] sm:$0xf] }
  0x54   :  { %v3191_v8 = vor.u32 %v3836_v6, %v3190_v5  ;;  %v3195_v12 = vor.u32 %v3835_v9, %v3192_v10  ;;  %v3837_v13 = vld [vmem:[#allocation13 + $0x10] sm:$0xf0] }
  0x55   :  { %546 = vmatpush.bf16.msra.mxu2 %v3247_v36  ;;  %v3199_v14 = vor.u32 %v3837_v13, %v3198_v11  ;;  %v276_v36 = vld [vmem:[#allocation12 + $0x1] ss:$0 sm:$0xff] }
  0x57   :  { %519 = vmatpush.bf16.msra.mxu0 %v3227_v40 }
  0x59   :  { %547 = vmatpush.bf16.msra.mxu2 %v3235_v45 }
  0x5b   :  { %520 = vmatpush.bf16.msra.mxu0 %v3215_v50 }
  0xb9   :  { %v280_v57 = vpop.xlane.xlu0 %279 }
  0xba   :  { %v290_v58 = vmul.f32 %v4507_v56, %v280_v57  ;;  %v3223_v57 = vor.u32 %v3843_v53, %v3222_v52 }
  0xbc   :  { %v4510_v59 = vsub.f32 %v277_v35, %v290_v58  ;;  %v3243_v35 = vor.u32 %v3847_v30, %v3240_v32  ;;  %548 = vmatpush.bf16.msra.mxu2 %v3223_v57  ;;  %v275_v32 = vld [vmem:[#allocation12] ss:$0 sm:$0xff] }
  0xbe   :  { %v294_v60 = vmul.f32 %v4510_v59, %v4510_v59  ;;  %532 = vmatpush.bf16.msra.mxu1 %v3243_v35 }
  0xc0   :  { %296 = vadd.xlane.f32.xlu1 %v294_v60  ;;  %v3202_v60 = vld [vmem:[#allocation13 + $0x18] sm:$0xf]  ;;  %549 = vmatpush.bf16.msra.mxu2 %v3211_v7 }
  0xc1   :  { %v282_v61 = vpop.xlane.xlu0 %281 }
  0xc2   :  { %v291_v62 = vmul.f32 %v4507_v56, %v282_v61  ;;  %533 = vmatpush.bf16.msra.mxu1 %v3231_v44  ;;  %v3839_v61 = vld [vmem:[#allocation13 + $0x20] sm:$0xf0] }
  0xc4   :  { %v4515_v63 = vsub.f32 %v278_v49, %v291_v62  ;;  %v3203_v62 = vor.u32 %v3839_v61, %v3202_v60  ;;  %550 = vmatpush.bf16.msra.mxu2 %v3199_v14 }
  0xc6   :  { %v295_v0 = vmul.f32 %v4515_v63, %v4515_v63  ;;  %534 = vmatpush.bf16.msra.mxu1 %v3219_v55  ;;  %521 = vmatpush.bf16.msra.mxu0 %v3203_v62 }
  0xc8   :  { %298 = vadd.xlane.f32.xlu1 %v295_v0  ;;  %v3838_v0 = vld [vmem:[#allocation13 + $0x1c] sm:$0xf] }
  0xc9   :  { %v3207_v3 = vor.u32 %v3838_v0, %v3204_v1 }
  0xca   :  { %522 = vmatpush.bf16.msra.mxu0 %v3191_v8 }
  0xcb   :  { %535 = vmatpush.bf16.msra.mxu1 %v3207_v3 }
  0xcf   :  { %536 = vmatpush.bf16.msra.mxu1 %v3195_v12 }
 0x133   :  { %v297_v49 = vpop.xlane.xlu1 %296 }
 0x134   :  { %v300_v54 = vmul.f32 %v297_v49, %v4507_v56 }
 0x136   :  { %v302_v58 = vadd.f32 1e-12, %v300_v54 }
 0x138   :  { %4009 = vrsqrt.f32 %v302_v58  ;;  %vm310_vm2 = vweird.f32 %v302_v58 }
 0x13b   :  { %v299_v18 = vpop.xlane.xlu1 %298 }
 0x13c   :  { %v301_v19 = vmul.f32 %v299_v18, %v4507_v56 }
 0x13e   :  { %v4010_v15 = vpop.eup %4009  ;;  %v303_v20 = vadd.f32 1e-12, %v301_v19 }
 0x13f   :  { %v305_v16 = vmul.f32 %v4010_v15, %v302_v58  ;;  %vm311_vm1 = vweird.f32 %v4010_v15  ;;  %v330_v58 = vld [vmem:[%s5062_s1] sm:$0x3] }
 0x140   :  { %4011 = vrsqrt.f32 %v303_v20  ;;  %vm312_vm3 = vmor %vm310_vm2, %vm311_vm1  ;;  %vm320_vm5 = vweird.f32 %v303_v20  ;;  %v331_v60 = vcvt.s32.f32 %v330_v58  ;;  %v3862_v58 = vld [vmem:[#allocation15 + $0x18] sm:$0xff] }
 0x141   :  { %v306_v17 = vmul.f32 %v4010_v15, %v305_v16 }
 0x142   :  { %v332_v62 = vsub.f32 1.0, %v331_v60 }
 0x143   :  { %v307_v21 = vmul.f32 0.5, %v306_v17 }
 0x144   :  { %v333_v1 = vmul.f32 -10000.0, %v332_v62  ;;  %v3861_v62 = vld [vmem:[#allocation15 + $0x10] sm:$0xff] }
 0x145   :  { %v308_v22 = vsub.f32 1.5, %v307_v21 }
 0x146   :  { %v4012_v23 = vpop.eup %4011  ;;  %v4547_v2 = vperm.slane %v333_v1, 0  ;;  %v335_v8 = vrot.slane %v333_v1, 1  ;;  %v3859_v1 = vld [vmem:[#allocation15] sm:$0xff] }
 0x147   :  { %v309_v24 = vmul.f32 %v4010_v15, %v308_v22  ;;  %v315_v25 = vmul.f32 %v4012_v23, %v303_v20  ;;  %vm321_vm4 = vweird.f32 %v4012_v23 }
 0x148   :  { %vm322_vm6 = vmor %vm320_vm5, %vm321_vm4  ;;  %v4553_v10 = vperm.slane %v335_v8, 0  ;;  %v339_v8 = vld [vmem:[#allocation12 + $0x5] ss:$0 sm:$0xff] }
 0x149   :  { %v316_v26 = vmul.f32 %v4012_v23, %v315_v25  ;;  %v313_v27 = vsel %vm312_vm3, %v4010_v15, %v309_v24 }
 0x14a   :  { %v324_v30 = vmul.f32 %v313_v27, %v4510_v59  ;;  %v338_v59 = vld [vmem:[#allocation12 + $0x4] ss:$8 sm:$0x7] }
 0x14b   :  { %v317_v28 = vmul.f32 0.5, %v316_v26  ;;  %v382_v41 = vperm.slane %v338_v59, 1  ;;  %v381_v42 = vperm.slane %v338_v59, 0  ;;  %v383_v46 = vperm.slane %v338_v59, 2 }
 0x14c   :  { %v326_v35 = vmul.f32 %v324_v30, %v275_v32 }
 0x14d   :  { %v318_v29 = vsub.f32 1.5, %v317_v28 }
 0x14e   :  { %v4523_v38 = vadd.f32 %v326_v35, %v276_v36 }
 0x14f   :  { %v319_v31 = vmul.f32 %v4012_v23, %v318_v29 }
 0x151   :  { %v323_v33 = vsel %vm322_vm6, %v4012_v23, %v319_v31 }
 0x152   :  { %v325_v34 = vmul.f32 %v323_v33, %v4515_v63 }
 0x154   :  { %v327_v37 = vmul.f32 %v325_v34, %v275_v32 }
 0x156   :  { %v4525_v39 = vadd.f32 %v327_v37, %v276_v36 }
 0x158   :  { %v347_v40 = vpack.c.bf16 %v4525_v39, %v4523_v38 }
 0x15a   :  { %523 = vmatmul.bf16.vlgmr.msra.gmra.mxu0 %v347_v40  ;;  %537 = vmatmul.bf16.vlgmr.msra.gmra.mxu1 %v347_v40 }
 0x15b   :  { %551 = vmatmul.bf16.vlgmr.msra.gmra.mxu2 %v347_v40 }
 0x1d7   :  { %v524_v43 = vpop.f32.mrf.mxu0  ;;  %v538_v44 = vpop.f32.mrf.mxu1 }
 0x1d8   :  { %v539_v63 = vadd.f32 %v538_v44, %v382_v41  ;;  %v525_v45 = vadd.f32 %v524_v43, %v381_v42 }
 0x1da   :  { %564 = vrot.lane.b32.xlu2 %v539_v63, %s4380_s5  ;;  %3284 = vmatpush.xpose.msk.msra.mxu3 %vm579_vm7, %v539_v63 }
 0x1dd   :  { %3285 = vmatmul.msk.f32.vlgmr.msra.gmra.mxu3 %vm579_vm7, %v525_v45 }
 0x1de   :  { %v552_v47 = vpop.f32.mrf.mxu2 }
 0x1df   :  { %v4532_v48 = vadd.f32 %v552_v47, %v383_v46  ;;  %v526_v49 = vpop.f32.mrf.mxu0  ;;  %v540_v50 = vpop.f32.mrf.mxu1 }
 0x1e0   :  { %v527_v51 = vadd.f32 %v526_v49, %v381_v42  ;;  %v541_v52 = vadd.f32 %v540_v50, %v382_v41 }
 0x1e2   :  { %567 = vrot.lane.b32.xlu0 %v541_v52, %s4380_s5  ;;  %561 = vrot.lane.b32.xlu1 %v527_v51, %s4380_s5 }
 0x1e3   :  { %558 = vrot.lane.b32.xlu2 %v525_v45, %s4380_s5 }
 0x1e6   :  { %v554_v53 = vpop.f32.mrf.mxu2 }
 0x1e7   :  { %v555_v54 = vadd.f32 %v554_v53, %v383_v46  ;;  %v3865_v53 = vld [vmem:[#allocation15 + $0x30] sm:$0xff] }
 0x1e9   :  { %785 = vmatpush.msrb.mxu0 %v555_v54 }
 0x234   :  { %v565_v55 = vpop.permute.xlu2 %564 }
 0x235   :  { %3286 = vmatpush.xpose.msk.msrb.mxu3 %vm579_vm7, %v565_v55  ;;  %v3864_v55 = vld [vmem:[#allocation15 + $0x28] sm:$0xff] }
 0x239   :  { %3288 = vmatpush.xpose.msk.msra.mxu3 %vm579_vm7, %v541_v52  ;;  %v3866_v52 = vld [vmem:[#allocation15 + $0x38] sm:$0xff] }
 0x23a   :  { %893 = vmatpush.bf16.msrb.mxu2 %v3866_v52  ;;  %v3346_v52 = vld [vmem:[#allocation16 + $0x20] sm:$0xf] }
 0x23d   :  { %v559_v57 = vpop.permute.xlu2 %558 }
 0x23e   :  { %3287 = vmatmul.msk.f32.vlgmr.msrb.gmra.mxu3 %vm579_vm7, %v559_v57  ;;  %894 = vmatpush.bf16.msrb.mxu2 %v3865_v53  ;;  %v3863_v57 = vld [vmem:[#allocation15 + $0x20] sm:$0xff]  ;;  %v3872_v53 = vld [vmem:[#allocation16 + $0x24] sm:$0xf0] }
 0x242   :  { %895 = vmatpush.bf16.msrb.mxu2 %v3864_v55  ;;  %v3347_v55 = vor.u32 %v3872_v53, %v3346_v52  ;;  %v3885_v52 = vld [vmem:[#allocation18 + $0x10] sm:$0xff]  ;;  %v3891_v53 = vld [vmem:[#allocation18 + $0x40] sm:$0xff] }
 0x246   :  { %3289 = vmatmul.msk.f32.vlgmr.msra.gmra.mxu3 %vm579_vm7, %v527_v51  ;;  %896 = vmatpush.bf16.msrb.mxu2 %v3863_v57  ;;  %v3348_v57 = vld [vmem:[#allocation16 + $0x28] sm:$0xf0] }
 0x24a   :  { %897 = vmatpush.bf16.msrb.mxu2 %v3862_v58 }
 0x24e   :  { %898 = vmatpush.bf16.msrb.mxu2 %v3861_v62  ;;  %v3869_v62 = vld [vmem:[#allocation16 + $0x14] sm:$0xf] }
 0x254   :  { %v568_v61 = vpop.permute.xlu0 %567  ;;  %v562_v0 = vpop.permute.xlu1 %561 }
 0x255   :  { %3290 = vmatpush.xpose.msk.msrb.mxu3 %vm579_vm7, %v568_v61 }
 0x258   :  { %3291 = vmatmul.msk.f32.vlgmr.msrb.gmra.mxu3 %vm579_vm7, %v562_v0  ;;  %v3860_v0 = vld [vmem:[#allocation15 + $0x8] sm:$0xff] }
 0x259   :  { %739 = vmatpush.msra.mxu3 %v4532_v48  ;;  %899 = vmatpush.bf16.msrb.mxu2 %v3860_v0 }
 0x25d   :  { %900 = vmatpush.bf16.msrb.mxu2 %v3859_v1  ;;  %v3340_v1 = vld [vmem:[#allocation16 + $0x18] sm:$0xf0] }
 0x260   :  { %v601_v3 = vpop.f32.mrf.mxu3 }
 0x261   :  { %v602_v4 = vadd.f32 %v601_v3, %v4547_v2 }
 0x263   :  { %v677_v5 = vsel %vm676_vm8, %v602_v4, -inf }
 0x264   :  { %678 = vmax.xlane.f32.xlu2 %v677_v5 }
 0x2c1   :  { %v625_v6 = vpop.f32.mrf.mxu3 }
 0x2c2   :  { %v626_v7 = vadd.f32 %v625_v6, %v4547_v2 }
 0x2c4   :  { %v680_v9 = vsel %vm676_vm8, %v626_v7, -inf }
 0x2c5   :  { %681 = vmax.xlane.f32.xlu0 %v680_v9 }
 0x2c9   :  { %v649_v11 = vpop.f32.mrf.mxu3 }
 0x2ca   :  { %v650_v12 = vadd.f32 %v649_v11, %v4553_v10 }
 0x2cc   :  { %v683_v13 = vsel %vm676_vm8, %v650_v12, -inf }
 0x2cd   :  { %684 = vmax.xlane.f32.xlu2 %v683_v13 }
 0x2d7   :  { %v679_v14 = vpop.xlane.xlu2 %678 }
 0x2d8   :  { %v689_v15 = vsub.f32 %v602_v4, %v679_v14 }
 0x2da   :  { %v693_v16 = vmul.f32 1.442695, %v689_v15 }
 0x2db   :  { %v673_v17 = vpop.f32.mrf.mxu3 }
 0x2dc   :  { %4013 = vpow2.f32 %v693_v16  ;;  %v674_v18 = vadd.f32 %v673_v17, %v4553_v10 }
 0x2de   :  { %v686_v19 = vsel %vm676_vm8, %v674_v18, -inf }
 0x2df   :  { %687 = vmax.xlane.f32.xlu1 %v686_v19 }
 0x2e2   :  { %v4014_v20 = vpop.eup %4013 }
 0x2e3   :  { %v701_v21 = vsel %vm676_vm8, %v4014_v20, 0.0 }
 0x2e4   :  { %702 = vadd.xlane.f32.xlu2 %v701_v21 }
 0x2f8   :  { %574 = vrot.lane.b32.xlu1 %v555_v54, %s4380_s5 }
 0x338   :  { %v682_v22 = vpop.xlane.xlu0 %681 }
 0x339   :  { %v690_v23 = vsub.f32 %v626_v7, %v682_v22 }
 0x33b   :  { %v695_v24 = vmul.f32 1.442695, %v690_v23  ;;  %v3882_v23 = vld [vmem:[#allocation16 + $0x74] sm:$0xf0] }
 0x33d   :  { %4015 = vpow2.f32 %v695_v24  ;;  %v3881_v24 = vld [vmem:[#allocation16 + $0x74] sm:$0xf] }
 0x340   :  { %v685_v27 = vpop.xlane.xlu2 %684 }
 0x341   :  { %v691_v30 = vsub.f32 %v650_v12, %v685_v27 }
 0x343   :  { %v4016_v25 = vpop.eup %4015  ;;  %v697_v33 = vmul.f32 1.442695, %v691_v30  ;;  %v3879_v30 = vld [vmem:[#allocation16 + $0x64] sm:$0xf] }
 0x344   :  { %v704_v26 = vsel %vm676_vm8, %v4016_v25, 0.0 }
 0x345   :  { %705 = vadd.xlane.f32.xlu2 %v704_v26  ;;  %v3388_v26 = vld [vmem:[#allocation16 + $0x78] sm:$0xf0] }
 0x346   :  { %v3391_v27 = vor.u32 %v3881_v24, %v3388_v26 }
 0x348   :  { %1069 = vmatpush.bf16.msra.mxu0 %v3391_v27 }
 0x352   :  { %v688_v28 = vpop.xlane.xlu1 %687 }
 0x353   :  { %v692_v29 = vsub.f32 %v674_v18, %v688_v28  ;;  %v3378_v28 = vld [vmem:[#allocation16 + $0x60] sm:$0xf] }
 0x355   :  { %v699_v31 = vmul.f32 1.442695, %v692_v29  ;;  %v3880_v29 = vld [vmem:[#allocation16 + $0x64] sm:$0xf0] }
 0x357   :  { %4017 = vpow2.f32 %v699_v31  ;;  %v703_v32 = vpop.xlane.xlu2 %702  ;;  %v3379_v31 = vor.u32 %v3880_v29, %v3378_v28 }
 0x358   :  { %4019 = vrcp.f32 %v703_v32  ;;  %v3380_v32 = vld [vmem:[#allocation16 + $0x68] sm:$0xf0] }
 0x359   :  { %4021 = vpow2.f32 %v697_v33  ;;  %v3383_v33 = vor.u32 %v3879_v30, %v3380_v32 }
 0x35b   :  { %1070 = vmatpush.bf16.msra.mxu0 %v3383_v33 }
 0x35d   :  { %v4018_v34 = vpop.eup %4017  ;;  %570 = vrot.lane.b32.xlu2 %v4532_v48, %s4380_s5 }
 0x35e   :  { %v4020_v35 = vpop.eup %4019  ;;  %v710_v36 = vsel %vm676_vm8, %v4018_v34, 0.0 }
 0x35f   :  { %v717_v37 = vmul.f32 %v4020_v35, %v4014_v20  ;;  %711 = vadd.xlane.f32.xlu0 %v710_v36  ;;  %v4022_v40 = vpop.eup %4021  ;;  %v3878_v35 = vld [vmem:[#allocation16 + $0x54] sm:$0xf0]  ;;  %v3877_v36 = vld [vmem:[#allocation16 + $0x54] sm:$0xf] }
 0x360   :  { %v707_v59 = vsel %vm676_vm8, %v4022_v40, 0.0 }
 0x361   :  { %3292 = vmatmul.msk.f32.vlgmr.msra.gmra.mxu3 %vm676_vm8, %v717_v37 }
 0x367   :  { %708 = vadd.xlane.f32.xlu0 %v707_v59 }
 0x36a   :  { %v575_v41 = vpop.permute.xlu1 %574 }
 0x36b   :  { %808 = vmatpush.msrb.mxu1 %v575_v41  ;;  %v3362_v41 = vld [vmem:[#allocation16 + $0x40] sm:$0xf] }
 0x3b8   :  { %v706_v42 = vpop.xlane.xlu2 %705 }
 0x3b9   :  { %4023 = vrcp.f32 %v706_v42  ;;  %v3876_v42 = vld [vmem:[#allocation16 + $0x44] sm:$0xf0] }
 0x3bf   :  { %v4024_v43 = vpop.eup %4023 }
 0x3c0   :  { %v718_v44 = vmul.f32 %v4024_v43, %v4016_v25  ;;  %v571_v63 = vpop.permute.xlu2 %570  ;;  %v3875_v43 = vld [vmem:[#allocation16 + $0x44] sm:$0xf] }
 0x3c1   :  { %762 = vmatpush.msrb.mxu3 %v571_v63  ;;  %v3364_v63 = vld [vmem:[#allocation16 + $0x48] sm:$0xf0] }
 0x3c2   :  { %3293 = vmatmul.msk.f32.vlgmr.msrb.gmra.mxu3 %vm676_vm8, %v718_v44  ;;  %v3363_v44 = vor.u32 %v3876_v42, %v3362_v41  ;;  %v3897_v41 = vld [vmem:[#allocation18 + $0x70] sm:$0xff]  ;;  %v3890_v42 = vld [vmem:[#allocation18 + $0x38] sm:$0xff] }
 0x3c3   :  { %1249 = vmatpush.bf16.msra.mxu1 %v3890_v42 }
 0x3d2   :  { %v712_v45 = vpop.xlane.xlu0 %711 }
 0x3d3   :  { %4025 = vrcp.f32 %v712_v45  ;;  %v3367_v45 = vor.u32 %v3875_v43, %v3364_v63  ;;  %v3896_v43 = vld [vmem:[#allocation18 + $0x68] sm:$0xff] }
 0x3d4   :  { %v3888_v63 = vld [vmem:[#allocation18 + $0x28] sm:$0xff] }
 0x3d9   :  { %v4026_v46 = vpop.eup %4025 }
 0x3da   :  { %v709_v47 = vpop.xlane.xlu0 %708  ;;  %v720_v48 = vmul.f32 %v4026_v46, %v4018_v34  ;;  %v3370_v34 = vld [vmem:[#allocation16 + $0x50] sm:$0xf] }
 0x3db   :  { %4027 = vrcp.f32 %v709_v47  ;;  %v3371_v37 = vor.u32 %v3878_v35, %v3370_v34  ;;  %v3354_v46 = vld [vmem:[#allocation16 + $0x30] sm:$0xf]  ;;  %v3874_v47 = vld [vmem:[#allocation16 + $0x34] sm:$0xf0] }
 0x3dc   :  { %3295 = vmatmul.msk.f32.vlgmr.msrb.gmra.mxu1 %vm676_vm8, %v720_v48  ;;  %v3873_v48 = vld [vmem:[#allocation16 + $0x34] sm:$0xf]  ;;  %v344_v35 = vld [vmem:[#allocation12 + $0x19] ss:$0 sm:$0xff] }
 0x3e1   :  { %v4028_v49 = vpop.eup %4027 }
 0x3e2   :  { %v719_v50 = vmul.f32 %v4028_v49, %v4022_v40  ;;  %v3372_v40 = vld [vmem:[#allocation16 + $0x58] sm:$0xf0]  ;;  %v3355_v49 = vor.u32 %v3874_v47, %v3354_v46  ;;  %v3887_v46 = vld [vmem:[#allocation18 + $0x20] sm:$0xff]  ;;  %v3893_v47 = vld [vmem:[#allocation18 + $0x50] sm:$0xff] }
 0x3e3   :  { %v3375_v59 = vor.u32 %v3877_v36, %v3372_v40 }
 0x3e4   :  { %v741_v51 = vpop.f32.mrf.mxu3  ;;  %3294 = vmatmul.msk.f32.vlgmr.msrb.gmra.mxu0 %vm676_vm8, %v719_v50  ;;  %v3356_v50 = vld [vmem:[#allocation16 + $0x38] sm:$0xf0] }
 0x3e5   :  { %813 = vst.msk [vmem:[#allocation3] sm:$0xff] %vm579_vm7, %v741_v51  ;;  %1071 = vmatpush.bf16.msra.mxu0 %v3375_v59  ;;  %v3359_v51 = vor.u32 %v3873_v48, %v3356_v50  ;;  %v3886_v48 = vld [vmem:[#allocation18 + $0x18] sm:$0xff]  ;;  %v3892_v50 = vld [vmem:[#allocation18 + $0x48] sm:$0xff] }
 0x3e9   :  { %1072 = vmatpush.bf16.msra.mxu0 %v3367_v45  ;;  %v3894_v45 = vld [vmem:[#allocation18 + $0x58] sm:$0xff] }
 0x3ed   :  { %1073 = vmatpush.bf16.msra.mxu0 %v3359_v51 }
 0x445   :  { %v764_v54 = vpop.f32.mrf.mxu3 }
 0x446   :  { %815 = vrot.lane.b32.xlu0 %v764_v54, %s4380_s5  ;;  %v3871_v54 = vld [vmem:[#allocation16 + $0x24] sm:$0xf] }
 0x447   :  { %v3351_v58 = vor.u32 %v3871_v54, %v3348_v57  ;;  %v3884_v57 = vld [vmem:[#allocation18 + $0x8] sm:$0xff] }
 0x449   :  { %1074 = vmatpush.bf16.msra.mxu0 %v3351_v58 }
 0x459   :  { %v810_v60 = vpop.f32.mrf.mxu1 }
 0x45a   :  { %822 = vrot.lane.b32.xlu2 %v810_v60, %s4380_s5  ;;  %v3338_v60 = vld [vmem:[#allocation16 + $0x10] sm:$0xf] }
 0x461   :  { %v787_v61 = vpop.f32.mrf.mxu0 }
 0x462   :  { %820 = vst.msk [vmem:[#allocation3 + $0x8] sm:$0xff] %vm579_vm7, %v787_v61  ;;  %v3870_v61 = vld [vmem:[#allocation16 + $0x14] sm:$0xf0] }
 0x463   :  { %v3339_v0 = vor.u32 %v3870_v61, %v3338_v60 }
 0x4b4   :  { %v823_v3 = vpop.permute.xlu2 %822 }
 0x4b5   :  { %825 = vst.msk [vmem:[#allocation3 + $0x8] sm:$0xff] %vm818_vm9, %v823_v3  ;;  %v3343_v3 = vor.u32 %v3869_v62, %v3340_v1  ;;  %v3883_v62 = vld [vmem:[#allocation18] sm:$0xff] }
 0x4b7   :  { %1075 = vmatpush.bf16.msra.mxu0 %v3343_v3 }
 0x4b8   :  { %v816_v4 = vpop.permute.xlu0 %815 }
 0x4b9   :  { %819 = vst.msk [vmem:[#allocation3] sm:$0xff] %vm818_vm9, %v816_v4  ;;  %v3330_v4 = vld [vmem:[#allocation16] sm:$0xf] }
 0x4bc   :  { %v827_v6 = vld [vmem:[#allocation3 + $0x8] sm:$0xff] }
 0x4c0   :  { %v826_v5 = vld [vmem:[#allocation3] sm:$0xff] }
 0x4c1   :  { %v828_v7 = vpack.c.bf16 %v827_v6, %v826_v5  ;;  %v3868_v5 = vld [vmem:[#allocation16 + $0x4] sm:$0xf0]  ;;  %v3867_v6 = vld [vmem:[#allocation16 + $0x4] sm:$0xf] }
 0x4c3   :  { %901 = vmatmul.bf16.vlgmr.msrb.gmra.mxu2 %v828_v7 }
 0x546   :  { %v902_v9 = vpop.f32.mrf.mxu2 }
 0x547   :  { %v903_v11 = vadd.f32 %v902_v9, %v339_v8  ;;  %v3332_v9 = vld [vmem:[#allocation16 + $0x8] sm:$0xf0] }
 0x549   :  { %v907_v12 = vadd.f32 %v903_v11, %v4523_v38 }
 0x54b   :  { %909 = vadd.xlane.f32.xlu1 %v907_v12 }
 0x54e   :  { %v904_v13 = vpop.f32.mrf.mxu2 }
 0x54f   :  { %v905_v14 = vadd.f32 %v904_v13, %v339_v8  ;;  %v3331_v8 = vor.u32 %v3868_v5, %v3330_v4 }
 0x551   :  { %v908_v15 = vadd.f32 %v905_v14, %v4525_v39  ;;  %v3386_v39 = vld [vmem:[#allocation16 + $0x70] sm:$0xf] }
 0x552   :  { %v3387_v25 = vor.u32 %v3882_v23, %v3386_v39 }
 0x553   :  { %911 = vadd.xlane.f32.xlu2 %v908_v15 }
 0x554   :  { %1055 = vmatpush.bf16.msra.mxu3 %v3387_v25 }
 0x558   :  { %1056 = vmatpush.bf16.msra.mxu3 %v3379_v31  ;;  %v343_v31 = vld [vmem:[#allocation12 + $0x18] ss:$0 sm:$0xff] }
 0x55c   :  { %1057 = vmatpush.bf16.msra.mxu3 %v3371_v37 }
 0x560   :  { %1058 = vmatpush.bf16.msra.mxu3 %v3363_v44  ;;  %v3895_v44 = vld [vmem:[#allocation18 + $0x60] sm:$0xff] }
 0x564   :  { %1059 = vmatpush.bf16.msra.mxu3 %v3355_v49  ;;  %v341_v49 = vld [vmem:[#allocation12 + $0x6] ss:$8 sm:$0x3] }
 0x565   :  { %v972_v51 = vperm.slane %v341_v49, 1  ;;  %v971_v60 = vperm.slane %v341_v49, 0 }
 0x568   :  { %1060 = vmatpush.bf16.msra.mxu3 %v3347_v55 }
 0x56c   :  { %1061 = vmatpush.bf16.msra.mxu3 %v3339_v0 }
 0x570   :  { %1062 = vmatpush.bf16.msra.mxu3 %v3331_v8 }
 0x5be   :  { %v910_v16 = vpop.xlane.xlu1 %909 }
 0x5bf   :  { %v913_v17 = vmul.f32 %v910_v16, %v4507_v56 }
 0x5c1   :  { %v4579_v18 = vsub.f32 %v907_v12, %v913_v17  ;;  %v3335_v12 = vor.u32 %v3867_v6, %v3332_v9 }
 0x5c3   :  { %v917_v19 = vmul.f32 %v4579_v18, %v4579_v18  ;;  %1076 = vmatpush.bf16.msra.mxu0 %v3335_v12 }
 0x5c5   :  { %919 = vadd.xlane.f32.xlu0 %v917_v19 }
 0x5c6   :  { %v912_v20 = vpop.xlane.xlu2 %911 }
 0x5c7   :  { %v914_v21 = vmul.f32 %v912_v20, %v4507_v56 }
 0x5c9   :  { %v4584_v22 = vsub.f32 %v908_v15, %v914_v21 }
 0x5cb   :  { %v918_v38 = vmul.f32 %v4584_v22, %v4584_v22 }
 0x5cd   :  { %921 = vadd.xlane.f32.xlu1 %v918_v38 }
 0x638   :  { %v920_v7 = vpop.xlane.xlu0 %919 }
 0x639   :  { %v923_v11 = vmul.f32 %v920_v7, %v4507_v56 }
 0x63b   :  { %v925_v13 = vadd.f32 1e-12, %v923_v11 }
 0x63d   :  { %4029 = vrsqrt.f32 %v925_v13  ;;  %vm933_vm11 = vweird.f32 %v925_v13 }
 0x640   :  { %v922_v14 = vpop.xlane.xlu1 %921 }
 0x641   :  { %v924_v15 = vmul.f32 %v922_v14, %v4507_v56 }
 0x643   :  { %v4030_v16 = vpop.eup %4029  ;;  %v926_v17 = vadd.f32 1e-12, %v924_v15 }
 0x644   :  { %v928_v19 = vmul.f32 %v4030_v16, %v925_v13  ;;  %vm934_vm10 = vweird.f32 %v4030_v16 }
 0x645   :  { %4031 = vrsqrt.f32 %v926_v17  ;;  %vm935_vm12 = vmor %vm933_vm11, %vm934_vm10  ;;  %vm943_vm14 = vweird.f32 %v926_v17 }
 0x646   :  { %v929_v20 = vmul.f32 %v4030_v16, %v928_v19 }
 0x648   :  { %v930_v21 = vmul.f32 0.5, %v929_v20 }
 0x64a   :  { %v931_v38 = vsub.f32 1.5, %v930_v21 }
 0x64b   :  { %v4032_v39 = vpop.eup %4031 }
 0x64c   :  { %v932_v23 = vmul.f32 %v4030_v16, %v931_v38  ;;  %v938_v24 = vmul.f32 %v4032_v39, %v926_v17  ;;  %vm944_vm13 = vweird.f32 %v4032_v39 }
 0x64d   :  { %vm945_vm15 = vmor %vm943_vm14, %vm944_vm13 }
 0x64e   :  { %v939_v25 = vmul.f32 %v4032_v39, %v938_v24  ;;  %v936_v26 = vsel %vm935_vm12, %v4030_v16, %v932_v23 }
 0x64f   :  { %v947_v29 = vmul.f32 %v936_v26, %v4579_v18  ;;  %v3898_v18 = vld [vmem:[#allocation18 + $0x78] sm:$0xff] }
 0x650   :  { %v940_v27 = vmul.f32 0.5, %v939_v25  ;;  %1263 = vmatpush.bf16.msra.mxu2 %v3898_v18 }
 0x651   :  { %v949_v34 = vmul.f32 %v947_v29, %v343_v31 }
 0x652   :  { %v941_v28 = vsub.f32 1.5, %v940_v27 }
 0x653   :  { %v4592_v37 = vadd.f32 %v949_v34, %v344_v35 }
 0x654   :  { %v942_v30 = vmul.f32 %v4032_v39, %v941_v28  ;;  %1264 = vmatpush.bf16.msra.mxu2 %v3897_v41 }
 0x656   :  { %v946_v32 = vsel %vm945_vm15, %v4032_v39, %v942_v30 }
 0x657   :  { %v948_v33 = vmul.f32 %v946_v32, %v4584_v22  ;;  %v3889_v22 = vld [vmem:[#allocation18 + $0x30] sm:$0xff] }
 0x658   :  { %1265 = vmatpush.bf16.msra.mxu2 %v3896_v43  ;;  %1250 = vmatpush.bf16.msra.mxu1 %v3889_v22 }
 0x659   :  { %v950_v36 = vmul.f32 %v948_v33, %v343_v31 }
 0x65b   :  { %v4594_v40 = vadd.f32 %v950_v36, %v344_v35 }
 0x65c   :  { %1266 = vmatpush.bf16.msra.mxu2 %v3895_v44  ;;  %1251 = vmatpush.bf16.msra.mxu1 %v3888_v63  ;;  %v342_v63 = vld [vmem:[#allocation12 + $0x7] ss:$0 sm:$0xff] }
 0x65d   :  { %v953_v59 = vpack.c.bf16 %v4594_v40, %v4592_v37 }
 0x65f   :  { %1063 = vmatmul.bf16.vlgmr.msra.gmra.mxu3 %v953_v59  ;;  %1077 = vmatmul.bf16.vlgmr.msra.gmra.mxu0 %v953_v59 }
 0x660   :  { %1267 = vmatpush.bf16.msra.mxu2 %v3894_v45  ;;  %1252 = vmatpush.bf16.msra.mxu1 %v3887_v46 }
 0x664   :  { %1268 = vmatpush.bf16.msra.mxu2 %v3893_v47  ;;  %1253 = vmatpush.bf16.msra.mxu1 %v3886_v48 }
 0x668   :  { %1269 = vmatpush.bf16.msra.mxu2 %v3892_v50  ;;  %1254 = vmatpush.bf16.msra.mxu1 %v3885_v52 }
 0x66c   :  { %1270 = vmatpush.bf16.msra.mxu2 %v3891_v53  ;;  %1255 = vmatpush.bf16.msra.mxu1 %v3884_v57 }
 0x670   :  { %1256 = vmatpush.bf16.msra.mxu1 %v3883_v62 }
 0x6dc   :  { %v1078_v54 = vpop.f32.mrf.mxu0 }
 0x6dd   :  { %v1079_v55 = vadd.f32 %v1078_v54, %v972_v51 }
 0x6df   :  { %v1084_v58 = vmul.f32 %v1079_v55, %v1079_v55 }
 0x6e1   :  { %v1088_v61 = vmul.f32 %v1084_v58, %v1079_v55 }
 0x6e2   :  { %v1064_v0 = vpop.f32.mrf.mxu3 }
 0x6e3   :  { %v1092_v1 = vmul.f32 0.044715, %v1088_v61  ;;  %v1065_v3 = vadd.f32 %v1064_v0, %v971_v60 }
 0x6e4   :  { %v1080_v4 = vpop.f32.mrf.mxu0 }
 0x6e5   :  { %v1096_v5 = vadd.f32 %v1092_v1, %v1079_v55  ;;  %v1083_v6 = vmul.f32 %v1065_v3, %v1065_v3  ;;  %v1081_v7 = vadd.f32 %v1080_v4, %v972_v51  ;;  %v3921_v1 = vld [vmem:[#allocation13 + $0x170] sm:$0xf0] }
 0x6e7   :  { %v1100_v8 = vmul.f32 0.7978846, %v1096_v5  ;;  %v1087_v9 = vmul.f32 %v1083_v6, %v1065_v3  ;;  %v1086_v11 = vmul.f32 %v1081_v7, %v1081_v7  ;;  %v3544_v5 = vld [vmem:[#allocation13 + $0x174] sm:$0xf0]  ;;  %v3550_v6 = vld [vmem:[#allocation13 + $0x170] sm:$0xf] }
 0x6e9   :  { %v1091_v12 = vmul.f32 0.044715, %v1087_v9  ;;  %v1090_v13 = vmul.f32 %v1086_v11, %v1081_v7  ;;  %4033 = vtanh.f32 %v1100_v8  ;;  %v3530_v11 = vld [vmem:[#allocation13 + $0x150] sm:$0xf] }
 0x6ea   :  { %v1066_v14 = vpop.f32.mrf.mxu3 }
 0x6eb   :  { %v1095_v15 = vadd.f32 %v1091_v12, %v1065_v3  ;;  %v1094_v16 = vmul.f32 0.044715, %v1090_v13  ;;  %v1067_v17 = vadd.f32 %v1066_v14, %v971_v60  ;;  %v3918_v12 = vld [vmem:[#allocation13 + $0x158] sm:$0xf0]  ;;  %v3917_v13 = vld [vmem:[#allocation13 + $0x154] sm:$0xf] }
 0x6ec   :  { %v3531_v14 = vor.u32 %v3918_v12, %v3530_v11  ;;  %v3460_v11 = vld [vmem:[#allocation13 + $0xcc] sm:$0xf0]  ;;  %v3466_v12 = vld [vmem:[#allocation13 + $0xc8] sm:$0xf] }
 0x6ed   :  { %v1099_v19 = vmul.f32 0.7978846, %v1095_v15  ;;  %v1098_v20 = vadd.f32 %v1094_v16, %v1081_v7  ;;  %v1085_v21 = vmul.f32 %v1067_v17, %v1067_v17  ;;  %v3532_v15 = vld [vmem:[#allocation13 + $0x15c] sm:$0xf0]  ;;  %v3538_v16 = vld [vmem:[#allocation13 + $0x158] sm:$0xf] }
 0x6ef   :  { %v1102_v38 = vmul.f32 0.7978846, %v1098_v20  ;;  %v1089_v39 = vmul.f32 %v1085_v21, %v1067_v17  ;;  %4035 = vtanh.f32 %v1099_v19  ;;  %v4034_v23 = vpop.eup %4033  ;;  %v3535_v19 = vor.u32 %v3917_v13, %v3532_v15  ;;  %v3518_v21 = vld [vmem:[#allocation13 + $0x138] sm:$0xf]  ;;  %v3901_v13 = vld [vmem:[#allocation13 + $0xd0] sm:$0xf0] }
 0x6f0   :  { %v1108_v26 = vadd.f32 1.0, %v4034_v23 }
 0x6f1   :  { %4037 = vtanh.f32 %v1102_v38  ;;  %v1093_v24 = vmul.f32 0.044715, %v1089_v39  ;;  %v3915_v38 = vld [vmem:[#allocation13 + $0x140] sm:$0xf0]  ;;  %v3914_v39 = vld [vmem:[#allocation13 + $0x13c] sm:$0xf] }
 0x6f2   :  { %v1112_v30 = vmul.f32 0.5, %v1108_v26  ;;  %v3519_v23 = vor.u32 %v3915_v38, %v3518_v21  ;;  %v3916_v26 = vld [vmem:[#allocation13 + $0x148] sm:$0xf0] }
 0x6f3   :  { %v1097_v25 = vadd.f32 %v1093_v24, %v1067_v17  ;;  %v3520_v24 = vld [vmem:[#allocation13 + $0x144] sm:$0xf0] }
 0x6f4   :  { %v1116_v34 = vmul.f32 %v1112_v30, %v1079_v55  ;;  %v3912_v30 = vld [vmem:[#allocation13 + $0x128] sm:$0xf0] }
 0x6f5   :  { %v1101_v27 = vmul.f32 0.7978846, %v1097_v25  ;;  %v4036_v28 = vpop.eup %4035  ;;  %v3526_v25 = vld [vmem:[#allocation13 + $0x140] sm:$0xf] }
 0x6f6   :  { %v1107_v32 = vadd.f32 1.0, %v4036_v28  ;;  %v3527_v28 = vor.u32 %v3916_v26, %v3526_v25 }
 0x6f7   :  { %v4038_v29 = vpop.eup %4037  ;;  %4039 = vtanh.f32 %v1101_v27  ;;  %v3523_v27 = vor.u32 %v3914_v39, %v3520_v24 }
 0x6f8   :  { %v1110_v31 = vadd.f32 1.0, %v4038_v29  ;;  %v1111_v59 = vmul.f32 0.5, %v1107_v32  ;;  %v3506_v29 = vld [vmem:[#allocation13 + $0x120] sm:$0xf] }
 0x6f9   :  { %v3507_v32 = vor.u32 %v3912_v30, %v3506_v29 }
 0x6fa   :  { %v1114_v33 = vmul.f32 0.5, %v1110_v31  ;;  %v1115_v43 = vmul.f32 %v1111_v59, %v1065_v3  ;;  %v3920_v3 = vld [vmem:[#allocation13 + $0x16c] sm:$0xf]  ;;  %v3911_v31 = vld [vmem:[#allocation13 + $0x124] sm:$0xf] }
 0x6fb   :  { %v3547_v8 = vor.u32 %v3920_v3, %v3544_v5  ;;  %v3458_v5 = vld [vmem:[#allocation13 + $0xc0] sm:$0xf] }
 0x6fc   :  { %v1118_v35 = vmul.f32 %v1114_v33, %v1081_v7  ;;  %v3922_v7 = vld [vmem:[#allocation13 + $0x178] sm:$0xf0]  ;;  %v3508_v33 = vld [vmem:[#allocation13 + $0x12c] sm:$0xf0] }
 0x6fd   :  { %v4040_v36 = vpop.eup %4039  ;;  %v3551_v9 = vor.u32 %v3922_v7, %v3550_v6  ;;  %1516 = vmatpush.bf16.msrb.mxu0 %v3547_v8  ;;  %v3900_v6 = vld [vmem:[#allocation13 + $0xc8] sm:$0xf0]  ;;  %v3899_v7 = vld [vmem:[#allocation13 + $0xc4] sm:$0xf] }
 0x6fe   :  { %v1109_v18 = vadd.f32 1.0, %v4040_v36  ;;  %v1120_v41 = vpack.c.bf16 %v1118_v35, %v1116_v34  ;;  %v3514_v34 = vld [vmem:[#allocation13 + $0x128] sm:$0xf]  ;;  %v3913_v35 = vld [vmem:[#allocation13 + $0x130] sm:$0xf0]  ;;  %v3511_v36 = vor.u32 %v3911_v31, %v3508_v33  ;;  %v3463_v15 = vor.u32 %v3899_v7, %v3460_v11 }
 0x6ff   :  { %1530 = vmatpush.bf16.msrb.mxu1 %v3551_v9  ;;  %v3515_v59 = vor.u32 %v3913_v35, %v3514_v34  ;;  %v3459_v9 = vor.u32 %v3900_v6, %v3458_v5  ;;  %v345_v35 = vld [vmem:[#allocation12 + $0x1a] ss:$0 sm:$0xff] }
 0x700   :  { %v1113_v42 = vmul.f32 0.5, %v1109_v18  ;;  %1271 = vmatmul.bf16.vlgmr.msra.gmra.mxu2 %v1120_v41  ;;  %v3494_v18 = vld [vmem:[#allocation13 + $0x108] sm:$0xf]  ;;  %v3909_v41 = vld [vmem:[#allocation13 + $0x110] sm:$0xf0] }
 0x701   :  { %1517 = vmatpush.bf16.msrb.mxu0 %v3535_v19 }
 0x702   :  { %v1117_v22 = vmul.f32 %v1113_v42, %v1067_v17  ;;  %v3919_v17 = vld [vmem:[#allocation13 + $0x160] sm:$0xf0]  ;;  %v3908_v42 = vld [vmem:[#allocation13 + $0x10c] sm:$0xf] }
 0x703   :  { %v3539_v20 = vor.u32 %v3919_v17, %v3538_v16  ;;  %v3467_v16 = vor.u32 %v3901_v13, %v3466_v12 }
 0x704   :  { %v1119_v44 = vpack.c.bf16 %v1117_v22, %v1115_v43  ;;  %v3495_v43 = vor.u32 %v3909_v41, %v3494_v18  ;;  %v3496_v22 = vld [vmem:[#allocation13 + $0x114] sm:$0xf0]  ;;  %v346_v41 = vld [vmem:[#allocation12 + $0x1b] ss:$0 sm:$0xff] }
 0x705   :  { %1531 = vmatpush.bf16.msrb.mxu1 %v3539_v20  ;;  %1518 = vmatpush.bf16.msrb.mxu0 %v3523_v27 }
 0x706   :  { %1257 = vmatmul.bf16.vlgmr.msra.gmra.mxu1 %v1119_v44  ;;  %v3502_v44 = vld [vmem:[#allocation13 + $0x110] sm:$0xf] }
 0x709   :  { %1532 = vmatpush.bf16.msrb.mxu1 %v3527_v28  ;;  %1519 = vmatpush.bf16.msrb.mxu0 %v3511_v36 }
 0x70d   :  { %1533 = vmatpush.bf16.msrb.mxu1 %v3515_v59 }
 0x783   :  { %v1258_v45 = vpop.f32.mrf.mxu1  ;;  %v1272_v46 = vpop.f32.mrf.mxu2 }
 0x784   :  { %v1259_v47 = vadd.f32 %v1258_v45, %v342_v63  ;;  %v3499_v45 = vor.u32 %v3908_v42, %v3496_v22 }
 0x786   :  { %v1273_v48 = vadd.f32 %v1272_v46, %v1259_v47  ;;  %1520 = vmatpush.bf16.msrb.mxu0 %v3499_v45  ;;  %v3482_v47 = vld [vmem:[#allocation13 + $0xf0] sm:$0xf] }
 0x788   :  { %v1277_v49 = vadd.f32 %v1273_v48, %v4592_v37  ;;  %v3906_v48 = vld [vmem:[#allocation13 + $0xf8] sm:$0xf0] }
 0x78a   :  { %1279 = vadd.xlane.f32.xlu2 %v1277_v49 }
 0x78b   :  { %v1260_v50 = vpop.f32.mrf.mxu1  ;;  %v1274_v52 = vpop.f32.mrf.mxu2 }
 0x78c   :  { %v1261_v51 = vadd.f32 %v1260_v50, %v342_v63  ;;  %v3910_v63 = vld [vmem:[#allocation13 + $0x118] sm:$0xf0]  ;;  %v3483_v50 = vor.u32 %v3906_v48, %v3482_v47 }
 0x78d   :  { %v3503_v46 = vor.u32 %v3910_v63, %v3502_v44 }
 0x78e   :  { %v1275_v53 = vadd.f32 %v1274_v52, %v1261_v51  ;;  %v3484_v51 = vld [vmem:[#allocation13 + $0xfc] sm:$0xf0]  ;;  %v3490_v52 = vld [vmem:[#allocation13 + $0xf8] sm:$0xf] }
 0x78f   :  { %1534 = vmatpush.bf16.msrb.mxu1 %v3503_v46 }
 0x790   :  { %v1278_v54 = vadd.f32 %v1275_v53, %v4594_v40  ;;  %v3542_v40 = vld [vmem:[#allocation13 + $0x168] sm:$0xf]  ;;  %v3907_v53 = vld [vmem:[#allocation13 + $0x100] sm:$0xf0] }
 0x791   :  { %v3543_v4 = vor.u32 %v3921_v1, %v3542_v40  ;;  %v3478_v40 = vld [vmem:[#allocation13 + $0xe0] sm:$0xf]  ;;  %v3904_v1 = vld [vmem:[#allocation13 + $0xe8] sm:$0xf0] }
 0x792   :  { %1281 = vadd.xlane.f32.xlu0 %v1278_v54 }
 0x793   :  { %1502 = vmatpush.bf16.msrb.mxu3 %v3543_v4  ;;  %v3479_v4 = vor.u32 %v3904_v1, %v3478_v40 }
 0x797   :  { %1503 = vmatpush.bf16.msrb.mxu3 %v3531_v14 }
 0x79b   :  { %1504 = vmatpush.bf16.msrb.mxu3 %v3519_v23 }
 0x79f   :  { %1505 = vmatpush.bf16.msrb.mxu3 %v3507_v32 }
 0x7a3   :  { %1506 = vmatpush.bf16.msrb.mxu3 %v3495_v43 }
 0x7a7   :  { %1507 = vmatpush.bf16.msrb.mxu3 %v3483_v50 }
 0x7fd   :  { %v1280_v55 = vpop.xlane.xlu2 %1279 }
 0x7fe   :  { %v1283_v57 = vmul.f32 %v1280_v55, %v4507_v56  ;;  %v3491_v55 = vor.u32 %v3907_v53, %v3490_v52 }
 0x800   :  { %v4601_v58 = vsub.f32 %v1277_v49, %v1283_v57  ;;  %v3905_v49 = vld [vmem:[#allocation13 + $0xf4] sm:$0xf]  ;;  %1535 = vmatpush.bf16.msrb.mxu1 %v3491_v55  ;;  %v3470_v57 = vld [vmem:[#allocation13 + $0xd8] sm:$0xf] }
 0x802   :  { %v1287_v60 = vmul.f32 %v4601_v58, %v4601_v58 }
 0x804   :  { %1289 = vadd.xlane.f32.xlu1 %v1287_v60  ;;  %v3903_v60 = vld [vmem:[#allocation13 + $0xe0] sm:$0xf0]  ;;  %1536 = vmatpush.bf16.msrb.mxu1 %v3479_v4 }
 0x805   :  { %v1282_v61 = vpop.xlane.xlu0 %1281 }
 0x806   :  { %v1284_v37 = vmul.f32 %v1282_v61, %v4507_v56  ;;  %v3902_v61 = vld [vmem:[#allocation13 + $0xdc] sm:$0xf] }
 0x808   :  { %v4606_v62 = vsub.f32 %v1278_v54, %v1284_v37  ;;  %v3487_v54 = vor.u32 %v3905_v49, %v3484_v51  ;;  %v3471_v37 = vor.u32 %v3903_v60, %v3470_v57  ;;  %1537 = vmatpush.bf16.msrb.mxu1 %v3467_v16 }
 0x80a   :  { %v1288_v0 = vmul.f32 %v4606_v62, %v4606_v62  ;;  %1521 = vmatpush.bf16.msrb.mxu0 %v3487_v54  ;;  %1508 = vmatpush.bf16.msrb.mxu3 %v3471_v37 }
 0x80c   :  { %1291 = vadd.xlane.f32.xlu2 %v1288_v0  ;;  %v3472_v0 = vld [vmem:[#allocation13 + $0xe4] sm:$0xf0] }
 0x80d   :  { %v3475_v3 = vor.u32 %v3902_v61, %v3472_v0 }
 0x80e   :  { %1509 = vmatpush.bf16.msrb.mxu3 %v3459_v9 }
 0x80f   :  { %1522 = vmatpush.bf16.msrb.mxu0 %v3475_v3 }
 0x813   :  { %1523 = vmatpush.bf16.msrb.mxu0 %v3463_v15 }
 0x877   :  { %v1290_v8 = vpop.xlane.xlu1 %1289 }
 0x878   :  { %v1293_v14 = vmul.f32 %v1290_v8, %v4507_v56 }
 0x87a   :  { %v1295_v17 = vadd.f32 1e-12, %v1293_v14 }
 0x87c   :  { %4041 = vrsqrt.f32 %v1295_v17  ;;  %vm1303_vm1 = vweird.f32 %v1295_v17 }
 0x87f   :  { %v1292_v19 = vpop.xlane.xlu2 %1291 }
 0x880   :  { %v1294_v20 = vmul.f32 %v1292_v19, %v4507_v56 }
 0x882   :  { %v4042_v21 = vpop.eup %4041  ;;  %v1296_v38 = vadd.f32 1e-12, %v1294_v20 }
 0x883   :  { %v1298_v39 = vmul.f32 %v4042_v21, %v1295_v17  ;;  %vm1304_vm0 = vweird.f32 %v4042_v21 }
 0x884   :  { %4043 = vrsqrt.f32 %v1296_v38  ;;  %vm1305_vm2 = vmor %vm1303_vm1, %vm1304_vm0  ;;  %vm1313_vm4 = vweird.f32 %v1296_v38 }
 0x885   :  { %v1299_v23 = vmul.f32 %v4042_v21, %v1298_v39 }
 0x887   :  { %v1300_v24 = vmul.f32 0.5, %v1299_v23 }
 0x889   :  { %v1301_v25 = vsub.f32 1.5, %v1300_v24 }
 0x88a   :  { %v4044_v26 = vpop.eup %4043 }
 0x88b   :  { %v1302_v27 = vmul.f32 %v4042_v21, %v1301_v25  ;;  %v1308_v28 = vmul.f32 %v4044_v26, %v1296_v38  ;;  %vm1314_vm3 = vweird.f32 %v4044_v26 }
 0x88c   :  { %vm1315_vm5 = vmor %vm1313_vm4, %vm1314_vm3 }
 0x88d   :  { %v1309_v29 = vmul.f32 %v4044_v26, %v1308_v28  ;;  %v1306_v30 = vsel %vm1305_vm2, %v4042_v21, %v1302_v27 }
 0x88e   :  { %v1317_v33 = vmul.f32 %v1306_v30, %v4601_v58  ;;  %v1324_v58 = vld [vmem:[#allocation12 + $0x1c] ss:$8 sm:$0x7] }
 0x88f   :  { %v1310_v31 = vmul.f32 0.5, %v1309_v29  ;;  %v1369_v63 = vperm.slane %v1324_v58, 1  ;;  %v1370_v45 = vperm.slane %v1324_v58, 2  ;;  %v1368_v49 = vperm.slane %v1324_v58, 0 }
 0x890   :  { %v1319_v18 = vmul.f32 %v1317_v33, %v345_v35 }
 0x891   :  { %v1311_v32 = vsub.f32 1.5, %v1310_v31 }
 0x892   :  { %v4614_v43 = vadd.f32 %v1319_v18, %v346_v41 }
 0x893   :  { %v1312_v34 = vmul.f32 %v4044_v26, %v1311_v32 }
 0x895   :  { %v1316_v36 = vsel %vm1315_vm5, %v4044_v26, %v1312_v34  ;;  %vm3133_vm5 = vcmask 9216  }
 0x896   :  { %v1318_v59 = vmul.f32 %v1316_v36, %v4606_v62 }
 0x898   :  { %v1320_v42 = vmul.f32 %v1318_v59, %v345_v35 }
 0x89a   :  { %v4616_v22 = vadd.f32 %v1320_v42, %v346_v41 }
 0x89c   :  { %v1333_v44 = vpack.c.bf16 %v4616_v22, %v4614_v43 }
 0x89e   :  { %1510 = vmatmul.bf16.vlgmr.msrb.gmra.mxu3 %v1333_v44  ;;  %1524 = vmatmul.bf16.vlgmr.msrb.gmra.mxu0 %v1333_v44 }
 0x89f   :  { %1538 = vmatmul.bf16.vlgmr.msrb.gmra.mxu1 %v1333_v44 }
 0x91b   :  { %v1525_v46 = vpop.f32.mrf.mxu0 }
 0x91c   :  { %v1526_v47 = vadd.f32 %v1525_v46, %v1369_v63  ;;  %v1539_v48 = vpop.f32.mrf.mxu1 }
 0x91d   :  { %v1540_v62 = vadd.f32 %v1539_v48, %v1370_v45 }
 0x91e   :  { %1551 = vrot.lane.b32.xlu0 %v1526_v47, %s4380_s5  ;;  %3552 = vmatpush.xpose.msk.msrb.mxu2 %vm579_vm7, %v1526_v47 }
 0x91f   :  { %1722 = vmatpush.msra.mxu1 %v1540_v62 }
 0x921   :  { %v1511_v50 = vpop.f32.mrf.mxu3 }
 0x922   :  { %v1512_v51 = vadd.f32 %v1511_v50, %v1368_v49 }
 0x923   :  { %v1527_v52 = vpop.f32.mrf.mxu0 }
 0x924   :  { %v1528_v53 = vadd.f32 %v1527_v52, %v1369_v63  ;;  %v1541_v54 = vpop.f32.mrf.mxu1  ;;  %1545 = vrot.lane.b32.xlu1 %v1512_v51, %s4380_s5  ;;  %3553 = vmatmul.msk.f32.vlgmr.msrb.gmra.mxu2 %vm579_vm7, %v1512_v51  ;;  %v3930_v51 = vld [vmem:[#allocation15 + $0x78] sm:$0xff]  ;;  %v3929_v52 = vld [vmem:[#allocation15 + $0x70] sm:$0xff] }
 0x925   :  { %v1542_v55 = vadd.f32 %v1541_v54, %v1370_v45  ;;  %1876 = vmatpush.bf16.msrb.mxu1 %v3930_v51  ;;  %v3927_v54 = vld [vmem:[#allocation15 + $0x60] sm:$0xff] }
 0x926   :  { %1554 = vrot.lane.b32.xlu2 %v1528_v53, %s4380_s5  ;;  %3556 = vmatpush.xpose.msk.msra.mxu3 %vm579_vm7, %v1528_v53  ;;  %v3928_v53 = vld [vmem:[#allocation15 + $0x68] sm:$0xff] }
 0x929   :  { %v1513_v57 = vpop.f32.mrf.mxu3  ;;  %1877 = vmatpush.bf16.msrb.mxu1 %v3929_v52  ;;  %v3606_v52 = vld [vmem:[#allocation16 + $0x90] sm:$0xf] }
 0x92a   :  { %1768 = vmatpush.msrb.mxu3 %v1542_v55  ;;  %v1514_v60 = vadd.f32 %v1513_v57, %v1368_v49  ;;  %v3925_v57 = vld [vmem:[#allocation15 + $0x50] sm:$0xff] }
 0x92c   :  { %1548 = vrot.lane.b32.xlu0 %v1514_v60, %s4380_s5  ;;  %3557 = vmatmul.msk.f32.vlgmr.msra.gmra.mxu3 %vm579_vm7, %v1514_v60  ;;  %v3924_v60 = vld [vmem:[#allocation15 + $0x48] sm:$0xff] }
 0x92d   :  { %1878 = vmatpush.bf16.msrb.mxu1 %v3928_v53  ;;  %v3934_v53 = vld [vmem:[#allocation16 + $0x94] sm:$0xf0] }
 0x931   :  { %1879 = vmatpush.bf16.msrb.mxu1 %v3927_v54  ;;  %v3933_v54 = vld [vmem:[#allocation16 + $0x94] sm:$0xf] }
 0x980   :  { %v1555_v61 = vpop.permute.xlu2 %1554 }
 0x981   :  { %3558 = vmatpush.xpose.msk.msra.mxu0 %vm579_vm7, %v1555_v61 }
 0x990   :  { %v1552_v37 = vpop.permute.xlu0 %1551 }
 0x991   :  { %3554 = vmatpush.xpose.msk.msra.mxu2 %vm579_vm7, %v1552_v37  ;;  %v3923_v37 = vld [vmem:[#allocation15 + $0x40] sm:$0xff] }
 0x996   :  { %v1546_v0 = vpop.permute.xlu1 %1545 }
 0x997   :  { %3555 = vmatmul.msk.f32.vlgmr.msra.gmra.mxu2 %vm579_vm7, %v1546_v0 }
 0x99e   :  { %v1549_v40 = vpop.permute.xlu0 %1548 }
 0x99f   :  { %3559 = vmatmul.msk.f32.vlgmr.msra.gmra.mxu0 %vm579_vm7, %v1549_v40 }
 0x9a7   :  { %v1585_v5 = vpop.f32.mrf.mxu2 }
 0x9a8   :  { %v1586_v13 = vadd.f32 %v1585_v5, %v4547_v2 }
 0x9aa   :  { %v1660_v14 = vsel %vm676_vm8, %v1586_v13, -inf }
 0x9af   :  { %v1633_v1 = vpop.f32.mrf.mxu3 }
 0x9b0   :  { %v1634_v3 = vadd.f32 %v1633_v1, %v4553_v10 }
 0x9b2   :  { %v1666_v4 = vsel %vm676_vm8, %v1634_v3, -inf }
 0x9b3   :  { %1667 = vmax.xlane.f32.xlu2 %v1666_v4  ;;  %v1325_v4 = vld [vmem:[#allocation12 + $0x1d] ss:$0 sm:$0xff] }
 0xa1a   :  { %v1609_v6 = vpop.f32.mrf.mxu2 }
 0xa1b   :  { %v1610_v7 = vadd.f32 %v1609_v6, %v4547_v2 }
 0xa1c   :  { %v1657_v8 = vpop.f32.mrf.mxu0 }
 0xa1d   :  { %v1658_v9 = vadd.f32 %v1657_v8, %v4553_v10  ;;  %v1663_v11 = vsel %vm676_vm8, %v1610_v7, -inf }
 0xa1e   :  { %1664 = vmax.xlane.f32.xlu1 %v1663_v11 }
 0xa1f   :  { %v1669_v12 = vsel %vm676_vm8, %v1658_v9, -inf }
 0xa20   :  { %1670 = vmax.xlane.f32.xlu0 %v1669_v12 }
 0xa26   :  { %1661 = vmax.xlane.f32.xlu1 %v1660_v14  ;;  %v1668_v17 = vpop.xlane.xlu2 %1667 }
 0xa27   :  { %v1674_v10 = vsub.f32 %v1634_v3, %v1668_v17 }
 0xa29   :  { %v1680_v39 = vmul.f32 1.442695, %v1674_v10 }
 0xa3f   :  { %1557 = vrot.lane.b32.xlu1 %v1540_v62, %s4380_s5 }
 0xa91   :  { %v1665_v15 = vpop.xlane.xlu1 %1664 }
 0xa92   :  { %v1673_v16 = vsub.f32 %v1610_v7, %v1665_v15 }
 0xa93   :  { %v1671_v19 = vpop.xlane.xlu0 %1670 }
 0xa94   :  { %v1678_v20 = vmul.f32 1.442695, %v1673_v16  ;;  %v1675_v21 = vsub.f32 %v1658_v9, %v1671_v19 }
 0xa96   :  { %4045 = vpow2.f32 %v1678_v20  ;;  %v1682_v38 = vmul.f32 1.442695, %v1675_v21  ;;  %v3946_v20 = vld [vmem:[#allocation16 + $0xf4] sm:$0xf0]  ;;  %v3945_v21 = vld [vmem:[#allocation16 + $0xf4] sm:$0xf] }
 0xa98   :  { %4047 = vpow2.f32 %v1682_v38  ;;  %v3656_v38 = vld [vmem:[#allocation16 + $0xf8] sm:$0xf0] }
 0xa99   :  { %v1662_v23 = vpop.xlane.xlu1 %1661  ;;  %4049 = vpow2.f32 %v1680_v39  ;;  %v3659_v39 = vor.u32 %v3945_v21, %v3656_v38 }
 0xa9a   :  { %v1672_v26 = vsub.f32 %v1586_v13, %v1662_v23  ;;  %v3646_v23 = vld [vmem:[#allocation16 + $0xe0] sm:$0xf] }
 0xa9b   :  { %2053 = vmatpush.bf16.msra.mxu3 %v3659_v39 }
 0xa9c   :  { %v4046_v24 = vpop.eup %4045  ;;  %v1676_v28 = vmul.f32 1.442695, %v1672_v26  ;;  %v3648_v26 = vld [vmem:[#allocation16 + $0xe8] sm:$0xf0] }
 0xa9d   :  { %v1687_v2 = vsel %vm676_vm8, %v4046_v24, 0.0 }
 0xa9e   :  { %v4048_v25 = vpop.eup %4047  ;;  %1688 = vadd.xlane.f32.xlu0 %v1687_v2  ;;  %4051 = vpow2.f32 %v1676_v28  ;;  %v3943_v2 = vld [vmem:[#allocation16 + $0xe4] sm:$0xf]  ;;  %v3638_v28 = vld [vmem:[#allocation16 + $0xd0] sm:$0xf] }
 0xa9f   :  { %v1693_v27 = vsel %vm676_vm8, %v4048_v25, 0.0  ;;  %v4050_v29 = vpop.eup %4049 }
 0xaa0   :  { %1694 = vadd.xlane.f32.xlu2 %v1693_v27  ;;  %v1690_v30 = vsel %vm676_vm8, %v4050_v29, 0.0  ;;  %v3651_v27 = vor.u32 %v3943_v2, %v3648_v26 }
 0xaa2   :  { %2054 = vmatpush.bf16.msra.mxu3 %v3651_v27  ;;  %v1330_v27 = vld [vmem:[#allocation12 + $0x31] ss:$0 sm:$0xff] }
 0xaa4   :  { %v4052_v31 = vpop.eup %4051 }
 0xaa5   :  { %v1684_v32 = vsel %vm676_vm8, %v4052_v31, 0.0 }
 0xaa8   :  { %1691 = vadd.xlane.f32.xlu2 %v1690_v30  ;;  %v3941_v30 = vld [vmem:[#allocation16 + $0xd4] sm:$0xf] }
 0xab0   :  { %1685 = vadd.xlane.f32.xlu2 %v1684_v32  ;;  %v3640_v32 = vld [vmem:[#allocation16 + $0xd8] sm:$0xf0] }
 0xab1   :  { %v1558_v33 = vpop.permute.xlu1 %1557 }
 0xab2   :  { %1561 = vrot.lane.b32.xlu0 %v1542_v55, %s4380_s5  ;;  %1745 = vmatpush.msrb.mxu2 %v1558_v33  ;;  %v3926_v55 = vld [vmem:[#allocation15 + $0x58] sm:$0xff]  ;;  %v3643_v33 = vor.u32 %v3941_v30, %v3640_v32 }
 0xab3   :  { %1880 = vmatpush.bf16.msrb.mxu1 %v3926_v55  ;;  %v3607_v55 = vor.u32 %v3934_v53, %v3606_v52  ;;  %v3962_v32 = vld [vmem:[#allocation18 + $0xf8] sm:$0xff] }
 0xab4   :  { %2055 = vmatpush.bf16.msra.mxu3 %v3643_v33  ;;  %v3953_v33 = vld [vmem:[#allocation18 + $0xb0] sm:$0xff] }
 0xab7   :  { %1881 = vmatpush.bf16.msrb.mxu1 %v3925_v57  ;;  %v3608_v57 = vld [vmem:[#allocation16 + $0x98] sm:$0xf0] }
 0xabb   :  { %1882 = vmatpush.bf16.msrb.mxu1 %v3924_v60  ;;  %v3598_v60 = vld [vmem:[#allocation16 + $0x80] sm:$0xf] }
 0xabf   :  { %1883 = vmatpush.bf16.msrb.mxu1 %v3923_v37 }
 0xb11   :  { %v1689_v34 = vpop.xlane.xlu0 %1688 }
 0xb12   :  { %4053 = vrcp.f32 %v1689_v34  ;;  %v3630_v34 = vld [vmem:[#allocation16 + $0xc0] sm:$0xf] }
 0xb13   :  { %v1695_v35 = vpop.xlane.xlu2 %1694 }
 0xb14   :  { %4055 = vrcp.f32 %v1695_v35  ;;  %v3940_v35 = vld [vmem:[#allocation16 + $0xc4] sm:$0xf0] }
 0xb18   :  { %v4054_v36 = vpop.eup %4053 }
 0xb19   :  { %v1701_v59 = vmul.f32 %v4054_v36, %v4046_v24  ;;  %v3944_v24 = vld [vmem:[#allocation16 + $0xe4] sm:$0xf0]  ;;  %v3939_v36 = vld [vmem:[#allocation16 + $0xc4] sm:$0xf] }
 0xb1a   :  { %v4056_v41 = vpop.eup %4055 }
 0xb1b   :  { %v1692_v18 = vpop.xlane.xlu2 %1691  ;;  %3561 = vmatmul.msk.f32.vlgmr.msrb.gmra.mxu2 %vm676_vm8, %v1701_v59  ;;  %v1703_v63 = vmul.f32 %v4056_v41, %v4048_v25  ;;  %v3647_v25 = vor.u32 %v3944_v24, %v3646_v23  ;;  %v3631_v59 = vor.u32 %v3940_v35, %v3630_v34  ;;  %v1329_v24 = vld [vmem:[#allocation12 + $0x30] ss:$0 sm:$0xff]  ;;  %v3961_v34 = vld [vmem:[#allocation18 + $0xf0] sm:$0xff] }
 0xb1c   :  { %4057 = vrcp.f32 %v1692_v18  ;;  %v3632_v18 = vld [vmem:[#allocation16 + $0xc8] sm:$0xf0] }
 0xb1d   :  { %v3635_v41 = vor.u32 %v3939_v36, %v3632_v18  ;;  %v3960_v35 = vld [vmem:[#allocation18 + $0xe8] sm:$0xff]  ;;  %v3951_v36 = vld [vmem:[#allocation18 + $0xa0] sm:$0xff]  ;;  %v3950_v18 = vld [vmem:[#allocation18 + $0x98] sm:$0xff] }
 0xb1f   :  { %2056 = vmatpush.bf16.msra.mxu3 %v3635_v41  ;;  %v3958_v41 = vld [vmem:[#allocation18 + $0xd8] sm:$0xff] }
 0xb22   :  { %v4058_v42 = vpop.eup %4057 }
 0xb23   :  { %v1702_v44 = vmul.f32 %v4058_v42, %v4050_v29  ;;  %v1686_v58 = vpop.xlane.xlu2 %1685  ;;  %v3942_v29 = vld [vmem:[#allocation16 + $0xd4] sm:$0xf0]  ;;  %v3622_v42 = vld [vmem:[#allocation16 + $0xb0] sm:$0xf] }
 0xb24   :  { %4059 = vrcp.f32 %v1686_v58  ;;  %v1562_v45 = vpop.permute.xlu0 %1561  ;;  %v3937_v58 = vld [vmem:[#allocation16 + $0xb4] sm:$0xf] }
 0xb25   :  { %3562 = vmatmul.msk.f32.vlgmr.msrb.gmra.mxu3 %vm676_vm8, %v1702_v44  ;;  %1791 = vmatpush.msrb.mxu0 %v1562_v45  ;;  %v3938_v44 = vld [vmem:[#allocation16 + $0xb4] sm:$0xf0]  ;;  %v3624_v45 = vld [vmem:[#allocation16 + $0xb8] sm:$0xf0] }
 0xb26   :  { %3563 = vmatmul.msk.f32.vlgmr.msrb.gmra.mxu0 %vm676_vm8, %v1703_v63  ;;  %v3623_v63 = vor.u32 %v3938_v44, %v3622_v42  ;;  %v3949_v42 = vld [vmem:[#allocation18 + $0x90] sm:$0xff] }
 0xb27   :  { %v3957_v44 = vld [vmem:[#allocation18 + $0xd0] sm:$0xff] }
 0xb2a   :  { %v4060_v46 = vpop.eup %4059 }
 0xb2b   :  { %v1700_v47 = vmul.f32 %v4060_v46, %v4052_v31  ;;  %v3639_v31 = vor.u32 %v3942_v29, %v3638_v28  ;;  %v3627_v46 = vor.u32 %v3937_v58, %v3624_v45  ;;  %v1327_v58 = vld [vmem:[#allocation12 + $0x1e] ss:$8 sm:$0x3]  ;;  %v3956_v45 = vld [vmem:[#allocation18 + $0xc8] sm:$0xff] }
 0xb2d   :  { %3560 = vmatmul.msk.f32.vlgmr.msra.gmra.mxu1 %vm676_vm8, %v1700_v47  ;;  %2057 = vmatpush.bf16.msra.mxu3 %v3627_v46  ;;  %v3614_v47 = vld [vmem:[#allocation16 + $0xa0] sm:$0xf]  ;;  %v1955_v46 = vperm.slane %v1327_v58, 0 }
 0xb2e   :  { %2248 = vmatpush.bf16.msra.mxu1 %v3962_v32 }
 0xb32   :  { %2249 = vmatpush.bf16.msra.mxu1 %v3961_v34 }
 0xb36   :  { %2250 = vmatpush.bf16.msra.mxu1 %v3960_v35 }
 0xb9e   :  { %v1747_v48 = vpop.f32.mrf.mxu2 }
 0xb9f   :  { %1798 = vrot.lane.b32.xlu2 %v1747_v48, %s4380_s5  ;;  %v3936_v48 = vld [vmem:[#allocation16 + $0xa4] sm:$0xf0] }
 0xba3   :  { %v1793_v62 = vpop.f32.mrf.mxu0 }
 0xba4   :  { %1804 = vrot.lane.b32.xlu0 %v1793_v62, %s4380_s5  ;;  %v3935_v62 = vld [vmem:[#allocation16 + $0xa4] sm:$0xf] }
 0xba8   :  { %v1770_v49 = vpop.f32.mrf.mxu3 }
 0xba9   :  { %1802 = vst.msk [vmem:[#allocation3 + $0x8] sm:$0xff] %vm579_vm7, %v1770_v49  ;;  %v3615_v49 = vor.u32 %v3936_v48, %v3614_v47  ;;  %v1956_v47 = vperm.slane %v1327_v58, 1 }
 0xbaa   :  { %v1724_v50 = vpop.f32.mrf.mxu1 }
 0xbab   :  { %1796 = vst.msk [vmem:[#allocation3] sm:$0xff] %vm579_vm7, %v1724_v50  ;;  %v3616_v50 = vld [vmem:[#allocation16 + $0xa8] sm:$0xf0] }
 0xbac   :  { %v3619_v51 = vor.u32 %v3935_v62, %v3616_v50  ;;  %v3955_v50 = vld [vmem:[#allocation18 + $0xc0] sm:$0xff] }
 0xbae   :  { %2058 = vmatpush.bf16.msra.mxu3 %v3619_v51 }
 0xbf9   :  { %v1799_v61 = vpop.permute.xlu2 %1798 }
 0xbfa   :  { %1801 = vst.msk [vmem:[#allocation3] sm:$0xff] %vm818_vm9, %v1799_v61  ;;  %v3932_v61 = vld [vmem:[#allocation16 + $0x84] sm:$0xf0] }
 0xc01   :  { %v1808_v40 = vld [vmem:[#allocation3] sm:$0xff] }
 0xc16   :  { %v1805_v0 = vpop.permute.xlu0 %1804 }
 0xc17   :  { %1807 = vst.msk [vmem:[#allocation3 + $0x8] sm:$0xff] %vm818_vm9, %v1805_v0  ;;  %v3611_v0 = vor.u32 %v3933_v54, %v3608_v57 }
 0xc19   :  { %2059 = vmatpush.bf16.msra.mxu3 %v3611_v0 }
 0xc1e   :  { %v1809_v1 = vld [vmem:[#allocation3 + $0x8] sm:$0xff] }
 0xc1f   :  { %v1810_v3 = vpack.c.bf16 %v1809_v1, %v1808_v40  ;;  %v3931_v40 = vld [vmem:[#allocation16 + $0x84] sm:$0xf]  ;;  %v3600_v1 = vld [vmem:[#allocation16 + $0x88] sm:$0xf0] }
 0xc21   :  { %1884 = vmatmul.bf16.vlgmr.msrb.gmra.mxu1 %v1810_v3 }
 0xc9e   :  { %v1885_v5 = vpop.f32.mrf.mxu1 }
 0xc9f   :  { %v1886_v6 = vadd.f32 %v1885_v5, %v1325_v4  ;;  %v3603_v5 = vor.u32 %v3931_v40, %v3600_v1 }
 0xca1   :  { %v1890_v7 = vadd.f32 %v1886_v6, %v4614_v43  ;;  %2060 = vmatpush.bf16.msra.mxu3 %v3603_v5 }
 0xca3   :  { %1892 = vadd.xlane.f32.xlu1 %v1890_v7 }
 0xca6   :  { %v1887_v8 = vpop.f32.mrf.mxu1 }
 0xca7   :  { %v1888_v9 = vadd.f32 %v1887_v8, %v1325_v4  ;;  %v3599_v4 = vor.u32 %v3932_v61, %v3598_v60 }
 0xca9   :  { %v1891_v11 = vadd.f32 %v1888_v9, %v4616_v22  ;;  %v3654_v22 = vld [vmem:[#allocation16 + $0xf0] sm:$0xf] }
 0xcaa   :  { %v3655_v10 = vor.u32 %v3946_v20, %v3654_v22 }
 0xcab   :  { %1894 = vadd.xlane.f32.xlu0 %v1891_v11 }
 0xcac   :  { %2039 = vmatpush.bf16.msra.mxu2 %v3655_v10 }
 0xcb0   :  { %2040 = vmatpush.bf16.msra.mxu2 %v3647_v25 }
 0xcb4   :  { %2041 = vmatpush.bf16.msra.mxu2 %v3639_v31 }
 0xcb8   :  { %2042 = vmatpush.bf16.msra.mxu2 %v3631_v59  ;;  %v3959_v59 = vld [vmem:[#allocation18 + $0xe0] sm:$0xff] }
 0xcb9   :  { %2251 = vmatpush.bf16.msra.mxu1 %v3959_v59 }
 0xcbc   :  { %2043 = vmatpush.bf16.msra.mxu2 %v3623_v63  ;;  %v3948_v63 = vld [vmem:[#allocation18 + $0x88] sm:$0xff] }
 0xcbd   :  { %2252 = vmatpush.bf16.msra.mxu1 %v3958_v41 }
 0xcc0   :  { %2044 = vmatpush.bf16.msra.mxu2 %v3615_v49  ;;  %v3947_v49 = vld [vmem:[#allocation18 + $0x80] sm:$0xff] }
 0xcc1   :  { %2253 = vmatpush.bf16.msra.mxu1 %v3957_v44 }
 0xcc4   :  { %2045 = vmatpush.bf16.msra.mxu2 %v3607_v55 }
 0xcc5   :  { %2254 = vmatpush.bf16.msra.mxu1 %v3956_v45 }
 0xcc8   :  { %2046 = vmatpush.bf16.msra.mxu2 %v3599_v4 }
 0xcc9   :  { %2255 = vmatpush.bf16.msra.mxu1 %v3955_v50 }
 0xd16   :  { %v1893_v12 = vpop.xlane.xlu1 %1892 }
 0xd17   :  { %v1896_v13 = vmul.f32 %v1893_v12, %v4507_v56 }
 0xd19   :  { %v4659_v14 = vsub.f32 %v1890_v7, %v1896_v13 }
 0xd1b   :  { %v1900_v15 = vmul.f32 %v4659_v14, %v4659_v14 }
 0xd1d   :  { %1902 = vadd.xlane.f32.xlu2 %v1900_v15 }
 0xd1e   :  { %v1895_v16 = vpop.xlane.xlu0 %1894 }
 0xd1f   :  { %v1897_v17 = vmul.f32 %v1895_v16, %v4507_v56 }
 0xd21   :  { %v4664_v19 = vsub.f32 %v1891_v11, %v1897_v17 }
 0xd23   :  { %v1901_v43 = vmul.f32 %v4664_v19, %v4664_v19 }
 0xd25   :  { %1904 = vadd.xlane.f32.xlu1 %v1901_v43 }
 0xd90   :  { %v1903_v37 = vpop.xlane.xlu2 %1902 }
 0xd91   :  { %v1906_v3 = vmul.f32 %v1903_v37, %v4507_v56 }
 0xd93   :  { %v1908_v6 = vadd.f32 1e-12, %v1906_v3 }
 0xd95   :  { %4061 = vrsqrt.f32 %v1908_v6  ;;  %vm1916_vm8 = vweird.f32 %v1908_v6 }
 0xd98   :  { %v1905_v7 = vpop.xlane.xlu1 %1904 }
 0xd99   :  { %v1907_v8 = vmul.f32 %v1905_v7, %v4507_v56 }
 0xd9b   :  { %v4062_v9 = vpop.eup %4061  ;;  %v1909_v11 = vadd.f32 1e-12, %v1907_v8 }
 0xd9c   :  { %v1911_v12 = vmul.f32 %v4062_v9, %v1908_v6  ;;  %vm1917_vm6 = vweird.f32 %v4062_v9 }
 0xd9d   :  { %4063 = vrsqrt.f32 %v1909_v11  ;;  %vm1918_vm9 = vmor %vm1916_vm8, %vm1917_vm6  ;;  %vm1926_vm11 = vweird.f32 %v1909_v11 }
 0xd9e   :  { %v1912_v13 = vmul.f32 %v4062_v9, %v1911_v12 }
 0xda0   :  { %v1913_v15 = vmul.f32 0.5, %v1912_v13 }
 0xda2   :  { %v1914_v16 = vsub.f32 1.5, %v1913_v15 }
 0xda3   :  { %v4064_v17 = vpop.eup %4063 }
 0xda4   :  { %v1915_v43 = vmul.f32 %v4062_v9, %v1914_v16  ;;  %v1921_v22 = vmul.f32 %v4064_v17, %v1909_v11  ;;  %vm1927_vm10 = vweird.f32 %v4064_v17 }
 0xda5   :  { %vm1928_vm12 = vmor %vm1926_vm11, %vm1927_vm10 }
 0xda6   :  { %v1922_v20 = vmul.f32 %v4064_v17, %v1921_v22  ;;  %v1919_v21 = vsel %vm1918_vm9, %v4062_v9, %v1915_v43 }
 0xda7   :  { %v1930_v39 = vmul.f32 %v1919_v21, %v4659_v14  ;;  %v3954_v14 = vld [vmem:[#allocation18 + $0xb8] sm:$0xff] }
 0xda8   :  { %v1923_v10 = vmul.f32 0.5, %v1922_v20  ;;  %2234 = vmatpush.bf16.msra.mxu0 %v3954_v14 }
 0xda9   :  { %v1932_v26 = vmul.f32 %v1930_v39, %v1329_v24 }
 0xdaa   :  { %v1924_v38 = vsub.f32 1.5, %v1923_v10 }
 0xdab   :  { %v4672_v29 = vadd.f32 %v1932_v26, %v1330_v27 }
 0xdac   :  { %v1925_v23 = vmul.f32 %v4064_v17, %v1924_v38  ;;  %2235 = vmatpush.bf16.msra.mxu0 %v3953_v33 }
 0xdae   :  { %v1929_v2 = vsel %vm1928_vm12, %v4064_v17, %v1925_v23 }
 0xdaf   :  { %v1931_v25 = vmul.f32 %v1929_v2, %v4664_v19  ;;  %v3952_v19 = vld [vmem:[#allocation18 + $0xa8] sm:$0xff] }
 0xdb0   :  { %2236 = vmatpush.bf16.msra.mxu0 %v3952_v19  ;;  %v1328_v19 = vld [vmem:[#allocation12 + $0x1f] ss:$0 sm:$0xff] }
 0xdb1   :  { %v1933_v28 = vmul.f32 %v1931_v25, %v1329_v24 }
 0xdb3   :  { %v4674_v30 = vadd.f32 %v1933_v28, %v1330_v27 }
 0xdb4   :  { %2237 = vmatpush.bf16.msra.mxu0 %v3951_v36 }
 0xdb5   :  { %v1936_v31 = vpack.c.bf16 %v4674_v30, %v4672_v29 }
 0xdb7   :  { %2047 = vmatmul.bf16.vlgmr.msra.gmra.mxu2 %v1936_v31  ;;  %2061 = vmatmul.bf16.vlgmr.msra.gmra.mxu3 %v1936_v31 }
 0xdb8   :  { %2238 = vmatpush.bf16.msra.mxu0 %v3950_v18 }
 0xdbc   :  { %2239 = vmatpush.bf16.msra.mxu0 %v3949_v42 }
 0xdc0   :  { %2240 = vmatpush.bf16.msra.mxu0 %v3948_v63 }
 0xdc4   :  { %2241 = vmatpush.bf16.msra.mxu0 %v3947_v49 }
 0xe3a   :  { %v2048_v48 = vpop.f32.mrf.mxu2  ;;  %v2062_v62 = vpop.f32.mrf.mxu3 }
 0xe3b   :  { %v2049_v51 = vadd.f32 %v2048_v48, %v1955_v46  ;;  %v2063_v52 = vadd.f32 %v2062_v62, %v1956_v47 }
 0xe3d   :  { %v2067_v53 = vmul.f32 %v2049_v51, %v2049_v51  ;;  %v2068_v54 = vmul.f32 %v2063_v52, %v2063_v52 }
 0xe3f   :  { %v2071_v55 = vmul.f32 %v2067_v53, %v2049_v51  ;;  %v2072_v57 = vmul.f32 %v2068_v54, %v2063_v52  ;;  %v3977_v53 = vld [vmem:[#allocation19 + $0x74] sm:$0xf] }
 0xe41   :  { %v2075_v60 = vmul.f32 0.044715, %v2071_v55  ;;  %v2076_v61 = vmul.f32 0.044715, %v2072_v57  ;;  %v3784_v55 = vld [vmem:[#allocation19 + $0x78] sm:$0xf0] }
 0xe42   :  { %v2050_v37 = vpop.f32.mrf.mxu2  ;;  %v2064_v0 = vpop.f32.mrf.mxu3  ;;  %v3787_v57 = vor.u32 %v3977_v53, %v3784_v55  ;;  %v3982_v53 = vld [vmem:[%s5071_s10 + $0x14] sm:$0xf0] }
 0xe43   :  { %v2079_v40 = vadd.f32 %v2075_v60, %v2049_v51  ;;  %v2080_v1 = vadd.f32 %v2076_v61, %v2063_v52  ;;  %v2051_v3 = vadd.f32 %v2050_v37, %v1955_v46  ;;  %v2065_v4 = vadd.f32 %v2064_v0, %v1956_v47  ;;  %v3774_v60 = vld [vmem:[#allocation19 + $0x60] sm:$0xf]  ;;  %v3976_v61 = vld [vmem:[#allocation19 + $0x64] sm:$0xf0]  ;;  %v3975_v37 = vld [vmem:[#allocation19 + $0x64] sm:$0xf] }
 0xe44   :  { %2426 = vmatpush.bf16.msrb.mxu3 %v3787_v57  ;;  %v3775_v0 = vor.u32 %v3976_v61, %v3774_v60  ;;  %v3983_v57 = vld [vmem:[%s5071_s10 + $0x24] sm:$0xf]  ;;  %v3808_v60 = vld [vmem:[%s5071_s10 + $0x28] sm:$0xf0] }
 0xe45   :  { %v2083_v5 = vmul.f32 0.7978846, %v2079_v40  ;;  %v2069_v6 = vmul.f32 %v2051_v3, %v2051_v3  ;;  %v2070_v7 = vmul.f32 %v2065_v4, %v2065_v4  ;;  %v2084_v8 = vmul.f32 0.7978846, %v2080_v1  ;;  %v3776_v40 = vld [vmem:[#allocation19 + $0x68] sm:$0xf0] }
 0xe46   :  { %v3779_v1 = vor.u32 %v3975_v37, %v3776_v40  ;;  %v3980_v40 = vld [vmem:[%s5071_s10 + $0x4] sm:$0xf0] }
 0xe47   :  { %v2073_v9 = vmul.f32 %v2069_v6, %v2051_v3  ;;  %v2074_v11 = vmul.f32 %v2070_v7, %v2065_v4  ;;  %4065 = vtanh.f32 %v2083_v5  ;;  %v3973_v5 = vld [vmem:[#allocation19 + $0x54] sm:$0xf]  ;;  %v3768_v7 = vld [vmem:[#allocation19 + $0x58] sm:$0xf0] }
 0xe48   :  { %4067 = vtanh.f32 %v2084_v8  ;;  %2427 = vmatpush.bf16.msrb.mxu3 %v3779_v1  ;;  %v3771_v8 = vor.u32 %v3973_v5, %v3768_v7  ;;  %v4742_v1 = vor.u32 %v3983_v57, %v3808_v60  ;;  %v3800_v5 = vld [vmem:[%s5071_s10 + $0x18] sm:$0xf0]  ;;  %v3106_v60 = vld [vmem:[%s5072_s11 + $0x30] sm:$0xff] }
 0xe49   :  { %v2077_v12 = vmul.f32 0.044715, %v2073_v9  ;;  %v2078_v13 = vmul.f32 0.044715, %v2074_v11  ;;  %v3758_v9 = vld [vmem:[#allocation19 + $0x40] sm:$0xf] }
 0xe4a   :  { %v3972_v11 = vld [vmem:[#allocation19 + $0x44] sm:$0xf0] }
 0xe4b   :  { %v2081_v15 = vadd.f32 %v2077_v12, %v2051_v3  ;;  %v2082_v16 = vadd.f32 %v2078_v13, %v2065_v4  ;;  %v3971_v12 = vld [vmem:[#allocation19 + $0x44] sm:$0xf]  ;;  %v3759_v13 = vor.u32 %v3972_v11, %v3758_v9 }
 0xe4c   :  { %2428 = vmatpush.bf16.msrb.mxu3 %v3771_v8 }
 0xe4d   :  { %v2085_v17 = vmul.f32 0.7978846, %v2081_v15  ;;  %v2086_v43 = vmul.f32 0.7978846, %v2082_v16  ;;  %v4066_v22 = vpop.eup %4065  ;;  %v3760_v15 = vld [vmem:[#allocation19 + $0x48] sm:$0xf0] }
 0xe4e   :  { %v4068_v20 = vpop.eup %4067  ;;  %v2091_v21 = vadd.f32 1.0, %v4066_v22  ;;  %v3763_v16 = vor.u32 %v3971_v12, %v3760_v15  ;;  %v3969_v22 = vld [vmem:[#allocation19 + $0x34] sm:$0xf]  ;;  %v3792_v15 = vld [vmem:[%s5071_s10 + $0x8] sm:$0xf0] }
 0xe4f   :  { %4069 = vtanh.f32 %v2085_v17  ;;  %v2092_v10 = vadd.f32 1.0, %v4068_v20  ;;  %v3750_v17 = vld [vmem:[#allocation19 + $0x30] sm:$0xf] }
 0xe50   :  { %4071 = vtanh.f32 %v2086_v43  ;;  %v2095_v23 = vmul.f32 0.5, %v2091_v21  ;;  %2429 = vmatpush.bf16.msrb.mxu3 %v3763_v16  ;;  %v3970_v43 = vld [vmem:[#allocation19 + $0x34] sm:$0xf0]  ;;  %v3752_v21 = vld [vmem:[#allocation19 + $0x38] sm:$0xf0] }
 0xe51   :  { %v2096_v2 = vmul.f32 0.5, %v2092_v10  ;;  %v3751_v20 = vor.u32 %v3970_v43, %v3750_v17  ;;  %v3755_v10 = vor.u32 %v3969_v22, %v3752_v21 }
 0xe52   :  { %v2099_v28 = vmul.f32 %v2095_v23, %v2049_v51  ;;  %v3967_v23 = vld [vmem:[#allocation19 + $0x24] sm:$0xf] }
 0xe53   :  { %v2100_v14 = vmul.f32 %v2096_v2, %v2063_v52  ;;  %v3978_v52 = vld [vmem:[#allocation19 + $0x74] sm:$0xf0]  ;;  %v3744_v2 = vld [vmem:[#allocation19 + $0x28] sm:$0xf0] }
 0xe54   :  { %2430 = vmatpush.bf16.msrb.mxu3 %v3755_v10 }
 0xe55   :  { %v4070_v38 = vpop.eup %4069 }
 0xe56   :  { %v4072_v39 = vpop.eup %4071  ;;  %v2093_v24 = vadd.f32 1.0, %v4070_v38  ;;  %v3742_v38 = vld [vmem:[#allocation19 + $0x20] sm:$0xf] }
 0xe57   :  { %v2094_v25 = vadd.f32 1.0, %v4072_v39  ;;  %v3968_v39 = vld [vmem:[#allocation19 + $0x24] sm:$0xf0] }
 0xe58   :  { %v2097_v26 = vmul.f32 0.5, %v2093_v24  ;;  %v3743_v24 = vor.u32 %v3968_v39, %v3742_v38  ;;  %v1331_v39 = vld [vmem:[#allocation12 + $0x32] ss:$0 sm:$0xff] }
 0xe59   :  { %v2098_v27 = vmul.f32 0.5, %v2094_v25  ;;  %v3747_v25 = vor.u32 %v3967_v23, %v3744_v2 }
 0xe5a   :  { %v2101_v31 = vmul.f32 %v2097_v26, %v2051_v3  ;;  %v3766_v3 = vld [vmem:[#allocation19 + $0x50] sm:$0xf] }
 0xe5b   :  { %v2102_v32 = vmul.f32 %v2098_v27, %v2065_v4  ;;  %v3974_v4 = vld [vmem:[#allocation19 + $0x54] sm:$0xf0]  ;;  %2431 = vmatpush.bf16.msrb.mxu3 %v3747_v25  ;;  %v3734_v26 = vld [vmem:[#allocation19 + $0x10] sm:$0xf]  ;;  %v1332_v25 = vld [vmem:[#allocation12 + $0x33] ss:$0 sm:$0xff] }
 0xe5c   :  { %v2103_v33 = vpack.c.bf16 %v2101_v31, %v2099_v28  ;;  %v3767_v6 = vor.u32 %v3974_v4, %v3766_v3  ;;  %v3966_v27 = vld [vmem:[#allocation19 + $0x14] sm:$0xf0]  ;;  %v3965_v28 = vld [vmem:[#allocation19 + $0x14] sm:$0xf] }
 0xe5d   :  { %v2104_v34 = vpack.c.bf16 %v2102_v32, %v2100_v14  ;;  %v3735_v31 = vor.u32 %v3966_v27, %v3734_v26  ;;  %v3736_v14 = vld [vmem:[#allocation19 + $0x18] sm:$0xf0]  ;;  %v3726_v32 = vld [vmem:[#allocation19] sm:$0xf]  ;;  %v3981_v4 = vld [vmem:[%s5071_s10 + $0x14] sm:$0xf] }
 0xe5e   :  { %2242 = vmatmul.bf16.vlgmr.msra.gmra.mxu0 %v2103_v33  ;;  %v3964_v33 = vld [vmem:[#allocation19 + $0x4] sm:$0xf0]  ;;  %v4756_v9 = vor.u32 %v3981_v4, %v3800_v5 }
 0xe5f   :  { %2256 = vmatmul.bf16.vlgmr.msra.gmra.mxu1 %v2104_v34 }
 0xedb   :  { %v2243_v35 = vpop.f32.mrf.mxu0 }
 0xedc   :  { %v2244_v36 = vadd.f32 %v2243_v35, %v1328_v19  ;;  %v2257_v59 = vpop.f32.mrf.mxu1  ;;  %v3963_v35 = vld [vmem:[#allocation19 + $0x4] sm:$0xf] }
 0xede   :  { %v2258_v18 = vadd.f32 %v2257_v59, %v2244_v36  ;;  %v3728_v36 = vld [vmem:[#allocation19 + $0x8] sm:$0xf0] }
 0xee0   :  { %v2262_v41 = vadd.f32 %v2258_v18, %v4672_v29  ;;  %v3727_v18 = vor.u32 %v3964_v33, %v3726_v32 }
 0xee2   :  { %2264 = vadd.xlane.f32.xlu0 %v2262_v41 }
 0xee3   :  { %v2245_v42 = vpop.f32.mrf.mxu0 }
 0xee4   :  { %v2246_v44 = vadd.f32 %v2245_v42, %v1328_v19  ;;  %v2259_v58 = vpop.f32.mrf.mxu1  ;;  %v3739_v19 = vor.u32 %v3965_v28, %v3736_v14 }
 0xee6   :  { %v2260_v63 = vadd.f32 %v2259_v58, %v2246_v44  ;;  %2432 = vmatpush.bf16.msrb.mxu3 %v3739_v19  ;;  %v3814_v44 = vld [vmem:[%s5071_s10 + $0x30] sm:$0xf]  ;;  %v3986_v58 = vld [vmem:[%s5071_s10 + $0x34] sm:$0xf0] }
 0xee8   :  { %v2263_v45 = vadd.f32 %v2260_v63, %v4674_v30  ;;  %v3782_v30 = vld [vmem:[#allocation19 + $0x70] sm:$0xf]  ;;  %v3806_v63 = vld [vmem:[%s5071_s10 + $0x20] sm:$0xf] }
 0xee9   :  { %v3783_v54 = vor.u32 %v3978_v52, %v3782_v30 }
 0xeea   :  { %2266 = vadd.xlane.f32.xlu1 %v2263_v45 }
 0xeeb   :  { %2412 = vmatpush.bf16.msrb.mxu2 %v3783_v54 }
 0xeef   :  { %2413 = vmatpush.bf16.msrb.mxu2 %v3775_v0  ;;  %v3790_v0 = vld [vmem:[%s5071_s10] sm:$0xf] }
 0xef0   :  { %v4753_v7 = vor.u32 %v3980_v40, %v3790_v0 }
 0xef3   :  { %2414 = vmatpush.bf16.msrb.mxu2 %v3767_v6 }
 0xef7   :  { %2415 = vmatpush.bf16.msrb.mxu2 %v3759_v13  ;;  %v3979_v13 = vld [vmem:[%s5071_s10 + $0x4] sm:$0xf] }
 0xef8   :  { %v4769_v17 = vor.u32 %v3979_v13, %v3792_v15 }
 0xefb   :  { %2416 = vmatpush.bf16.msrb.mxu2 %v3751_v20  ;;  %v4385_v20 = vmov 0  }
 0xeff   :  { %2417 = vmatpush.bf16.msrb.mxu2 %v3743_v24 }
 0xf03   :  { %2418 = vmatpush.bf16.msrb.mxu2 %v3735_v31 }
 0xf07   :  { %2419 = vmatpush.bf16.msrb.mxu2 %v3727_v18 }
 0xf55   :  { %v2265_v46 = vpop.xlane.xlu0 %2264 }
 0xf56   :  { %v2268_v47 = vmul.f32 %v2265_v46, %v4507_v56  ;;  %v4700_v46 = vor.u32 %v3986_v58, %v3814_v44 }
 0xf58   :  { %v4681_v48 = vsub.f32 %v2262_v41, %v2268_v47  ;;  %v3731_v41 = vor.u32 %v3963_v35, %v3728_v36  ;;  %v3984_v47 = vld [vmem:[%s5071_s10 + $0x24] sm:$0xf0]  ;;  %2537 = vmatpush.bf16.msrb.mxu0 %v4700_v46  ;;  %2618 = vmatpush.bf16.msrb.mxu1 %v4700_v46 }
 0xf5a   :  { %v2272_v62 = vmul.f32 %v4681_v48, %v4681_v48  ;;  %2433 = vmatpush.bf16.msrb.mxu3 %v3731_v41 }
 0xf5c   :  { %2274 = vadd.xlane.f32.xlu0 %v2272_v62 }
 0xf5d   :  { %v2267_v49 = vpop.xlane.xlu1 %2266 }
 0xf5e   :  { %v2269_v29 = vmul.f32 %v2267_v49, %v4507_v56  ;;  %v4707_v49 = vor.u32 %v3984_v47, %v3806_v63  ;;  %2699 = vmatpush.bf16.msra.mxu3 %v4700_v46  ;;  %v2444_v63 = vlaneseq }
 0xf60   :  { %v4686_v50 = vsub.f32 %v2263_v45, %v2269_v29  ;;  %v3985_v29 = vld [vmem:[%s5071_s10 + $0x34] sm:$0xf]  ;;  %2538 = vmatpush.bf16.msrb.mxu0 %v4707_v49  ;;  %2619 = vmatpush.bf16.msrb.mxu1 %v4707_v49 }
 0xf62   :  { %v2273_v51 = vmul.f32 %v4686_v50, %v4686_v50  ;;  %2700 = vmatpush.bf16.msra.mxu3 %v4707_v49 }
 0xf64   :  { %2276 = vadd.xlane.f32.xlu1 %v2273_v51  ;;  %v3816_v51 = vld [vmem:[%s5071_s10 + $0x38] sm:$0xf0] }
 0xf65   :  { %v4722_v54 = vor.u32 %v3985_v29, %v3816_v51 }
 0xf67   :  { %2631 = vmatpush.bf16.msra.mxu2 %v4722_v54 }
 0xf6b   :  { %2632 = vmatpush.bf16.msra.mxu2 %v4742_v1 }
 0xf6f   :  { %2633 = vmatpush.bf16.msra.mxu2 %v4756_v9 }
 0xf73   :  { %2634 = vmatpush.bf16.msra.mxu2 %v4769_v17 }
 0xfcf   :  { %v2275_v34 = vpop.xlane.xlu0 %2274 }
 0xfd0   :  { %v2278_v59 = vmul.f32 %v2275_v34, %v4507_v56 }
 0xfd2   :  { %v2280_v42 = vadd.f32 1e-12, %v2278_v59 }
 0xfd4   :  { %4073 = vrsqrt.f32 %v2280_v42  ;;  %vm2288_vm14 = vweird.f32 %v2280_v42 }
 0xfd7   :  { %v2277_v45 = vpop.xlane.xlu1 %2276 }
 0xfd8   :  { %v2279_v62 = vmul.f32 %v2277_v45, %v4507_v56  ;;  %v3798_v56 = vld [vmem:[%s5071_s10 + $0x10] sm:$0xf] }
 0xfd9   :  { %v4733_v37 = vor.u32 %v3982_v53, %v3798_v56 }
 0xfda   :  { %v4074_v30 = vpop.eup %4073  ;;  %v2281_v52 = vadd.f32 1e-12, %v2279_v62  ;;  %v2445_v62 = vand.u32 127, %v2444_v63 }
 0xfdb   :  { %v2283_v55 = vmul.f32 %v4074_v30, %v2280_v42  ;;  %2539 = vmatpush.bf16.msrb.mxu0 %v4733_v37  ;;  %2620 = vmatpush.bf16.msrb.mxu1 %v4733_v37  ;;  %vm2289_vm13 = vweird.f32 %v4074_v30 }
 0xfdc   :  { %4075 = vrsqrt.f32 %v2281_v52  ;;  %2701 = vmatpush.bf16.msra.mxu3 %v4733_v37  ;;  %vm2290_vm15 = vmor %vm2288_vm14, %vm2289_vm13  ;;  %vm2298_vm1 = vweird.f32 %v2281_v52  ;;  %v2446_v29 = vadd.s32 128, %v2445_v62  ;;  %v2447_v53 = vand.u32 32, %v2445_v62 }
 0xfdd   :  { %v2284_v61 = vmul.f32 %v4074_v30, %v2283_v55 }
 0xfde   :  { %v2448_v55 = vand.u32 32, %v2446_v29  ;;  %vm4810_vm3 = vcmp.eq.s32.totalorder %v2447_v53, 0 }
 0xfdf   :  { %v2285_v3 = vmul.f32 0.5, %v2284_v61  ;;  %2540 = vmatpush.bf16.msrb.mxu0 %v4753_v7  ;;  %2621 = vmatpush.bf16.msrb.mxu1 %v4753_v7 }
 0xfe0   :  { %2702 = vmatpush.bf16.msra.mxu3 %v4753_v7  ;;  %vm4814_vm4 = vcmp.eq.s32.totalorder %v2448_v55, 0 }
 0xfe1   :  { %v2286_v6 = vsub.f32 1.5, %v2285_v3 }
 0xfe2   :  { %v4076_v8 = vpop.eup %4075  ;;  %2541 = vmatmul.bf16.vlgmr.msrb.gmra.mxu0 %v4385_v20 }
 0xfe3   :  { %v2287_v11 = vmul.f32 %v4074_v30, %v2286_v6  ;;  %v2293_v12 = vmul.f32 %v4076_v8, %v2281_v52  ;;  %2550 = vmatpush.bf16.msra.mxu0 %v4722_v54  ;;  %2780 = vmatpush.bf16.msra.mxu1 %v4700_v46  ;;  %vm2299_vm0 = vweird.f32 %v4076_v8 }
 0xfe4   :  { %vm2300_vm2 = vmor %vm2298_vm1, %vm2299_vm0 }
 0xfe5   :  { %v2294_v16 = vmul.f32 %v4076_v8, %v2293_v12  ;;  %v2291_v43 = vsel %vm2290_vm15, %v4074_v30, %v2287_v11 }
 0xfe6   :  { %v2302_v10 = vmul.f32 %v2291_v43, %v4681_v48 }
 0xfe7   :  { %v2295_v22 = vmul.f32 0.5, %v2294_v16  ;;  %2551 = vmatpush.bf16.msra.mxu0 %v4742_v1  ;;  %2781 = vmatpush.bf16.msra.mxu1 %v4707_v49 }
 0xfe8   :  { %v2304_v2 = vmul.f32 %v2302_v10, %v1331_v39 }
 0xfe9   :  { %v2296_v21 = vsub.f32 1.5, %v2295_v22 }
 0xfea   :  { %v2306_v27 = vadd.f32 %v2304_v2, %v1332_v25 }
 0xfeb   :  { %v2297_v38 = vmul.f32 %v4076_v8, %v2296_v21  ;;  %2552 = vmatpush.bf16.msra.mxu0 %v4756_v9  ;;  %2782 = vmatpush.bf16.msra.mxu1 %v4733_v37 }
 0xfed   :  { %v2301_v23 = vsel %vm2300_vm2, %v4076_v8, %v2297_v38 }
 0xfee   :  { %v2303_v24 = vmul.f32 %v2301_v23, %v4686_v50  ;;  %v2309_v50 = vld [vmem:[#allocation12 + $0x2] ss:$8 sm:$0x3] }
 0xfef   :  { %2553 = vmatpush.bf16.msra.mxu0 %v4769_v17  ;;  %2783 = vmatpush.bf16.msra.mxu1 %v4753_v7  ;;  %v2328_v31 = vperm.slane %v2309_v50, 0  ;;  %v2329_v14 = vperm.slane %v2309_v50, 1 }
 0xff0   :  { %v2305_v26 = vmul.f32 %v2303_v24, %v1331_v39 }
 0xff2   :  { %v2307_v48 = vadd.f32 %v2305_v26, %v1332_v25  ;;  %2554 = vmatmul.bf16.vlgmr.msra.gmra.mxu0 %v4385_v20 }
 0xff3   :  { %2712 = vmatpush.bf16.msrb.mxu0 %v4722_v54 }
 0xff4   :  { %v2310_v28 = vpack.c.bf16 %v2307_v48, %v2306_v27 }
 0xff6   :  { %2420 = vmatmul.bf16.vlgmr.msrb.gmra.mxu2 %v2310_v28  ;;  %2434 = vmatmul.bf16.vlgmr.msrb.gmra.mxu3 %v2310_v28 }
 0xff7   :  { %2713 = vmatpush.bf16.msrb.mxu0 %v4742_v1  ;;  %2793 = vmatpush.bf16.msrb.mxu2 %v4722_v54 }
 0xff8   :  { %2849 = vmatpush.bf16.msrb.mxu3 %v4700_v46 }
 0xffb   :  { %2714 = vmatpush.bf16.msrb.mxu0 %v4756_v9  ;;  %2794 = vmatpush.bf16.msrb.mxu2 %v4742_v1 }
 0xffc   :  { %2850 = vmatpush.bf16.msrb.mxu3 %v4707_v49 }
 0xfff   :  { %2715 = vmatpush.bf16.msrb.mxu0 %v4769_v17  ;;  %2795 = vmatpush.bf16.msrb.mxu2 %v4756_v9 }
0x1000   :  { %2851 = vmatpush.bf16.msrb.mxu3 %v4733_v37 }
0x1003   :  { %2862 = vmatpush.bf16.msra.mxu0 %v4722_v54  ;;  %2796 = vmatpush.bf16.msrb.mxu2 %v4769_v17 }
0x1004   :  { %2852 = vmatpush.bf16.msrb.mxu3 %v4753_v7 }
0x1007   :  { %2863 = vmatpush.bf16.msra.mxu0 %v4742_v1 }
0x100b   :  { %2864 = vmatpush.bf16.msra.mxu0 %v4756_v9 }
0x100f   :  { %2865 = vmatpush.bf16.msra.mxu0 %v4769_v17 }
0x105f   :  { %v2542_v35 = vpop.f32.mrf.mxu0 }
0x1067   :  { %v2544_v18 = vpop.f32.mrf.mxu0 }
0x106f   :  { %v2555_v58 = vpop.f32.mrf.mxu0 }
0x1077   :  { %v2557_v47 = vpop.f32.mrf.mxu0 }
0x1079   :  { %v2421_v32 = vpop.f32.mrf.mxu2  ;;  %v2435_v33 = vpop.f32.mrf.mxu3 }
0x107a   :  { %v2422_v34 = vadd.f32 %v2421_v32, %v2328_v31  ;;  %v2436_v19 = vadd.f32 %v2435_v33, %v2329_v14 }
0x107c   :  { %2440 = vst [vmem:[#allocation4] sm:$0xff] %v2422_v34 }
0x107d   :  { %2441 = vst [vmem:[#allocation4 + $0x8] sm:$0xff] %v2436_v19 }
0x1081   :  { %v2423_v36 = vpop.f32.mrf.mxu2  ;;  %v2437_v59 = vpop.f32.mrf.mxu3 }
0x1082   :  { %v2424_v42 = vadd.f32 %v2423_v36, %v2328_v31  ;;  %v2438_v44 = vadd.f32 %v2437_v59, %v2329_v14 }
0x1084   :  { %v4798_v41 = vld [vmem:[#allocation4] ss:$8 sm:$0x3]  ;;  %2442 = vst [vmem:[#allocation4 + $0x10] sm:$0xff] %v2424_v42 }
0x1085   :  { %2472 = vst [vmem:[#allocation1] ss:$9 sm:$0xff] %v4798_v41  ;;  %v4804_v51 = vld [vmem:[#allocation4 + $0x7] ss:$8 sm:$0x3] }
0x1086   :  { %2443 = vst [vmem:[#allocation4 + $0x18] sm:$0xff] %v2438_v44  ;;  %v4818_v61 = vld [vmem:[#allocation4 + $0x1] ss:$8 sm:$0x3] }
0x1087   :  { %v2584_v13 = vld [vmem:[#allocation4 + $0x6] ss:$8 sm:$0x3]  ;;  %v2661_v39 = vld [vmem:[#allocation4 + $0x2] ss:$8 sm:$0x3] }
0x1088   :  { %v2665_v25 = vld [vmem:[#allocation4 + $0x5] ss:$8 sm:$0x3]  ;;  %v2742_v28 = vld [vmem:[#allocation4 + $0x3] ss:$8 sm:$0x3] }
0x1089   :  { %v2746_v32 = vld [vmem:[#allocation4 + $0x4] ss:$8 sm:$0x3] }
0x108d   :  { %v4801_v45 = vld [vmem:[#allocation4 + $0x10] ss:$8 sm:$0x3]  ;;  %v4806_v56 = vld [vmem:[#allocation4 + $0x17] ss:$8 sm:$0x3] }
0x108e   :  { %2474 = vst [vmem:[#allocation1 + $0x1] ss:$9 sm:$0xff] %v4801_v45  ;;  %v4820_v3 = vld [vmem:[#allocation4 + $0x11] ss:$8 sm:$0x3] }
0x108f   :  { %v2586_v43 = vld [vmem:[#allocation4 + $0x16] ss:$8 sm:$0x3]  ;;  %v2663_v2 = vld [vmem:[#allocation4 + $0x12] ss:$8 sm:$0x3] }
0x1090   :  { %v2667_v48 = vld [vmem:[#allocation4 + $0x15] ss:$8 sm:$0x3]  ;;  %v2744_v14 = vld [vmem:[#allocation4 + $0x13] ss:$8 sm:$0x3] }
0x1091   :  { %v2748_v19 = vld [vmem:[#allocation4 + $0x14] ss:$8 sm:$0x3] }
0x1095   :  { %v2475_v30 = vld [vmem:[#allocation1] sm:$0xff]  ;;  %v2476_v52 = vld [vmem:[#allocation1 + $0x9] sm:$0xff] }
0x1096   :  { %2481 = vst [vmem:[#allocation1] ss:$9 sm:$0xff] %v4804_v51 }
0x1097   :  { %2483 = vst [vmem:[#allocation1 + $0x1] ss:$9 sm:$0xff] %v4806_v56 }
0x109e   :  { %v2484_v0 = vld [vmem:[#allocation1] sm:$0xff]  ;;  %v2485_v40 = vld [vmem:[#allocation1 + $0x9] sm:$0xff] }
0x109f   :  { %2589 = vst [vmem:[#allocation1] ss:$9 sm:$0xff] %v4818_v61  ;;  %v2488_v4 = vsel %vm4810_vm3, %v2475_v30, %v2484_v0  ;;  %v2489_v5 = vsel %vm4814_vm4, %v2476_v52, %v2485_v40 }
0x10a0   :  { %2591 = vst [vmem:[#allocation1 + $0x1] ss:$9 sm:$0xff] %v4820_v3  ;;  %v2559_v6 = vadd.f32 %v2542_v35, %v2488_v4  ;;  %v2560_v8 = vadd.f32 %v2555_v58, %v2489_v5 }
0x10a2   :  { %v2561_v11 = vmul.f32 0.5, %v2559_v6  ;;  %v2562_v12 = vmul.f32 0.5, %v2560_v8 }
0x10a4   :  { %4077 = vtanh.f32 %v2561_v11 }
0x10a5   :  { %4079 = vtanh.f32 %v2562_v12 }
0x10a7   :  { %v4828_v15 = vld [vmem:[#allocation1] sm:$0xff]  ;;  %v4830_v16 = vld [vmem:[#allocation1 + $0x9] sm:$0xff] }
0x10a8   :  { %2598 = vst [vmem:[#allocation1] ss:$9 sm:$0xff] %v2584_v13 }
0x10a9   :  { %2600 = vst [vmem:[#allocation1 + $0x1] ss:$9 sm:$0xff] %v2586_v43 }
0x10aa   :  { %v4078_v22 = vpop.eup %4077 }
0x10ab   :  { %v2565_v20 = vmul.f32 0.5, %v4078_v22  ;;  %v4832_v10 = vpop.eup %4079 }
0x10ad   :  { %v2566_v21 = vadd.f32 0.5, %v2565_v20 }
0x10af   :  { %v2570_v38 = vmul.f32 %v4832_v10, %v2566_v21  ;;  %v2569_v40 = vmul.f32 0.0, %v2566_v21 }
0x10b0   :  { %v4835_v23 = vld [vmem:[#allocation1] sm:$0xff]  ;;  %v4837_v24 = vld [vmem:[#allocation1 + $0x9] sm:$0xff] }
0x10b1   :  { %2670 = vst [vmem:[#allocation1] ss:$9 sm:$0xff] %v2661_v39  ;;  %2572 = vrot.lane.b32.xlu2 %v2570_v38, %s4380_s5  ;;  %v2606_v38 = vsel %vm4814_vm4, %v4830_v16, %v4837_v24 }
0x10b2   :  { %2672 = vst [vmem:[#allocation1 + $0x1] ss:$9 sm:$0xff] %v2663_v2 }
0x10b9   :  { %v4840_v26 = vld [vmem:[#allocation1] sm:$0xff]  ;;  %v4842_v27 = vld [vmem:[#allocation1 + $0x9] sm:$0xff] }
0x10ba   :  { %2679 = vst [vmem:[#allocation1] ss:$9 sm:$0xff] %v2665_v25 }
0x10bb   :  { %2681 = vst [vmem:[#allocation1 + $0x1] ss:$9 sm:$0xff] %v2667_v48 }
0x10c2   :  { %v4844_v50 = vld [vmem:[#allocation1] sm:$0xff]  ;;  %v4846_v31 = vld [vmem:[#allocation1 + $0x9] sm:$0xff] }
0x10c3   :  { %2751 = vst [vmem:[#allocation1] ss:$9 sm:$0xff] %v2742_v28 }
0x10c4   :  { %2753 = vst [vmem:[#allocation1 + $0x1] ss:$9 sm:$0xff] %v2744_v14 }
0x10cb   :  { %v4848_v33 = vld [vmem:[#allocation1] sm:$0xff]  ;;  %v4850_v34 = vld [vmem:[#allocation1 + $0x9] sm:$0xff] }
0x10cc   :  { %2760 = vst [vmem:[#allocation1] ss:$9 sm:$0xff] %v2746_v32 }
0x10cd   :  { %2762 = vst [vmem:[#allocation1 + $0x1] ss:$9 sm:$0xff] %v2748_v19 }
0x10d4   :  { %v4852_v35 = vld [vmem:[#allocation1] sm:$0xff]  ;;  %v4854_v36 = vld [vmem:[#allocation1 + $0x9] sm:$0xff] }
0x10d5   :  { %2822 = vst [vmem:[#allocation1] ss:$9 sm:$0xff] %v2746_v32 }
0x10d6   :  { %2824 = vst [vmem:[#allocation1 + $0x1] ss:$9 sm:$0xff] %v2748_v19 }
0x10dd   :  { %v4856_v59 = vld [vmem:[#allocation1] sm:$0xff]  ;;  %v4858_v18 = vld [vmem:[#allocation1 + $0x9] sm:$0xff] }
0x10de   :  { %2829 = vst [vmem:[#allocation1] ss:$9 sm:$0xff] %v2742_v28 }
0x10df   :  { %2831 = vst [vmem:[#allocation1 + $0x1] ss:$9 sm:$0xff] %v2744_v14 }
0x10e6   :  { %v4860_v42 = vld [vmem:[#allocation1] sm:$0xff]  ;;  %v4862_v44 = vld [vmem:[#allocation1 + $0x9] sm:$0xff] }
0x10e7   :  { %2891 = vst [vmem:[#allocation1] ss:$9 sm:$0xff] %v2665_v25  ;;  %v2837_v58 = vsel %vm4814_vm4, %v4858_v18, %v4862_v44  ;;  %v2836_v63 = vsel %vm4810_vm3, %v4856_v59, %v4860_v42 }
0x10e8   :  { %2893 = vst [vmem:[#allocation1 + $0x1] ss:$9 sm:$0xff] %v2667_v48 }
0x10ef   :  { %v4872_v47 = vld [vmem:[#allocation1] sm:$0xff]  ;;  %v4874_v62 = vld [vmem:[#allocation1 + $0x9] sm:$0xff] }
0x10f0   :  { %2898 = vst [vmem:[#allocation1] ss:$9 sm:$0xff] %v2661_v39 }
0x10f1   :  { %2900 = vst [vmem:[#allocation1 + $0x1] ss:$9 sm:$0xff] %v2663_v2 }
0x10f8   :  { %v4876_v29 = vld [vmem:[#allocation1] sm:$0xff]  ;;  %v4878_v30 = vld [vmem:[#allocation1 + $0x9] sm:$0xff] }
0x10f9   :  { %2960 = vst [vmem:[#allocation1] ss:$9 sm:$0xff] %v2584_v13  ;;  %v2905_v52 = vsel %vm4810_vm3, %v4872_v47, %v4876_v29  ;;  %v2906_v53 = vsel %vm4814_vm4, %v4874_v62, %v4878_v30 }
0x10fa   :  { %2962 = vst [vmem:[#allocation1 + $0x1] ss:$9 sm:$0xff] %v2586_v43 }
0x1101   :  { %v4888_v55 = vld [vmem:[#allocation1] sm:$0xff]  ;;  %v4890_v0 = vld [vmem:[#allocation1 + $0x9] sm:$0xff] }
0x1102   :  { %2967 = vst [vmem:[#allocation1] ss:$9 sm:$0xff] %v4818_v61 }
0x1103   :  { %2969 = vst [vmem:[#allocation1 + $0x1] ss:$9 sm:$0xff] %v4820_v3  ;;  %v2567_v3 = vmul.f32 0.5, %v4832_v10 }
0x1105   :  { %v2568_v12 = vadd.f32 0.5, %v2567_v3 }
0x110a   :  { %v4894_v4 = vld [vmem:[#allocation1 + $0x9] sm:$0xff]  ;;  %v4896_v5 = vld [vmem:[#allocation1] sm:$0xff] }
0x110b   :  { %v2573_v6 = vpop.permute.xlu2 %2572  ;;  %v2975_v8 = vsel %vm4814_vm4, %v4890_v0, %v4894_v4  ;;  %v2974_v11 = vsel %vm4810_vm3, %v4888_v55, %v4896_v5  ;;  %3029 = vst [vmem:[#allocation1] ss:$9 sm:$0xff] %v4804_v51 }
0x110c   :  { %v2575_v61 = vadd.f32 %v2573_v6, %v2569_v40  ;;  %3031 = vst [vmem:[#allocation1 + $0x1] ss:$9 sm:$0xff] %v4806_v56 }
0x110e   :  { %4081 = vtanh.f32 %v2575_v61 }
0x1113   :  { %v4909_v13 = vld [vmem:[#allocation1] sm:$0xff]  ;;  %v4911_v43 = vld [vmem:[#allocation1 + $0x9] sm:$0xff] }
0x1114   :  { %v4082_v22 = vpop.eup %4081  ;;  %3036 = vst [vmem:[#allocation1] ss:$9 sm:$0xff] %v4798_v41  ;;  %v2605_v41 = vsel %vm4810_vm3, %v4828_v15, %v4835_v23 }
0x1115   :  { %v4914_v20 = vmul.f32 %v4082_v22, %v2568_v12  ;;  %3038 = vst [vmem:[#allocation1 + $0x1] ss:$9 sm:$0xff] %v4801_v45 }
0x1117   :  { %v2607_v51 = vpack.c.bf16 %v4914_v20, %v4914_v20 }
0x1119   :  { %2609 = vrot.lane.b32.xlu0 %v2607_v51, %s4380_s5 }
0x118b   :  { %v2610_v56 = vpop.permute.xlu0 %2609 }
0x118c   :  { %3820 = vmatmul.msk.bf16.vlgmr.msrb.gmra.mxu1 %vm579_vm7, %v2610_v56  ;;  %3821 = vmatmul.msk.bf16.vlgmr.msra.gmra.mxu2 %vm579_vm7, %v2610_v56 }
0x118d   :  { %2918 = vmatpush.bf16.msrb.mxu1 %v4700_v46  ;;  %2931 = vmatpush.bf16.msra.mxu2 %v4722_v54 }
0x1191   :  { %2919 = vmatpush.bf16.msrb.mxu1 %v4707_v49  ;;  %2932 = vmatpush.bf16.msra.mxu2 %v4742_v1 }
0x1195   :  { %2920 = vmatpush.bf16.msrb.mxu1 %v4733_v37  ;;  %2933 = vmatpush.bf16.msra.mxu2 %v4756_v9 }
0x1199   :  { %2921 = vmatpush.bf16.msrb.mxu1 %v4753_v7  ;;  %2934 = vmatpush.bf16.msra.mxu2 %v4769_v17 }
0x1209   :  { %v2623_v45 = vpop.f32.mrf.mxu1 }
0x120a   :  { %v2640_v21 = vadd.f32 %v2623_v45, %v2605_v41  ;;  %v2687_v41 = vsel %vm4814_vm4, %v4842_v27, %v4846_v31  ;;  %v2686_v45 = vsel %vm4810_vm3, %v4840_v26, %v4844_v50 }
0x120c   :  { %v2642_v10 = vmul.f32 0.5, %v2640_v21 }
0x120e   :  { %4083 = vtanh.f32 %v2642_v10 }
0x120f   :  { %v2636_v39 = vpop.f32.mrf.mxu2 }
0x1210   :  { %v2641_v2 = vadd.f32 %v2636_v39, %v2606_v38 }
0x1211   :  { %v2625_v25 = vpop.f32.mrf.mxu1 }
0x1212   :  { %v2643_v48 = vmul.f32 0.5, %v2641_v2 }
0x1214   :  { %v4084_v28 = vpop.eup %4083  ;;  %4085 = vtanh.f32 %v2643_v48 }
0x1215   :  { %v2646_v14 = vmul.f32 0.5, %v4084_v28 }
0x1217   :  { %v2638_v32 = vpop.f32.mrf.mxu2  ;;  %v2647_v19 = vadd.f32 0.5, %v2646_v14 }
0x1219   :  { %v2650_v23 = vmul.f32 %v2647_v19, %v2575_v61 }
0x121a   :  { %v4086_v40 = vpop.eup %4085 }
0x121b   :  { %v2651_v15 = vmul.f32 %v4086_v40, %v2647_v19  ;;  %v2648_v12 = vmul.f32 0.5, %v4086_v40 }
0x121d   :  { %2653 = vrot.lane.b32.xlu1 %v2651_v15, %s4380_s5  ;;  %v2649_v22 = vadd.f32 0.5, %v2648_v12 }
0x128f   :  { %v2654_v6 = vpop.permute.xlu1 %2653 }
0x1290   :  { %v2656_v3 = vadd.f32 %v2654_v6, %v2650_v23 }
0x1292   :  { %4087 = vtanh.f32 %v2656_v3 }
0x1298   :  { %v4088_v16 = vpop.eup %4087 }
0x1299   :  { %v2658_v24 = vmul.f32 %v4088_v16, %v2649_v22 }
0x129b   :  { %v2688_v51 = vpack.c.bf16 %v2658_v24, %v2658_v24  ;;  %v2659_v6 = vadd.f32 %v2658_v24, %v4914_v20  ;;  %v2767_v20 = vsel %vm4810_vm3, %v4848_v33, %v4852_v35 }
0x129d   :  { %2690 = vrot.lane.b32.xlu0 %v2688_v51, %s4380_s5 }
0x130f   :  { %v2691_v56 = vpop.permute.xlu0 %2690 }
0x1310   :  { %3822 = vmatmul.msk.bf16.vlgmr.msra.gmra.mxu3 %vm579_vm7, %v2691_v56  ;;  %3823 = vmatmul.msk.bf16.vlgmr.msrb.gmra.mxu0 %vm579_vm7, %v2691_v56 }
0x1311   :  { %2987 = vmatpush.bf16.msra.mxu3 %v4700_v46  ;;  %3000 = vmatpush.bf16.msrb.mxu0 %v4722_v54 }
0x1315   :  { %2988 = vmatpush.bf16.msra.mxu3 %v4707_v49  ;;  %3001 = vmatpush.bf16.msrb.mxu0 %v4742_v1 }
0x1319   :  { %2989 = vmatpush.bf16.msra.mxu3 %v4733_v37  ;;  %3002 = vmatpush.bf16.msrb.mxu0 %v4756_v9 }
0x131d   :  { %2990 = vmatpush.bf16.msra.mxu3 %v4753_v7  ;;  %3003 = vmatpush.bf16.msrb.mxu0 %v4769_v17 }
0x138d   :  { %v2717_v61 = vpop.f32.mrf.mxu0 }
0x138e   :  { %v2722_v10 = vadd.f32 %v2717_v61, %v2687_v41 }
0x1390   :  { %v2724_v25 = vmul.f32 0.5, %v2722_v10 }
0x1393   :  { %v2704_v21 = vpop.f32.mrf.mxu3 }
0x1394   :  { %v2721_v38 = vadd.f32 %v2704_v21, %v2686_v45 }
0x1395   :  { %v2719_v39 = vpop.f32.mrf.mxu0 }
0x1396   :  { %v2723_v2 = vmul.f32 0.5, %v2721_v38 }
0x1398   :  { %4089 = vtanh.f32 %v2723_v2 }
0x1399   :  { %4091 = vtanh.f32 %v2724_v25 }
0x139b   :  { %v2706_v48 = vpop.f32.mrf.mxu3 }
0x139e   :  { %v4090_v28 = vpop.eup %4089 }
0x139f   :  { %v2727_v14 = vmul.f32 0.5, %v4090_v28  ;;  %v4092_v19 = vpop.eup %4091 }
0x13a0   :  { %v2729_v26 = vmul.f32 0.5, %v4092_v19 }
0x13a1   :  { %v2728_v32 = vadd.f32 0.5, %v2727_v14 }
0x13a2   :  { %v2730_v50 = vadd.f32 0.5, %v2729_v26 }
0x13a3   :  { %v2732_v40 = vmul.f32 %v4092_v19, %v2728_v32  ;;  %v2731_v27 = vmul.f32 %v2728_v32, %v2656_v3 }
0x13a5   :  { %2734 = vrot.lane.b32.xlu2 %v2732_v40, %s4380_s5 }
0x13ff   :  { %v2735_v31 = vpop.permute.xlu2 %2734 }
0x1400   :  { %v2737_v15 = vadd.f32 %v2735_v31, %v2731_v27 }
0x1402   :  { %4093 = vtanh.f32 %v2737_v15 }
0x1408   :  { %v4094_v23 = vpop.eup %4093 }
0x1409   :  { %v2739_v12 = vmul.f32 %v4094_v23, %v2730_v50 }
0x140b   :  { %v2769_v22 = vpack.c.bf16 %v2739_v12, %v2739_v12  ;;  %v2740_v16 = vadd.f32 %v2739_v12, %v2659_v6 }
0x140d   :  { %2771 = vrot.lane.b32.xlu0 %v2769_v22, %s4380_s5 }
0x147f   :  { %v2772_v51 = vpop.permute.xlu0 %2771 }
0x1480   :  { %3824 = vmatmul.msk.bf16.vlgmr.msra.gmra.mxu1 %vm579_vm7, %v2772_v51  ;;  %3825 = vmatmul.msk.bf16.vlgmr.msrb.gmra.mxu2 %vm579_vm7, %v2772_v51 }
0x1481   :  { %3056 = vmatpush.bf16.msra.mxu1 %v4700_v46  ;;  %3069 = vmatpush.bf16.msrb.mxu2 %v4722_v54 }
0x1485   :  { %3057 = vmatpush.bf16.msra.mxu1 %v4707_v49  ;;  %3070 = vmatpush.bf16.msrb.mxu2 %v4742_v1  ;;  %v2768_v49 = vsel %vm4814_vm4, %v4850_v34, %v4854_v36 }
0x1489   :  { %3058 = vmatpush.bf16.msra.mxu1 %v4733_v37  ;;  %3071 = vmatpush.bf16.msrb.mxu2 %v4756_v9 }
0x148d   :  { %3059 = vmatpush.bf16.msra.mxu1 %v4753_v7  ;;  %3072 = vmatpush.bf16.msrb.mxu2 %v4769_v17 }
0x14fd   :  { %v2785_v46 = vpop.f32.mrf.mxu1 }
0x14fe   :  { %v2802_v3 = vadd.f32 %v2785_v46, %v2767_v20 }
0x1500   :  { %v2804_v54 = vmul.f32 0.5, %v2802_v3 }
0x1502   :  { %4095 = vtanh.f32 %v2804_v54 }
0x1503   :  { %v2798_v37 = vpop.f32.mrf.mxu2 }
0x1504   :  { %v2803_v1 = vadd.f32 %v2798_v37, %v2768_v49 }
0x1505   :  { %v2787_v9 = vpop.f32.mrf.mxu1 }
0x1506   :  { %v2805_v7 = vmul.f32 0.5, %v2803_v1 }
0x1508   :  { %v4096_v24 = vpop.eup %4095  ;;  %4097 = vtanh.f32 %v2805_v7 }
0x1509   :  { %v2808_v17 = vmul.f32 0.5, %v4096_v24 }
0x150b   :  { %v2800_v56 = vpop.f32.mrf.mxu2  ;;  %v2809_v61 = vadd.f32 0.5, %v2808_v17 }
0x150d   :  { %v2812_v35 = vmul.f32 %v2809_v61, %v2737_v15 }
0x150e   :  { %v4098_v41 = vpop.eup %4097 }
0x150f   :  { %v2813_v33 = vmul.f32 %v4098_v41, %v2809_v61  ;;  %v2810_v10 = vmul.f32 0.5, %v4098_v41 }
0x1511   :  { %2815 = vrot.lane.b32.xlu2 %v2813_v33, %s4380_s5  ;;  %v2811_v38 = vadd.f32 0.5, %v2810_v10 }
0x156b   :  { %v2816_v45 = vpop.permute.xlu2 %2815 }
0x156c   :  { %v2818_v21 = vadd.f32 %v2816_v45, %v2812_v35 }
0x156e   :  { %4099 = vtanh.f32 %v2818_v21 }
0x1574   :  { %v4100_v34 = vpop.eup %4099 }
0x1575   :  { %v2820_v36 = vmul.f32 %v4100_v34, %v2811_v38 }
0x1577   :  { %v2838_v39 = vpack.c.bf16 %v2820_v36, %v2820_v36  ;;  %v2821_v2 = vadd.f32 %v2820_v36, %v2740_v16 }
0x1579   :  { %2840 = vrot.lane.b32.xlu1 %v2838_v39, %s4380_s5 }
0x15eb   :  { %v2841_v25 = vpop.permute.xlu1 %2840 }
0x15ec   :  { %3826 = vmatmul.msk.bf16.vlgmr.msrb.gmra.mxu3 %vm579_vm7, %v2841_v25  ;;  %3827 = vmatmul.msk.bf16.vlgmr.msra.gmra.mxu0 %vm579_vm7, %v2841_v25 }
0x1669   :  { %v2867_v48 = vpop.f32.mrf.mxu0 }
0x166a   :  { %v2872_v14 = vadd.f32 %v2867_v48, %v2837_v58 }
0x166c   :  { %v2874_v27 = vmul.f32 0.5, %v2872_v14 }
0x166f   :  { %v2854_v28 = vpop.f32.mrf.mxu3 }
0x1670   :  { %v2871_v32 = vadd.f32 %v2854_v28, %v2836_v63 }
0x1671   :  { %v2869_v19 = vpop.f32.mrf.mxu0 }
0x1672   :  { %v2873_v40 = vmul.f32 0.5, %v2871_v32 }
0x1674   :  { %4101 = vtanh.f32 %v2873_v40 }
0x1675   :  { %4103 = vtanh.f32 %v2874_v27 }
0x1677   :  { %v2856_v31 = vpop.f32.mrf.mxu3 }
0x167a   :  { %v4102_v15 = vpop.eup %4101 }
0x167b   :  { %v2877_v26 = vmul.f32 0.5, %v4102_v15  ;;  %v4104_v23 = vpop.eup %4103 }
0x167c   :  { %v2879_v12 = vmul.f32 0.5, %v4104_v23 }
0x167d   :  { %v2878_v50 = vadd.f32 0.5, %v2877_v26  ;;  %v3039_v26 = vld [vmem:[#allocation1] sm:$0xff] }
0x167e   :  { %v2880_v59 = vadd.f32 0.5, %v2879_v12 }
0x167f   :  { %v2882_v6 = vmul.f32 %v4104_v23, %v2878_v50  ;;  %v2881_v18 = vmul.f32 %v2878_v50, %v2818_v21  ;;  %v3043_v50 = vsel %vm4810_vm3, %v4909_v13, %v3039_v26 }
0x1681   :  { %2884 = vrot.lane.b32.xlu0 %v2882_v6, %s4380_s5 }
0x16f3   :  { %v2885_v44 = vpop.permute.xlu0 %2884 }
0x16f4   :  { %v2887_v58 = vadd.f32 %v2885_v44, %v2881_v18  ;;  %v3040_v44 = vld [vmem:[#allocation1 + $0x9] sm:$0xff] }
0x16f6   :  { %4105 = vtanh.f32 %v2887_v58 }
0x16fc   :  { %v4106_v42 = vpop.eup %4105 }
0x16fd   :  { %v2889_v63 = vmul.f32 %v4106_v42, %v2880_v59 }
0x16ff   :  { %v2907_v22 = vpack.c.bf16 %v2889_v63, %v2889_v63  ;;  %v2890_v16 = vadd.f32 %v2889_v63, %v2821_v2 }
0x1701   :  { %2909 = vrot.lane.b32.xlu2 %v2907_v22, %s4380_s5 }
0x175b   :  { %v2910_v51 = vpop.permute.xlu2 %2909 }
0x175c   :  { %3828 = vmatmul.msk.bf16.vlgmr.msrb.gmra.mxu1 %vm579_vm7, %v2910_v51  ;;  %3829 = vmatmul.msk.bf16.vlgmr.msra.gmra.mxu2 %vm579_vm7, %v2910_v51 }
0x17d9   :  { %v2923_v20 = vpop.f32.mrf.mxu1 }
0x17da   :  { %v2940_v46 = vadd.f32 %v2923_v20, %v2905_v52 }
0x17dc   :  { %v2942_v3 = vmul.f32 0.5, %v2940_v46  ;;  %v3107_v46 = vld [vmem:[%s5072_s11 + $0x38] sm:$0xff] }
0x17dd   :  { %3121 = vmatpush.msrb.mxu3 %v3107_v46 }
0x17de   :  { %4107 = vtanh.f32 %v2942_v3  ;;  %v3104_v3 = vld [vmem:[%s5072_s11 + $0x20] sm:$0xff] }
0x17df   :  { %v2936_v54 = vpop.f32.mrf.mxu2  ;;  %3122 = vmatpush.msrb.mxu3 %v3106_v60 }
0x17e0   :  { %v2941_v49 = vadd.f32 %v2936_v54, %v2906_v53  ;;  %v3103_v54 = vld [vmem:[%s5072_s11 + $0x18] sm:$0xff] }
0x17e1   :  { %v2925_v37 = vpop.f32.mrf.mxu1 }
0x17e2   :  { %v2943_v1 = vmul.f32 0.5, %v2941_v49  ;;  %v3102_v49 = vld [vmem:[%s5072_s11 + $0x10] sm:$0xff]  ;;  %v3101_v37 = vld [vmem:[%s5072_s11 + $0x8] sm:$0xff] }
0x17e4   :  { %v4108_v9 = vpop.eup %4107  ;;  %4109 = vtanh.f32 %v2943_v1  ;;  %v3100_v1 = vld [vmem:[%s5072_s11] sm:$0xff] }
0x17e5   :  { %v2946_v7 = vmul.f32 0.5, %v4108_v9 }
0x17e7   :  { %v2938_v24 = vpop.f32.mrf.mxu2  ;;  %v2947_v17 = vadd.f32 0.5, %v2946_v7 }
0x17e9   :  { %v2950_v47 = vmul.f32 %v2947_v17, %v2887_v58  ;;  %v3044_v58 = vsel %vm4814_vm4, %v4911_v43, %v3040_v44  ;;  %v3105_v43 = vld [vmem:[%s5072_s11 + $0x28] sm:$0xff]  ;;  %s3140_s11 = sshll.u32 %s4386_s9, 4  ;;  %s3141_s11 = int_to_ptr.vmem [resolvable:$true] %s3140_s11 }
0x17ea   :  { %v4110_v56 = vpop.eup %4109  ;;  %3123 = vmatpush.msrb.mxu3 %v3105_v43 }
0x17eb   :  { %v2951_v61 = vmul.f32 %v4110_v56, %v2947_v17  ;;  %v2948_v41 = vmul.f32 0.5, %v4110_v56 }
0x17ec   :  { %3124 = vmatpush.msrb.mxu3 %v3104_v3 }
0x17ed   :  { %2953 = vrot.lane.b32.xlu1 %v2951_v61, %s4380_s5  ;;  %v2949_v33 = vadd.f32 0.5, %v2948_v41 }
0x17ee   :  { %3125 = vmatpush.msrb.mxu3 %v3103_v54 }
0x17f0   :  { %3126 = vmatpush.msrb.mxu3 %v3102_v49 }
0x17f2   :  { %3127 = vmatpush.msrb.mxu3 %v3101_v37 }
0x17f4   :  { %3128 = vmatpush.msrb.mxu3 %v3100_v1 }
0x185f   :  { %v2954_v29 = vpop.permute.xlu1 %2953 }
0x1860   :  { %v2956_v52 = vadd.f32 %v2954_v29, %v2950_v47 }
0x1862   :  { %4111 = vtanh.f32 %v2956_v52 }
0x1868   :  { %v4112_v35 = vpop.eup %4111 }
0x1869   :  { %v2958_v62 = vmul.f32 %v4112_v35, %v2949_v33  ;;  %v3099_v33 = vld [vmem:[#allocation12 + $0x3] ss:$0 sm:$0xff] }
0x186b   :  { %v2976_v30 = vpack.c.bf16 %v2958_v62, %v2958_v62  ;;  %v2959_v53 = vadd.f32 %v2958_v62, %v2890_v16 }
0x186d   :  { %2978 = vrot.lane.b32.xlu0 %v2976_v30, %s4380_s5 }
0x18df   :  { %v2979_v45 = vpop.permute.xlu0 %2978 }
0x18e0   :  { %3830 = vmatmul.msk.bf16.vlgmr.msra.gmra.mxu3 %vm579_vm7, %v2979_v45  ;;  %3831 = vmatmul.msk.bf16.vlgmr.msrb.gmra.mxu0 %vm579_vm7, %v2979_v45 }
0x195d   :  { %v3005_v21 = vpop.f32.mrf.mxu0 }
0x195e   :  { %v3010_v38 = vadd.f32 %v3005_v21, %v2975_v8 }
0x1960   :  { %v3012_v2 = vmul.f32 0.5, %v3010_v38 }
0x1963   :  { %v2992_v10 = vpop.f32.mrf.mxu3 }
0x1964   :  { %v3009_v34 = vadd.f32 %v2992_v10, %v2974_v11 }
0x1965   :  { %v3007_v36 = vpop.f32.mrf.mxu0 }
0x1966   :  { %v3011_v39 = vmul.f32 0.5, %v3009_v34 }
0x1968   :  { %4113 = vtanh.f32 %v3011_v39 }
0x1969   :  { %4115 = vtanh.f32 %v3012_v2 }
0x196b   :  { %v2994_v25 = vpop.f32.mrf.mxu3 }
0x196e   :  { %v4114_v48 = vpop.eup %4113 }
0x196f   :  { %v3015_v28 = vmul.f32 0.5, %v4114_v48  ;;  %v4116_v32 = vpop.eup %4115 }
0x1970   :  { %v3017_v40 = vmul.f32 0.5, %v4116_v32 }
0x1971   :  { %v3016_v14 = vadd.f32 0.5, %v3015_v28 }
0x1972   :  { %v3018_v55 = vadd.f32 0.5, %v3017_v40 }
0x1973   :  { %v3020_v19 = vmul.f32 %v4116_v32, %v3016_v14  ;;  %v3019_v0 = vmul.f32 %v3016_v14, %v2956_v52 }
0x1975   :  { %3022 = vrot.lane.b32.xlu2 %v3020_v19, %s4380_s5 }
0x19cf   :  { %v3023_v4 = vpop.permute.xlu2 %3022 }
0x19d0   :  { %v3025_v8 = vadd.f32 %v3023_v4, %v3019_v0 }
0x19d2   :  { %4117 = vtanh.f32 %v3025_v8 }
0x19d8   :  { %v4118_v5 = vpop.eup %4117 }
0x19d9   :  { %v3027_v11 = vmul.f32 %v4118_v5, %v3018_v55 }
0x19db   :  { %v3045_v27 = vpack.c.bf16 %v3027_v11, %v3027_v11  ;;  %v3028_v31 = vadd.f32 %v3027_v11, %v2959_v53 }
0x19dd   :  { %3047 = vrot.lane.b32.xlu1 %v3045_v27, %s4380_s5 }
0x1a4f   :  { %v3048_v15 = vpop.permute.xlu1 %3047 }
0x1a50   :  { %3832 = vmatmul.msk.bf16.vlgmr.msra.gmra.mxu1 %vm579_vm7, %v3048_v15  ;;  %3833 = vmatmul.msk.bf16.vlgmr.msrb.gmra.mxu2 %vm579_vm7, %v3048_v15 }
0x1acd   :  { %v3061_v23 = vpop.f32.mrf.mxu1 }
0x1ace   :  { %v3078_v6 = vadd.f32 %v3061_v23, %v3043_v50 }
0x1ad0   :  { %v3080_v18 = vmul.f32 0.5, %v3078_v6 }
0x1ad2   :  { %4119 = vtanh.f32 %v3080_v18 }
0x1ad3   :  { %v3074_v12 = vpop.f32.mrf.mxu2 }
0x1ad4   :  { %v3079_v59 = vadd.f32 %v3074_v12, %v3044_v58 }
0x1ad5   :  { %v3063_v42 = vpop.f32.mrf.mxu1 }
0x1ad6   :  { %v3081_v63 = vmul.f32 0.5, %v3079_v59 }
0x1ad8   :  { %v4120_v22 = vpop.eup %4119  ;;  %4121 = vtanh.f32 %v3081_v63 }
0x1ad9   :  { %v3084_v16 = vmul.f32 0.5, %v4120_v22 }
0x1adb   :  { %v3076_v51 = vpop.f32.mrf.mxu2  ;;  %v3085_v20 = vadd.f32 0.5, %v3084_v16 }
0x1add   :  { %v3088_v9 = vmul.f32 %v3085_v20, %v3025_v8 }
0x1ade   :  { %v4122_v57 = vpop.eup %4121 }
0x1adf   :  { %v3089_v13 = vmul.f32 %v4122_v57, %v3085_v20  ;;  %v3086_v17 = vmul.f32 0.5, %v4122_v57 }
0x1ae1   :  { %3091 = vrot.lane.b32.xlu0 %v3089_v13, %s4380_s5  ;;  %v3087_v56 = vadd.f32 0.5, %v3086_v17 }
0x1b53   :  { %v3092_v7 = vpop.permute.xlu0 %3091 }
0x1b54   :  { %v3094_v24 = vadd.f32 %v3092_v7, %v3088_v9 }
0x1b56   :  { %4123 = vtanh.f32 %v3094_v24 }
0x1b5c   :  { %v4124_v61 = vpop.eup %4123 }
0x1b5d   :  { %v3096_v47 = vmul.f32 %v4124_v61, %v3087_v56 }
0x1b5f   :  { %v3097_v29 = vadd.f32 %v3096_v47, %v3028_v31 }
0x1b61   :  { %v3098_v52 = vmul.f32 0.125, %v3097_v29 }
0x1b63   :  { %3109 = vrot.lane.b32.xlu2 %v3098_v52, %s4380_s5 }
0x1bbd   :  { %v3110_v41 = vpop.permute.xlu2 %3109 }
0x1bbe   :  { %3834 = vmatmul.msk.f32.vlgmr.msrb.gmra.mxu3 %vm579_vm7, %v3110_v41 }
0x1c41   :  { %v3130_v35 = vpop.f32.mrf.mxu3 }
0x1c42   :  { %v3131_v62 = vadd.f32 %v3130_v35, %v3099_v33 }
0x1c44   :  { %3134 = vst.msk [vmem:[#allocation21] sm:$0x3] %vm3133_vm5, %v3131_v62 }
0x1c45   :  { %3145 = dma.vmem_to_hbm [thread:$0]  %s3141_s11, 32, %s3143_s30, [#allocation7]  }
0x1c46   :  { %4365 = dma.done.wait [#allocation7], 32  }
0x1c47   :  { %4366 = vsyncadd [#allocation7], 4294967264 }
0x1c48   :  { %3150 = vsyncpa [#allocation6], 1 }
0x1c49   :  { %3151 = vsyncpa [#allocation11], 1 }
0x1c4a   :  { %3152 = vsyncpa [#allocation14], 1 }
0x1c4b   :  { %3153 = vsyncpa [#allocation17], 1 }
0x1c4c   :  { %3154 = vsyncpa [#allocation20], 1 }
0x1c4d   :  { %3155 = vsyncpa [#allocation7], 1 }
0x1c4e   :  { %3156 = vsyncpa [#allocation8], 1 }

</bundles_post_ra>
